<compile_context>
chip_gen: v7x
topology: tpu7x:2x2x1
jax: 0.10.0
libtpu: 0.0.40
codegen_flags: <defaults>
</compile_context>

<pallas_src>
import math
import jax
import jax.numpy as jnp
from jax.experimental import pallas as pl
from jax.experimental.pallas import tpu as pltpu

# Keep the tiny wrapper-side constant folds and the pure-JAX reference in true
# f32 so the self-check tolerance can stay tight (does not affect the kernel).
jax.config.update("jax_default_matmul_precision", "highest")

N_HEADS = 8
LN_EPS = 1e-6


def encoder_attn_kernel(x_ref, weff_ref, ceff_ref, m_ref, beff_ref, out_ref):
    """Fused single-query multi-head attention for one batch block.

    x_ref   : (B_blk, D, L)  feature block, native (channels, H*W) layout
    weff_ref: (H, D)         folded (q / sqrt(hd)) . Wk  -> score weights
    ceff_ref: (H, 1)         folded (q / sqrt(hd)) . bk  -> score bias
    m_ref   : (H*D, D)       folded Wv -> Wo projection
    beff_ref: (1, D)         folded bo + Wo @ bv
    out_ref : (B_blk, D)     holistic features
    """
    b_blk = x_ref.shape[0]
    hd_total = m_ref.shape[0]                       # H * D

    x = x_ref[...]                                  # (B, D, L)
    weff = weff_ref[...]                            # (H, D)
    ceff = ceff_ref[...].astype(jnp.float32)        # (H, 1) -> broadcasts (1,H,1)
    m = m_ref[...]                                  # (H*D, D)
    beff = beff_ref[...].astype(jnp.float32)        # (1, D)

    # All-head scores for the whole block in one batched MXU contraction:
    #   s[b, h, l] = sum_d weff[h, d] * x[b, d, l]   (+ folded key bias)
    weff_b = jnp.broadcast_to(weff, (b_blk,) + weff.shape)          # tiny, hoisted
    s = jnp.einsum("bhd,bdl->bhl", weff_b, x,
                   preferred_element_type=jnp.float32) + ceff

    # Numerically stable softmax over the L keys (lane reduction), f32 math.
    s_max = jnp.max(s, axis=-1, keepdims=True)
    p = jnp.exp(s - s_max)                                          # unnormalized
    denom = jnp.sum(p, axis=-1, keepdims=True)                      # (B, H, 1)

    # Attention-weighted sum of the raw features, then normalize the context
    # (B*H*D multiplies instead of B*H*L divides).
    ctx = jnp.einsum("bhl,bdl->bhd", p.astype(x.dtype), x,
                     preferred_element_type=jnp.float32)
    ctx = ctx * (1.0 / denom)                                       # (B, H, D)

    # Fused V + O projection: one (B, H*D) @ (H*D, D) matmul for the block.
    ctx_flat = ctx.reshape(b_blk, hd_total).astype(m.dtype)
    out = jnp.dot(ctx_flat, m, preferred_element_type=jnp.float32) + beff
    out_ref[...] = out.astype(out_ref.dtype)
    # TODO(synk): nn.Dropout is eval-mode identity here; training-time dropout
    # on the attention map / output is not implemented.


def _fold_constants(params, n_heads=N_HEADS):
    """Fold the constant START-token query through LN / fc_q / fc_k and fuse
    fc_v with fc_o.  All results are tiny (<= (H*D, D)); computed in f32."""
    wq, bq = params["wq"], params["bq"]
    wk, bk = params["wk"], params["bk"]
    wv, bv = params["wv"], params["bv"]
    wo, bo = params["wo"], params["bo"]
    D = wq.shape[0]
    hd = D // n_heads

    q0 = params["emb"][params["start_token"]].astype(jnp.float32)       # (D,)
    mu = jnp.mean(q0)
    var = jnp.mean((q0 - mu) ** 2)                                       # biased (nn.LayerNorm)
    qn = (q0 - mu) * jax.lax.rsqrt(var + LN_EPS) * params["ln_g"] + params["ln_b"]
    qp = wq @ qn + bq                                                    # fc_q(LayerNorm(emb))
    qs = (qp / math.sqrt(hd)).reshape(n_heads, hd)                       # (H, hd), scale folded

    wk_r = wk.reshape(n_heads, hd, D)
    weff = jnp.einsum("hd,hdc->hc", qs, wk_r)                            # (H, D)
    ceff = jnp.einsum("hd,hd->h", qs, bk.reshape(n_heads, hd)).reshape(n_heads, 1)

    wv_r = wv.reshape(n_heads, hd, D)
    wo_r = wo.reshape(D, n_heads, hd)
    m = jnp.einsum("hdc,jhd->hcj", wv_r, wo_r).reshape(n_heads * D, D)   # (H*D, D)
    beff = (bo + wo @ bv).reshape(1, D)
    return weff, ceff, m, beff


def _pick_block_b(B, block_b, D, L, itemsize):
    """Batch rows per grid step: whole batch if it fits comfortably in VMEM,
    otherwise a sublane-friendly multiple of 8 clamped by a VMEM budget."""
    budget = 24 * 1024 * 1024                       # headroom under scoped-VMEM default
    per_row = 2 * D * L * itemsize                  # double-buffered input block
    max_rows = max(8, budget // max(per_row, 1))
    if B <= min(block_b, max_rows):
        return B
    b = min(block_b, max_rows)
    return max(8, (b // 8) * 8)


def encoder_forward(x, params, *, block_b=32, compute_dtype=None):
    """x: (B, C, H, W) NCHW with C == hidden_dim.  Returns (B, hidden_dim)."""
    B, C, Hh, Ww = x.shape
    D = C
    L = Hh * Ww
    assert D % N_HEADS == 0

    # native layout: (B, D, L) — the big feature map is NOT transposed in HBM
    x_flat = x.reshape(B, D, L)
    weff, ceff, m_flat, beff = _fold_constants(params)

    if compute_dtype is not None:
        x_flat = x_flat.astype(compute_dtype)
        weff = weff.astype(compute_dtype)
        m_flat = m_flat.astype(compute_dtype)

    b_blk = _pick_block_b(B, block_b, D, L, x_flat.dtype.itemsize)
    b_pad = pl.cdiv(B, b_blk) * b_blk
    if b_pad != B:
        x_flat = jnp.pad(x_flat, ((0, b_pad - B), (0, 0), (0, 0)))

    def replicated(shape):
        nd = len(shape)
        return pl.BlockSpec(shape, lambda i, nd=nd: (0,) * nd)

    out = pl.pallas_call(
        encoder_attn_kernel,
        out_shape=jax.ShapeDtypeStruct((b_pad, D), x.dtype),
        grid_spec=pltpu.PrefetchScalarGridSpec(
            num_scalar_prefetch=0,
            grid=(b_pad // b_blk,),
            in_specs=[
                pl.BlockSpec((b_blk, D, L), lambda i: (i, 0, 0)),   # x block
                replicated((N_HEADS, D)),                           # w_eff
                replicated((N_HEADS, 1)),                           # c_eff
                replicated((N_HEADS * D, D)),                       # m_flat
                replicated((1, D)),                                 # b_eff
            ],
            out_specs=pl.BlockSpec((b_blk, D), lambda i: (i, 0)),
        ),
        compiler_params=pltpu.CompilerParams(
            dimension_semantics=("parallel",)),      # batch axis -> megacore
    )(x_flat, weff, ceff, m_flat, beff)
    return out[:B]


def encoder_reference(x, params, n_heads=N_HEADS):
    """Pure-JAX reference mirroring the PyTorch forward (eval mode, unfolded)."""
    B, C, Hh, Ww = x.shape
    D = C
    L = Hh * Ww
    hd = D // n_heads
    xf = jnp.transpose(x.reshape(B, D, L), (0, 2, 1))                   # (B, L, D)
    q0 = params["emb"][params["start_token"]]
    q = jnp.broadcast_to(q0, (B, D))
    mu = q.mean(-1, keepdims=True)
    var = ((q - mu) ** 2).mean(-1, keepdims=True)
    qn = (q - mu) / jnp.sqrt(var + LN_EPS) * params["ln_g"] + params["ln_b"]
    qp = qn @ params["wq"].T + params["bq"]
    kp = xf @ params["wk"].T + params["bk"]
    vp = xf @ params["wv"].T + params["bv"]
    q2 = qp.reshape(B, n_heads, hd)
    k2 = kp.reshape(B, L, n_heads, hd)
    v2 = vp.reshape(B, L, n_heads, hd)
    s = jnp.einsum("bhd,blhd->bhl", q2 / math.sqrt(hd), k2)
    a = jax.nn.softmax(s, axis=-1)
    o = jnp.einsum("bhl,blhd->bhd", a, v2).reshape(B, D)
    return o @ params["wo"].T + params["bo"]


def make_params(key, hidden_dim, vocab_size, start_token):
    D = hidden_dim
    ks = jax.random.split(key, 11)
    n = lambda k, shape, s=0.1: (s * jax.random.normal(k, shape)).astype(jnp.float32)
    return {
        "emb": n(ks[0], (vocab_size, D), 1.0),
        "ln_g": 1.0 + n(ks[1], (D,), 0.01),
        "ln_b": n(ks[2], (D,), 0.01),
        "wq": n(ks[3], (D, D)), "bq": n(ks[4], (D,), 0.01),
        "wk": n(ks[5], (D, D)), "bk": n(ks[6], (D,), 0.01),
        "wv": n(ks[7], (D, D)), "bv": n(ks[8], (D,), 0.01),
        "wo": n(ks[9], (D, D)), "bo": n(ks[10], (D,), 0.01),
        "start_token": start_token,
    }


if __name__ == "__main__":
    # Encoder(hidden_dim, voc, char2id, id2char) — synthetic deterministic params
    hidden_dim = 32                         # 8 heads * head_dim 4
    voc = list("abcdefghi") + ["EOS"]
    char2id = {c: i for i, c in enumerate(voc)}

    key = jax.random.PRNGKey(0)
    kp, kx1, kx2 = jax.random.split(key, 3)
    params = make_params(kp, hidden_dim, len(voc), char2id["EOS"])

    # Case 1: multi-step grid (B=20 forced into blocks of 8 -> 3 steps, padded)
    B1, H1, W1 = 20, 8, 8
    x1 = jax.random.normal(kx1, (B1, hidden_dim, H1, W1), dtype=jnp.float32)
    out1 = jax.block_until_ready(encoder_forward(x1, params, block_b=8))
    ref1 = jax.block_until_ready(encoder_reference(x1, params))
    assert out1.shape == (B1, hidden_dim)
    assert jnp.allclose(out1, ref1, rtol=5e-4, atol=1e-5), (
        f"f32 case1 max abs err {jnp.max(jnp.abs(out1 - ref1))}")

    # Case 2: default blocking — whole batch in a single grid step, no pad copy
    out1b = jax.block_until_ready(encoder_forward(x1, params))
    assert jnp.allclose(out1b, ref1, rtol=5e-4, atol=1e-5), (
        f"f32 case2 max abs err {jnp.max(jnp.abs(out1b - ref1))}")

    # Case 3: tiny batch, tiny spatial extent
    B2, H2, W2 = 2, 4, 4
    x2 = jax.random.normal(kx2, (B2, hidden_dim, H2, W2), dtype=jnp.float32)
    out2 = jax.block_until_ready(encoder_forward(x2, params))
    ref2 = jax.block_until_ready(encoder_reference(x2, params))
    assert out2.shape == (B2, hidden_dim)
    assert jnp.allclose(out2, ref2, rtol=5e-4, atol=1e-5), (
        f"f32 case3 max abs err {jnp.max(jnp.abs(out2 - ref2))}")

    # Case 4: bf16 MXU operands (f32 softmax/accumulation), loose tolerance
    out3 = jax.block_until_ready(
        encoder_forward(x1, params, compute_dtype=jnp.bfloat16))
    assert out3.shape == (B1, hidden_dim)
    assert jnp.allclose(out3, ref1, rtol=1e-1, atol=1e-1), (
        f"bf16 max abs err {jnp.max(jnp.abs(out3 - ref1))}")

    print("KERNEL_OK")
</pallas_src>

<mosaic_0001>
module attributes {stable_mosaic.version = 11 : i64} {
  func.func @encoder_attn_kernel(%arg0: i32, %arg1: memref<8x32x64xf32, #tpu.memory_space<vmem>>, %arg2: memref<8x32xf32, #tpu.memory_space<vmem>>, %arg3: memref<8x1xf32, #tpu.memory_space<vmem>>, %arg4: memref<256x32xf32, #tpu.memory_space<vmem>>, %arg5: memref<1x32xf32, #tpu.memory_space<vmem>>, %arg6: memref<8x32xf32, #tpu.memory_space<vmem>>) attributes {dimension_semantics = [#tpu.dimension_semantics<parallel>], iteration_bounds = array<i64: 3>, scalar_prefetch = 0 : i64, scratch_operands = 0 : i64, tpu.core_type = #tpu.core_type<tc>, window_params = [{transform_indices = @transform_0, window_bounds = array<i64: 8, 32, 64>}, {pipeline_mode = #tpu.pipeline_mode<synchronous>, transform_indices = @transform_1, window_bounds = array<i64: 8, 32>}, {pipeline_mode = #tpu.pipeline_mode<synchronous>, transform_indices = @transform_2, window_bounds = array<i64: 8, 1>}, {pipeline_mode = #tpu.pipeline_mode<synchronous>, transform_indices = @transform_3, window_bounds = array<i64: 256, 32>}, {pipeline_mode = #tpu.pipeline_mode<synchronous>, transform_indices = @transform_4, window_bounds = array<i64: 1, 32>}, {transform_indices = @transform_5, window_bounds = array<i64: 8, 32>}]} {
    %c0 = arith.constant 0 : index
    %c0_0 = arith.constant 0 : index
    %c0_1 = arith.constant 0 : index
    %0 = vector.load %arg1[%c0, %c0_0, %c0_1] : memref<8x32x64xf32, #tpu.memory_space<vmem>>, vector<8x32x64xf32>
    %c0_2 = arith.constant 0 : index
    %c0_3 = arith.constant 0 : index
    %1 = vector.load %arg2[%c0_2, %c0_3] : memref<8x32xf32, #tpu.memory_space<vmem>>, vector<8x32xf32>
    %c0_4 = arith.constant 0 : index
    %c0_5 = arith.constant 0 : index
    %2 = vector.load %arg3[%c0_4, %c0_5] : memref<8x1xf32, #tpu.memory_space<vmem>>, vector<8x1xf32>
    %c0_6 = arith.constant 0 : index
    %c0_7 = arith.constant 0 : index
    %3 = vector.load %arg4[%c0_6, %c0_7] : memref<256x32xf32, #tpu.memory_space<vmem>>, vector<256x32xf32>
    %c0_8 = arith.constant 0 : index
    %c0_9 = arith.constant 0 : index
    %4 = vector.load %arg5[%c0_8, %c0_9] : memref<1x32xf32, #tpu.memory_space<vmem>>, vector<1x32xf32>
    %5 = vector.shape_cast %1 : vector<8x32xf32> to vector<1x8x32xf32>
    %6 = vector.broadcast %5 : vector<1x8x32xf32> to vector<8x8x32xf32>
    "tpu.trace_start"() <{level = 10 : i32, message = "bhd,bdl->bhl"}> : () -> ()
    %cst = arith.constant dense<0.000000e+00> : vector<8x8x64xf32>
    %7 = tpu.matmul %6, %0, %cst {dimension_numbers = #tpu.dot_dimension_numbers<[2], [1], [1], [2], [0, 0, 0, 1, 1, 2], [0], [0]>, precision = #tpu.contract_precision<fp32>} : vector<8x8x32xf32>, vector<8x32x64xf32>, vector<8x8x64xf32> -> vector<8x8x64xf32>
    "tpu.trace_stop"() : () -> ()
    %8 = vector.shape_cast %2 : vector<8x1xf32> to vector<1x8x1xf32>
    %9 = vector.broadcast %8 : vector<1x8x1xf32> to vector<8x8x64xf32>
    %10 = arith.addf %7, %9 : vector<8x8x64xf32>
    %cst_10 = arith.constant dense<0xFF800000> : vector<8x8xf32>
    %11 = vector.multi_reduction <maximumf>, %10, %cst_10 [2] : vector<8x8x64xf32> to vector<8x8xf32>
    %12 = vector.shape_cast %11 : vector<8x8xf32> to vector<8x8x1xf32>
    %13 = vector.broadcast %12 : vector<8x8x1xf32> to vector<8x8x64xf32>
    %14 = arith.subf %10, %13 : vector<8x8x64xf32>
    %15 = math.exp %14 : vector<8x8x64xf32>
    %cst_11 = arith.constant dense<0.000000e+00> : vector<8x8xf32>
    %16 = vector.multi_reduction <add>, %15, %cst_11 [2] : vector<8x8x64xf32> to vector<8x8xf32>
    %17 = vector.shape_cast %16 : vector<8x8xf32> to vector<8x8x1xf32>
    "tpu.trace_start"() <{level = 10 : i32, message = "bhl,bdl->bhd"}> : () -> ()
    %cst_12 = arith.constant dense<0.000000e+00> : vector<8x8x32xf32>
    %18 = tpu.matmul %15, %0, %cst_12 {dimension_numbers = #tpu.dot_dimension_numbers<[2], [2], [1], [1], [0, 0, 0, 1, 1, 1], [0], [0]>, precision = #tpu.contract_precision<fp32>} : vector<8x8x64xf32>, vector<8x32x64xf32>, vector<8x8x32xf32> -> vector<8x8x32xf32>
    "tpu.trace_stop"() : () -> ()
    %cst_13 = arith.constant 1.000000e+00 : f32
    %19 = vector.broadcast %cst_13 : f32 to vector<8x8x1xf32>
    %20 = arith.divf %19, %17 : vector<8x8x1xf32>
    %21 = vector.broadcast %20 : vector<8x8x1xf32> to vector<8x8x32xf32>
    %22 = arith.mulf %18, %21 : vector<8x8x32xf32>
    %23 = vector.shape_cast %22 : vector<8x8x32xf32> to vector<8x256xf32>
    %cst_14 = arith.constant dense<0.000000e+00> : vector<8x32xf32>
    %24 = tpu.matmul %23, %3, %cst_14 {dimension_numbers = #tpu.dot_dimension_numbers<[1], [0], [0], [1], [0, 0, 1, 1], [], []>, precision = #tpu.contract_precision<fp32>} : vector<8x256xf32>, vector<256x32xf32>, vector<8x32xf32> -> vector<8x32xf32>
    %25 = vector.broadcast %4 : vector<1x32xf32> to vector<8x32xf32>
    %26 = arith.addf %24, %25 : vector<8x32xf32>
    %c0_15 = arith.constant 0 : index
    %c0_16 = arith.constant 0 : index
    %27 = vector.load %arg6[%c0_15, %c0_16] : memref<8x32xf32, #tpu.memory_space<vmem>>, vector<8x32xf32>
    tpu.vector_store %arg6[%c0_15, %c0_16], %26 {strides = array<i32>} : memref<8x32xf32, #tpu.memory_space<vmem>>, vector<8x32xf32>,
    return
  }
  func.func @transform_0(%arg0: i32) -> (i32, i32, i32) {
    %c0_i32 = arith.constant 0 : i32
    %c0_i32_0 = arith.constant 0 : i32
    %c0_i32_1 = arith.constant 0 : i32
    return %arg0, %c0_i32, %c0_i32_0 : i32, i32, i32
  }
  func.func @transform_1(%arg0: i32) -> (i32, i32) {
    %c0_i32 = arith.constant 0 : i32
    %c0_i32_0 = arith.constant 0 : i32
    %c0_i32_1 = arith.constant 0 : i32
    return %c0_i32, %c0_i32_0 : i32, i32
  }
  func.func @transform_2(%arg0: i32) -> (i32, i32) {
    %c0_i32 = arith.constant 0 : i32
    %c0_i32_0 = arith.constant 0 : i32
    %c0_i32_1 = arith.constant 0 : i32
    return %c0_i32, %c0_i32_0 : i32, i32
  }
  func.func @transform_3(%arg0: i32) -> (i32, i32) {
    %c0_i32 = arith.constant 0 : i32
    %c0_i32_0 = arith.constant 0 : i32
    %c0_i32_1 = arith.constant 0 : i32
    return %c0_i32, %c0_i32_0 : i32, i32
  }
  func.func @transform_4(%arg0: i32) -> (i32, i32) {
    %c0_i32 = arith.constant 0 : i32
    %c0_i32_0 = arith.constant 0 : i32
    %c0_i32_1 = arith.constant 0 : i32
    return %c0_i32, %c0_i32_0 : i32, i32
  }
  func.func @transform_5(%arg0: i32) -> (i32, i32) {
    %c0_i32 = arith.constant 0 : i32
    %c0_i32_0 = arith.constant 0 : i32
    return %arg0, %c0_i32 : i32, i32
  }
}

</mosaic_0001>

<bundles_post_ra>
// kernel: tpu_custom_call.1
= control target key start
LH: loop header
LB: loop body
LE: loop exit
PB: predicated region body
PF: predicated region fallthrough
CT: control target
= control target key end

     0   :  { %10 = vsyncpa [#allocation3], 0  ;;  %s14780_s0 = inlined_call_operand.hbm [shape: f32[24,32,64], index: 0, kind: input, shape index: {}]   ;;  %s14781_s1 = inlined_call_operand.vmem [shape: f32[8,32], index: 1, kind: input, shape index: {}]   ;;  %s14782_s2 = inlined_call_operand.vmem [shape: f32[8,1], index: 2, kind: input, shape index: {}]   ;;  %s14783_s3 = inlined_call_operand.vmem [shape: f32[256,32], index: 3, kind: input, shape index: {}]   ;;  %s14784_s4 = inlined_call_operand.vmem [shape: f32[1,32], index: 4, kind: input, shape index: {}]   ;;  %s14785_s5 = inlined_call_operand.hbm [shape: f32[24,32], index: 5, kind: output, shape index: {}]  }
   0x1   :  { %12 = vsyncpa [#allocation3 + $0x1], 0 }
   0x2   :  { %13 = vsyncpa [#allocation4], 0 }
   0x3   :  { %15 = vsyncpa [#allocation4 + $0x1], 0  ;;  %s12380_s18 = smov 0   ;;  %s12382_s19 = smov 0  }
   0x4   :  { %s12384_s20 = smov 0   ;;  %s12386_s21 = smov 0  }
   0x5 LB: > { %s12401_s22 = sadd.s32 4294967295, %s12335_s21   ;;  %s9418_s23 = sadd.s32 4294967294, %s12335_s21   ;;  %s12335_s21 = sphi %s12386_s21, %s14969_s21   ;;  %s12331_s20 = sphi %s12384_s20, %s14968_s20   ;;  %s12327_s19 = sphi %s12382_s19, %s14967_s19   ;;  %s12323_s18 = sphi %s12380_s18, %s14966_s18  }
   0x6   : > { %s12405_s24 = sadd.s32 1, %s12335_s21   ;;  %s28_s25 = sadd.s32 1, %s12331_s20 }
   0x7   : > { %s25_s26 = ssub.s32 %s12335_s21, %s12405_s24  ;;  %p35_p0 = scmp.ne.s32.totalorder %s12331_s20, %s12327_s19 }
   0x8   : > { %p26_p1 = scmp.eq.s32.totalorder %s25_s26, 0  ;;  %p36_p2 = scmp.eq.s32.totalorder %s12335_s21, 0 }
   0x9   : > { %p41_p3 = scmp.ne.s32.totalorder %s12327_s19, %s12323_s18  ;;  %p42_p4 = scmp.eq.s32.totalorder %s12401_s22, 0 }
   0xa   : > { %s12417_s27 = scalar_select %p26_p1, %s12331_s20, %s28_s25  }
   0xb   : > { %p12419_p5 = por %p36_p2, %p35_p0  ;;  %p12423_p6 = por %p42_p4, %p41_p3 }
   0xc   : > { %p149_p7 = scmp.eq.s32.totalorder %s12401_s22, 2  ;;  %p155_p8 = scmp.eq.s32.totalorder %s9418_s23, 2 }
   0xd   : > { %p12129_p9 = scmp.lt.s32.totalorder %s12335_s21, 3  ;;  %s187_s7 = sand.u32 1, %s12331_s20  }
   0xe   : > { %p12429_p10 = por %p149_p7, %p35_p0  ;;  %p12433_p11 = por %p155_p8, %p41_p3 }
   0xf   : > { %s9434_s8 = sshll.u32 %s12335_s21, 12  ;;  %s9421_s9 = sshll.u32 %s187_s7, 8 }
  0x10   : > { %s14870_s30 = scalar_select %p12429_p10, 1, 0 }
  0x11   : > { %s14871_s6 = scalar_select %p12433_p11, 1, 0 }
  0x12   : > { %s12442_s12 = scalar_lea.hbm %s14780_s0, %s9434_s8  ;;  %s191_s13 = scalar_lea.vmem [#allocation2], %s9421_s9 }
  0x13   : > { %s199_s14 = sshll.u32 %s191_s13, 4  ;;  %p12446_p12 = pnand %p12129_p9, %p12419_p5  ;;  %s12450_s14 = int_to_ptr.vmem [resolvable:$true] %s199_s14 }
  0x14   : > { %s12452_s16 = scalar_lea.sflag [#allocation3], %s187_s7  ;;  %s12239_s17 = scalar_lea.hbm %s12442_s12, 4096 }
  0x15   : > { %p12240_p13 = scmp.ne.s32.totalorder %s12442_s12, %s12239_s17  ;;  %p12241_p0 = pneg %p12446_p12 }
  0x16   : > { %s12244_s26 = scalar_lea.hbm %s14780_s0, 12288  ;;  %p12245_p3 = scmp.lt.u32.totalorder %s12442_s12, %s14780_s0 }
  0x17   : > { %p12242_p1 = pnand %p12241_p0, %p12240_p13  ;;  %p12246_p4 = scmp.lt.u32.totalorder %s12244_s26, %s12239_s17 }
  0x18   : > { %p12248_p7 = scmp.lt.u32.totalorder %s12239_s17, %s12442_s12 }
  0x19   : > { %p12243_p2 = pneg %p12242_p1  ;;  %p12247_p5 = por %p12246_p4, %p12245_p3 }
  0x1b   : > { %p12249_p8 = por %p12248_p7, %p12247_p5 }
  0x1d   : > { %p12250_p9 = pnand %p12249_p8, %p12243_p2 }
  0x1f   : > { %12253 = shalt.err (!%p12250_p9)
}
  0x20   : > { %s12254_s7 = scalar_lea.vmem %s12450_s14, 4096  ;;  %s12337_s9 = smov [#allocation2]  }
  0x21   : > { %p12255_p13 = scmp.ne.s32.totalorder %s12450_s14, %s12254_s7  ;;  %s12259_s10 = sshll.u32 %s12337_s9, 4  ;;  %s12260_s10 = int_to_ptr.vmem [resolvable:$false] %s12259_s10 }
  0x22   : > { %s12261_s11 = scalar_lea.vmem %s12260_s10, 8192  ;;  %p12262_p10 = scmp.lt.s32.totalorder %s12450_s14, %s12260_s10 }
  0x23   : > { %p12257_p1 = pnand %p12255_p13, %p12241_p0  ;;  %p12263_p3 = scmp.lt.s32.totalorder %s12261_s11, %s12254_s7 }
  0x25   : > { %p12258_p11 = pneg %p12257_p1  ;;  %p12264_p4 = por %p12263_p3, %p12262_p10 }
  0x27   : > { %p12265_p5 = pnand %p12264_p4, %p12258_p11 }
  0x29   : > { %12268 = shalt.err (!%p12265_p5)
}
  0x2a   : > { %s12338_s13 = smov 128   ;;  %s12339_s17 = smov 8  }
  0x2b   : > { %12124 = dma.hbm_to_vmem [thread:$0]  (!%p12446_p12), %s12442_s12, 4096, %s12450_s14, %s12452_s16, %s12338_s13, %s12338_s13, %s12339_s17  }
  0x2c   : > { %p9425_p0 = scmp.ge.s32.totalorder %s12335_s21, 1  ;;  %p207_p2 = scmp.lt.s32.totalorder %s12335_s21, 4 }
  0x2e   : > { %p208_p7 = pnand %p9425_p0, %p207_p2 }
  0x30   : > { %211 = sbr.rel (%p208_p7) target bundleno = 1525 (0x5f5), region = 40 }
  0x37   : > { %s12483_s23 = sand.u32 1, %s12327_s19  }
  0x38   : > { %s9426_s25 = sshll.u32 %s12483_s23, 8  ;;  %s214_s26 = scalar_lea.sflag [#allocation3], %s12483_s23 }
  0x39   : > { %s12487_s28 = scalar_lea.vmem [#allocation2], %s9426_s25 }
  0x3a   : > { %12314 = dma.done.wait (%p12423_p6), %s214_s26, 4096  }
  0x3b   : > { %12316 = vsyncadd (%p12423_p6), %s214_s26, 4294963200  ;;  %v12340_v0 = vmov 0.0|0.0   ;;  %vm12341_vm0 = vmmov 0   ;;  %v12342_v1 = vmov 0.0   ;;  %v245_v2 = vld [vmem:[%s12487_s28] sm:$0xff]  ;;  %v246_v3 = vld [vmem:[%s12487_s28 + $0x8] sm:$0xff] }
  0x3c   : > { %11181 = vmatprep.subr.bf16.mxu0 %v12340_v0  ;;  %11217 = vmatprep.subr.bf16.mxu1 %v12340_v0  ;;  %v249_v4 = vld [vmem:[%s12487_s28 + $0x20] sm:$0xff]  ;;  %vm317_vm1 = vcmask 261120   ;;  %v322_v5 = vand.u32 4294901760, %v245_v2  ;;  %v325_v6 = vand.u32 4294901760, %v246_v3  ;;  %v250_v7 = vld [vmem:[%s12487_s28 + $0x28] sm:$0xff]  ;;  %v247_v9 = vld [vmem:[%s12487_s28 + $0x10] sm:$0xff] }
  0x3d   : > { %10133 = vmatprep.mubr.msk.f32.mxu0 %vm12341_vm0, %v12342_v1  ;;  %10199 = vmatprep.mubr.msk.f32.mxu1 %vm12341_vm0, %v12342_v1  ;;  %v807_v8 = vand.u32 4294901760, %v249_v4  ;;  %v248_v10 = vld [vmem:[%s12487_s28 + $0x18] sm:$0xff]  ;;  %v810_v11 = vand.u32 4294901760, %v250_v7  ;;  %v328_v12 = vand.u32 4294901760, %v247_v9  ;;  %v251_v14 = vld [vmem:[%s12487_s28 + $0x30] sm:$0xff]  ;;  %v277_v16 = vld [vmem:[%s14781_s1] sm:$0xff] }
  0x3e   : > { %v331_v13 = vand.u32 4294901760, %v248_v10  ;;  %v252_v15 = vld [vmem:[%s12487_s28 + $0x38] sm:$0xff]  ;;  %v12510_v17 = vpack.c.bf16 %v325_v6, %v322_v5  ;;  %v12512_v18 = vsub.f32 %v245_v2, %v322_v5  ;;  %v12514_v19 = vsub.f32 %v246_v3, %v325_v6  ;;  %s12346_s10 = smov 32   ;;  %s12347_s11 = smov 64  }
  0x3f   : > { %v12516_v20 = vsub.f32 %v249_v4, %v807_v8  ;;  %v12518_v21 = vpack.c.bf16 %v810_v11, %v807_v8  ;;  %v12520_v22 = vsub.f32 %v250_v7, %v810_v11  ;;  %v12524_v24 = vsub.f32 %v247_v9, %v328_v12  ;;  %v253_v9 = vld [vmem:[%s12487_s28 + $0x40] sm:$0xff]  ;;  %s12348_s13 = smov 96   ;;  %s9427_s26 = sshll.u32 %s12483_s23, 3 }
  0x40   : > { %v12522_v23 = vpack.c.bf16 %v331_v13, %v328_v12  ;;  %11183 = vmatpush3.bf16.msra.mxu0 %v12510_v17  ;;  %v12527_v25 = vsub.f32 %v248_v10, %v331_v13  ;;  %v813_v26 = vand.u32 4294901760, %v251_v14  ;;  %v816_v27 = vand.u32 4294901760, %v252_v15  ;;  %v254_v10 = vld [vmem:[%s12487_s28 + $0x48] sm:$0xff]  ;;  %v257_v11 = vld [vmem:[%s12487_s28 + $0x60] sm:$0xff]  ;;  %s243_s29 = scalar_lea.vmem [#allocation5], %s9427_s26  ;;  %s9335_s8 = scalar_lea.sflag [#allocation4], %s12483_s23 }
  0x41   : > { %v319_v28 = vsel %vm317_vm1, %v277_v16, 0  ;;  %11219 = vmatpush3.bf16.msra.mxu1 %v12518_v21  ;;  %11184 = vmatprep.subr.bf16.mxu0 %v12340_v0  ;;  %v403_v30 = vand.u32 4294901760, %v12512_v18  ;;  %v410_v31 = vand.u32 4294901760, %v12514_v19  ;;  %v888_v32 = vand.u32 4294901760, %v12516_v20  ;;  %v258_v12 = vld [vmem:[%s12487_s28 + $0x68] sm:$0xff]  ;;  %s9348_s12 = sshll.u32 %s243_s29, 4  ;;  %s14738_s12 = int_to_ptr.vmem [resolvable:$true] %s9348_s12 }
  0x42   : > { %v12532_v29 = vand.u32 4294901760, %v319_v28  ;;  %11220 = vmatprep.subr.bf16.mxu1 %v12340_v0  ;;  %v12538_v33 = vpack.c.bf16 %v816_v27, %v813_v26  ;;  %v12540_v34 = vsub.f32 %v251_v14, %v813_v26  ;;  %v12542_v35 = vsub.f32 %v252_v15, %v816_v27  ;;  %v259_v26 = vld [vmem:[%s12487_s28 + $0x70] sm:$0xff]  ;;  %s12269_s7 = scalar_lea.vmem %s14738_s12, 128  ;;  %p14964_p10 = scmp.ne.s32.totalorder %s14870_s30, 0 }
  0x43   : > { %v895_v36 = vand.u32 4294901760, %v12520_v22  ;;  %v404_v38 = vsub.f32 %v12512_v18, %v403_v30  ;;  %v411_v39 = vsub.f32 %v12514_v19, %v410_v31  ;;  %v889_v40 = vsub.f32 %v12516_v20, %v888_v32  ;;  %p12270_p6 = scmp.ne.s32.totalorder %s14738_s12, %s12269_s7 }
  0x44   : > { %v12546_v37 = vsub.f32 %v319_v28, %v12532_v29  ;;  %11186 = vmatpush3.bf16.msra.mxu0 %v12522_v23  ;;  %v417_v42 = vand.u32 4294901760, %v12524_v24  ;;  %v424_v43 = vand.u32 4294901760, %v12527_v25  ;;  %v902_v44 = vand.u32 4294901760, %v12540_v34 }
  0x45   : > { %v896_v41 = vsub.f32 %v12520_v22, %v895_v36  ;;  %11222 = vmatpush3.bf16.msra.mxu1 %v12538_v33  ;;  %11187 = vmatprep.subr.bf16.mxu0 %v12340_v0  ;;  %v405_v46 = vand.u32 4294901760, %v404_v38  ;;  %v412_v47 = vand.u32 4294901760, %v411_v39  ;;  %v890_v48 = vand.u32 4294901760, %v889_v40  ;;  %p12271_p11 = pnand %p12270_p6, %p14964_p10 }
  0x46   : > { %v12566_v45 = vand.u32 4294901760, %v12546_v37  ;;  %11223 = vmatprep.subr.bf16.mxu1 %v12340_v0  ;;  %v418_v50 = vsub.f32 %v12524_v24, %v417_v42  ;;  %v425_v51 = vsub.f32 %v12527_v25, %v424_v43  ;;  %v903_v52 = vsub.f32 %v12540_v34, %v902_v44 }
  0x47   : > { %v897_v49 = vand.u32 4294901760, %v896_v41  ;;  %v909_v54 = vand.u32 4294901760, %v12542_v35  ;;  %v11188_v55 = vpack.c.bf16 %v412_v47, %v405_v46  ;;  %v11194_v3 = vpack.c.bf16 %v12514_v19, %v12512_v18  ;;  %p12272_p12 = pneg %p12271_p11 }
  0x48   : > { %v393_v53 = vsub.f32 %v12546_v37, %v12566_v45  ;;  %v419_v57 = vand.u32 4294901760, %v418_v50  ;;  %v426_v58 = vand.u32 4294901760, %v425_v51  ;;  %v904_v60 = vand.u32 4294901760, %v903_v52 }
  0x49   : > { %v11224_v56 = vpack.c.bf16 %v897_v49, %v890_v48  ;;  %v910_v61 = vsub.f32 %v12542_v35, %v909_v54  ;;  %v11230_v4 = vpack.c.bf16 %v12520_v22, %v12516_v20  ;;  %v11197_v5 = vpack.c.bf16 %v12527_v25, %v12524_v24  ;;  %v255_v20 = vld [vmem:[%s12487_s28 + $0x50] sm:$0xff]  ;;  %v256_v22 = vld [vmem:[%s12487_s28 + $0x58] sm:$0xff] }
  0x4a   : > { %v12582_v59 = vand.u32 4294901760, %v393_v53  ;;  %v11191_v63 = vpack.c.bf16 %v426_v58, %v419_v57  ;;  %v11233_v6 = vpack.c.bf16 %v12542_v35, %v12540_v34  ;;  %v11206_v7 = vpack.c.bf16 %v410_v31, %v403_v30  ;;  %v260_v24 = vld [vmem:[%s12487_s28 + $0x78] sm:$0xff] }
  0x4b   : > { %v911_v62 = vand.u32 4294901760, %v910_v61  ;;  %v11242_v8 = vpack.c.bf16 %v895_v36, %v888_v32  ;;  %v11209_v13 = vpack.c.bf16 %v424_v43, %v417_v42  ;;  %v1292_v14 = vand.u32 4294901760, %v253_v9  ;;  %v278_v32 = vld [vmem:[%s14782_s2] sm:$0xff] }
  0x4c   : > { %10134 = vmatmul.mubr.f32.vlgmr.msra.gmra.mrb[0].mxu0 %v12582_v59  ;;  %10200 = vmatmul.mubr.f32.vlgmr.msra.gmra.mrb[0].mxu1 %v12582_v59  ;;  %v11245_v15 = vpack.c.bf16 %v909_v54, %v902_v44  ;;  %v1295_v16 = vand.u32 4294901760, %v254_v10  ;;  %v1777_v18 = vand.u32 4294901760, %v257_v11  ;;  %v1780_v19 = vand.u32 4294901760, %v258_v12 }
  0x4d   : > { %11189 = vmatpush3.bf16.msra.mxu0 %v11188_v55  ;;  %11225 = vmatpush3.bf16.msra.mxu1 %v11224_v56  ;;  %v11227_v2 = vpack.c.bf16 %v911_v62, %v904_v60  ;;  %v12661_v25 = vsub.f32 %v253_v9, %v1292_v14  ;;  %v1298_v27 = vand.u32 4294901760, %v255_v20  ;;  %v1301_v28 = vand.u32 4294901760, %v256_v22 }
  0x4e   : > { %11190 = vmatprep.subr.bf16.mxu0 %v12340_v0  ;;  %11226 = vmatprep.subr.bf16.mxu1 %v12340_v0  ;;  %v1783_v30 = vand.u32 4294901760, %v259_v26  ;;  %v12343_v31 = vmov 0   ;;  %v12666_v34 = vsub.f32 %v254_v10, %v1295_v16  ;;  %v12668_v35 = vsub.f32 %v257_v11, %v1777_v18 }
  0x4f   : > { %10144 = vmatprep.mubr.msk.f32.mxu0 %vm12341_vm0, %v12342_v1  ;;  %10210 = vmatprep.mubr.msk.f32.mxu1 %vm12341_vm0, %v12342_v1  ;;  %v12670_v36 = vsub.f32 %v258_v12, %v1780_v19  ;;  %v1786_v38 = vand.u32 4294901760, %v260_v24  ;;  %v12676_v39 = vsub.f32 %v255_v20, %v1298_v27  ;;  %v12678_v40 = vsub.f32 %v256_v22, %v1301_v28  ;;  %v265_v20 = vld [vmem:[%s12487_s28 + $0xa0] sm:$0xff]  ;;  %v266_v22 = vld [vmem:[%s12487_s28 + $0xa8] sm:$0xff] }
  0x50   : > { %12174 = vset.pattern.permute.xlu0 %v12343_v31  ;;  %v12680_v41 = vsub.f32 %v259_v26, %v1783_v30  ;;  %v1373_v42 = vand.u32 4294901760, %v12661_v25  ;;  %v1380_v44 = vand.u32 4294901760, %v12666_v34  ;;  %v1858_v46 = vand.u32 4294901760, %v12668_v35  ;;  %v263_v31 = vld [vmem:[%s12487_s28 + $0x90] sm:$0xff] }
  0x51   : > { %11192 = vmatpush3.bf16.msra.mxu0 %v11191_v63  ;;  %11228 = vmatpush3.bf16.msra.mxu1 %v11227_v2  ;;  %v12685_v43 = vsub.f32 %v260_v24, %v1786_v38  ;;  %v1865_v47 = vand.u32 4294901760, %v12670_v36  ;;  %v1387_v49 = vand.u32 4294901760, %v12676_v39  ;;  %v1394_v50 = vand.u32 4294901760, %v12678_v40 }
  0x52   : > { %11193 = vmatprep.subr.bf16.mxu0 %v12340_v0  ;;  %11229 = vmatprep.subr.bf16.mxu1 %v12340_v0  ;;  %v1374_v48 = vsub.f32 %v12661_v25, %v1373_v42  ;;  %v1872_v51 = vand.u32 4294901760, %v12680_v41  ;;  %v1381_v52 = vsub.f32 %v12666_v34, %v1380_v44  ;;  %v1859_v53 = vsub.f32 %v12668_v35, %v1858_v46 }
  0x53   : > { %314 = vperm.xlu0 %12174, %v278_v32   ;;  %v1866_v54 = vsub.f32 %v12670_v36, %v1865_v47  ;;  %v1879_v55 = vand.u32 4294901760, %v12685_v43  ;;  %v1388_v57 = vsub.f32 %v12676_v39, %v1387_v49  ;;  %v1395_v58 = vsub.f32 %v12678_v40, %v1394_v50  ;;  %v264_v32 = vld [vmem:[%s12487_s28 + $0x98] sm:$0xff] }
  0x54   : > { %10145 = vmatmul.mubr.f32.vlgmr.msra.gmra.mrb[0].mxu0 %v12532_v29  ;;  %10211 = vmatmul.mubr.f32.vlgmr.msra.gmra.mrb[0].mxu1 %v12532_v29  ;;  %v1375_v56 = vand.u32 4294901760, %v1374_v48  ;;  %v1873_v60 = vsub.f32 %v12680_v41, %v1872_v51  ;;  %v1382_v61 = vand.u32 4294901760, %v1381_v52  ;;  %v1860_v62 = vand.u32 4294901760, %v1859_v53 }
  0x55   : > { %11195 = vmatpush3.bf16.msra.mxu0 %v11194_v3  ;;  %11231 = vmatpush3.bf16.msra.mxu1 %v11230_v4  ;;  %v1867_v63 = vand.u32 4294901760, %v1866_v54  ;;  %v1880_v2 = vsub.f32 %v12685_v43, %v1879_v55  ;;  %v1389_v3 = vand.u32 4294901760, %v1388_v57  ;;  %v1396_v4 = vand.u32 4294901760, %v1395_v58 }
  0x56   : > { %11196 = vmatprep.subr.bf16.mxu0 %v12340_v0  ;;  %11232 = vmatprep.subr.bf16.mxu1 %v12340_v0  ;;  %v11266_v11 = vpack.c.bf16 %v12666_v34, %v12661_v25  ;;  %v11302_v12 = vpack.c.bf16 %v12670_v36, %v12668_v35  ;;  %v11281_v25 = vpack.c.bf16 %v1394_v50, %v1387_v49  ;;  %v267_v34 = vld [vmem:[%s12487_s28 + $0xb0] sm:$0xff]  ;;  %v268_v35 = vld [vmem:[%s12487_s28 + $0xb8] sm:$0xff]  ;;  %vm4201_vm2 = vcmask 523264  }
  0x57   : > { %10155 = vmatprep.mubr.msk.f32.mxu0 %vm12341_vm0, %v12342_v1  ;;  %10221 = vmatprep.mubr.msk.f32.mxu1 %vm12341_vm0, %v12342_v1  ;;  %v11263_v9 = vpack.c.bf16 %v1396_v4, %v1389_v3  ;;  %vm8460_vm3 = vcmask 785408  }
  0x59   : > { %11198 = vmatpush3.bf16.msra.mxu0 %v11197_v5  ;;  %11234 = vmatpush3.bf16.msra.mxu1 %v11233_v6  ;;  %v11260_v5 = vpack.c.bf16 %v1382_v61, %v1375_v56  ;;  %v11296_v6 = vpack.c.bf16 %v1867_v63, %v1860_v62 }
  0x5a   : > { %11199 = vmatprep.subr.bf16.mxu0 %v12340_v0  ;;  %11235 = vmatprep.subr.bf16.mxu1 %v12340_v0 }
  0x5c   : > { %10156 = vmatmul.mubr.f32.vlgmr.msra.gmra.mrb[0].mxu0 %v12546_v37  ;;  %10222 = vmatmul.mubr.f32.vlgmr.msra.gmra.mrb[0].mxu1 %v12546_v37 }
  0x5d   : > { %11201 = vmatpush3.bf16.msra.mxu0 %v12510_v17  ;;  %11237 = vmatpush3.bf16.msra.mxu1 %v12518_v21 }
  0x5e   : > { %11202 = vmatprep.subr.bf16.mxu0 %v12340_v0  ;;  %11238 = vmatprep.subr.bf16.mxu1 %v12340_v0 }
  0x5f   : > { %10166 = vmatprep.mubr.msk.f32.mxu0 %vm12341_vm0, %v12342_v1  ;;  %10232 = vmatprep.mubr.msk.f32.mxu1 %vm12341_vm0, %v12342_v1 }
  0x61   : > { %11204 = vmatpush3.bf16.msra.mxu0 %v12522_v23  ;;  %11240 = vmatpush3.bf16.msra.mxu1 %v12538_v33 }
  0x62   : > { %11205 = vmatprep.subr.bf16.mxu0 %v12340_v0  ;;  %11241 = vmatprep.subr.bf16.mxu1 %v12340_v0 }
  0x64   : > { %10167 = vmatmul.mubr.f32.vlgmr.msra.gmra.mrb[0].mxu0 %v12566_v45  ;;  %10233 = vmatmul.mubr.f32.vlgmr.msra.gmra.mrb[0].mxu1 %v12566_v45 }
  0x65   : > { %11207 = vmatpush3.bf16.msra.mxu0 %v11206_v7  ;;  %11243 = vmatpush3.bf16.msra.mxu1 %v11242_v8  ;;  %v1874_v7 = vand.u32 4294901760, %v1873_v60  ;;  %v1881_v8 = vand.u32 4294901760, %v1880_v2 }
  0x66   : > { %11208 = vmatprep.subr.bf16.mxu0 %v12340_v0  ;;  %11244 = vmatprep.subr.bf16.mxu1 %v12340_v0 }
  0x67   : > { %10177 = vmatprep.mubr.msk.f32.mxu0 %vm12341_vm0, %v12342_v1  ;;  %10243 = vmatprep.mubr.msk.f32.mxu1 %vm12341_vm0, %v12342_v1  ;;  %v11299_v10 = vpack.c.bf16 %v1881_v8, %v1874_v7 }
  0x69   : > { %11210 = vmatpush3.bf16.msra.mxu0 %v11209_v13  ;;  %11246 = vmatpush3.bf16.msra.mxu1 %v11245_v15  ;;  %v11269_v13 = vpack.c.bf16 %v12678_v40, %v12676_v39  ;;  %v11278_v15 = vpack.c.bf16 %v1380_v44, %v1373_v42  ;;  %v2268_v39 = vand.u32 4294901760, %v263_v31  ;;  %v2271_v40 = vand.u32 4294901760, %v264_v32 }
  0x6a   : > { %11211 = vmatprep.subr.bf16.mxu0 %v12340_v0  ;;  %11247 = vmatprep.subr.bf16.mxu1 %v12340_v0  ;;  %v2756_v44 = vand.u32 4294901760, %v268_v35 }
  0x6b   : > { %v12880_v63 = vpack.c.bf16 %v2271_v40, %v2268_v39 }
  0x6c   : > { %10178 = vmatmul.mubr.f32.vlgmr.msra.gmra.mrb[0].mxu0 %v12532_v29  ;;  %10244 = vmatmul.mubr.f32.vlgmr.msra.gmra.mrb[0].mxu1 %v12532_v29 }
  0x6d   : > { %11213 = vmatpush3.bf16.msra.mxu0 %v12510_v17  ;;  %11249 = vmatpush3.bf16.msra.mxu1 %v12518_v21  ;;  %v12696_v17 = vpack.c.bf16 %v1295_v16, %v1292_v14  ;;  %v12698_v21 = vpack.c.bf16 %v1780_v19, %v1777_v18  ;;  %v11305_v14 = vpack.c.bf16 %v12685_v43, %v12680_v41  ;;  %v261_v18 = vld [vmem:[%s12487_s28 + $0x80] sm:$0xff]  ;;  %v262_v19 = vld [vmem:[%s12487_s28 + $0x88] sm:$0xff]  ;;  %v2753_v43 = vand.u32 4294901760, %v267_v34 }
  0x6e   : > { %11214 = vmatprep.subr.bf16.mxu0 %v12340_v0  ;;  %11250 = vmatprep.subr.bf16.mxu1 %v12340_v0  ;;  %v11314_v16 = vpack.c.bf16 %v1865_v47, %v1858_v46  ;;  %v2262_v26 = vand.u32 4294901760, %v261_v18  ;;  %v2265_v24 = vand.u32 4294901760, %v262_v19  ;;  %v12836_v46 = vsub.f32 %v263_v31, %v2268_v39  ;;  %v271_v39 = vld [vmem:[%s12487_s28 + $0xd0] sm:$0xff] }
  0x6f   : > { %10188 = vmatprep.mubr.msk.f32.mxu0 %vm12341_vm0, %v12342_v1  ;;  %10254 = vmatprep.mubr.msk.f32.mxu1 %vm12341_vm0, %v12342_v1  ;;  %v12838_v47 = vsub.f32 %v264_v32, %v2271_v40  ;;  %v12844_v50 = vsub.f32 %v267_v34, %v2753_v43  ;;  %v272_v40 = vld [vmem:[%s12487_s28 + $0xd8] sm:$0xff] }
  0x70   : > { %v12824_v36 = vsub.f32 %v261_v18, %v2262_v26  ;;  %v2357_v56 = vand.u32 4294901760, %v12836_v46 }
  0x71   : > { %11216 = vmatpush3.bf16.msra.mxu0 %v12522_v23  ;;  %11252 = vmatpush3.bf16.msra.mxu1 %v12538_v33  ;;  %v12720_v23 = vpack.c.bf16 %v1301_v28, %v1298_v27  ;;  %v12722_v33 = vpack.c.bf16 %v1786_v38, %v1783_v30  ;;  %v11317_v27 = vpack.c.bf16 %v1879_v55, %v1872_v51  ;;  %v2747_v28 = vand.u32 4294901760, %v265_v20 }
  0x72   : > { %11253 = vmatprep.subr.bf16.mxu0 %v12340_v0  ;;  %11289 = vmatprep.subr.bf16.mxu1 %v12340_v0  ;;  %v2750_v30 = vand.u32 4294901760, %v266_v22  ;;  %v12826_v38 = vsub.f32 %v262_v19, %v2265_v24  ;;  %v2343_v48 = vand.u32 4294901760, %v12824_v36  ;;  %v12846_v51 = vsub.f32 %v268_v35, %v2756_v44 }
  0x73   : > { %v12828_v41 = vsub.f32 %v265_v20, %v2747_v28  ;;  %v2364_v57 = vand.u32 4294901760, %v12838_v47  ;;  %v2842_v61 = vand.u32 4294901760, %v12844_v50  ;;  %v2358_v3 = vsub.f32 %v12836_v46, %v2357_v56 }
  0x74   : > { %10189 = vmatmul.mubr.f32.vlgmr.msra.gmra.mrb[0].mxu0 %v12532_v29  ;;  %10255 = vmatmul.mubr.f32.vlgmr.msra.gmra.mrb[0].mxu1 %v12532_v29  ;;  %v12830_v42 = vsub.f32 %v266_v22, %v2750_v30  ;;  %v2350_v49 = vand.u32 4294901760, %v12826_v38  ;;  %v2344_v54 = vsub.f32 %v12824_v36, %v2343_v48  ;;  %v2849_v62 = vand.u32 4294901760, %v12846_v51 }
  0x75   : > { %11255 = vmatpush3.bf16.msra.mxu0 %v12696_v17  ;;  %11291 = vmatpush3.bf16.msra.mxu1 %v12698_v21  ;;  %v2828_v52 = vand.u32 4294901760, %v12828_v41  ;;  %v2365_v4 = vsub.f32 %v12838_v47, %v2364_v57  ;;  %v2843_v7 = vsub.f32 %v12844_v50, %v2842_v61  ;;  %v11338_v18 = vpack.c.bf16 %v12826_v38, %v12824_v36 }
  0x76   : > { %11256 = vmatprep.subr.bf16.mxu0 %v12340_v0  ;;  %11292 = vmatprep.subr.bf16.mxu1 %v12340_v0  ;;  %v2835_v53 = vand.u32 4294901760, %v12830_v42  ;;  %v2351_v55 = vsub.f32 %v12826_v38, %v2350_v49  ;;  %v2850_v8 = vsub.f32 %v12846_v51, %v2849_v62  ;;  %v11374_v19 = vpack.c.bf16 %v12830_v42, %v12828_v41 }
  0x77   : > { %10265 = vmatprep.mubr.msk.f32.mxu0 %vm12341_vm0, %v12342_v1  ;;  %10331 = vmatprep.mubr.msk.f32.mxu1 %vm12341_vm0, %v12342_v1  ;;  %v2829_v58 = vsub.f32 %v12828_v41, %v2828_v52  ;;  %v11341_v20 = vpack.c.bf16 %v12838_v47, %v12836_v46  ;;  %v11377_v22 = vpack.c.bf16 %v12846_v51, %v12844_v50  ;;  %v275_v41 = vld [vmem:[%s12487_s28 + $0xf0] sm:$0xff]  ;;  %v3238_v46 = vand.u32 4294901760, %v271_v39 }
  0x78   : > { %v2836_v60 = vsub.f32 %v12830_v42, %v2835_v53  ;;  %v2352_v2 = vand.u32 4294901760, %v2351_v55  ;;  %v11353_v34 = vpack.c.bf16 %v2364_v57, %v2357_v56  ;;  %v11389_v35 = vpack.c.bf16 %v2849_v62, %v2842_v61  ;;  %v276_v42 = vld [vmem:[%s12487_s28 + $0xf8] sm:$0xff] }
  0x79   : > { %11258 = vmatpush3.bf16.msra.mxu0 %v12720_v23  ;;  %11294 = vmatpush3.bf16.msra.mxu1 %v12722_v33  ;;  %v3241_v47 = vand.u32 4294901760, %v272_v40  ;;  %v3723_v50 = vand.u32 4294901760, %v275_v41  ;;  %v3726_v51 = vand.u32 4294901760, %v276_v42 }
  0x7a   : > { %11259 = vmatprep.subr.bf16.mxu0 %v12340_v0  ;;  %11295 = vmatprep.subr.bf16.mxu1 %v12340_v0 }
  0x7b   : > { %v13004_v56 = vsub.f32 %v275_v41, %v3723_v50  ;;  %v13006_v57 = vsub.f32 %v276_v42, %v3726_v51  ;;  %v12207_v42 = vld [vmem:[%s12487_s28] sm:$0xff] }
  0x7c   : > { %10266 = vmatmul.mubr.f32.vlgmr.msra.gmra.mrb[2].mxu0 %v12582_v59  ;;  %10332 = vmatmul.mubr.f32.vlgmr.msra.gmra.mrb[2].mxu1 %v12582_v59 }
  0x7d   : > { %11261 = vmatpush3.bf16.msra.mxu0 %v11260_v5  ;;  %11297 = vmatpush3.bf16.msra.mxu1 %v11296_v6  ;;  %v2830_v5 = vand.u32 4294901760, %v2829_v58  ;;  %v2837_v6 = vand.u32 4294901760, %v2836_v60 }
  0x7e   : > { %11262 = vmatprep.subr.bf16.mxu0 %v12340_v0  ;;  %11298 = vmatprep.subr.bf16.mxu1 %v12340_v0 }
  0x7f   : > { %10276 = vmatprep.mubr.msk.f32.mxu0 %vm12341_vm0, %v12342_v1  ;;  %10342 = vmatprep.mubr.msk.f32.mxu1 %vm12341_vm0, %v12342_v1 }
  0x81   : > { %11264 = vmatpush3.bf16.msra.mxu0 %v11263_v9  ;;  %11300 = vmatpush3.bf16.msra.mxu1 %v11299_v10  ;;  %v2359_v10 = vand.u32 4294901760, %v2358_v3 }
  0x82   : > { %11265 = vmatprep.subr.bf16.mxu0 %v12340_v0  ;;  %11301 = vmatprep.subr.bf16.mxu1 %v12340_v0 }
  0x84   : > { %10277 = vmatmul.mubr.f32.vlgmr.msra.gmra.mrb[2].mxu0 %v12532_v29  ;;  %10343 = vmatmul.mubr.f32.vlgmr.msra.gmra.mrb[2].mxu1 %v12532_v29 }
  0x85   : > { %11267 = vmatpush3.bf16.msra.mxu0 %v11266_v11  ;;  %11303 = vmatpush3.bf16.msra.mxu1 %v11302_v12  ;;  %v11368_v11 = vpack.c.bf16 %v2837_v6, %v2830_v5  ;;  %v2366_v12 = vand.u32 4294901760, %v2365_v4  ;;  %v3812_v5 = vand.u32 4294901760, %v13004_v56  ;;  %v3819_v6 = vand.u32 4294901760, %v13006_v57 }
  0x86   : > { %11268 = vmatprep.subr.bf16.mxu0 %v12340_v0  ;;  %11304 = vmatprep.subr.bf16.mxu1 %v12340_v0 }
  0x87   : > { %10287 = vmatprep.mubr.msk.f32.mxu0 %vm12341_vm0, %v12342_v1  ;;  %10353 = vmatprep.mubr.msk.f32.mxu1 %vm12341_vm0, %v12342_v1 }
  0x89   : > { %11270 = vmatpush3.bf16.msra.mxu0 %v11269_v13  ;;  %11306 = vmatpush3.bf16.msra.mxu1 %v11305_v14  ;;  %v2844_v13 = vand.u32 4294901760, %v2843_v7  ;;  %v2851_v14 = vand.u32 4294901760, %v2850_v8  ;;  %v13040_v7 = vpack.c.bf16 %v3241_v47, %v3238_v46 }
  0x8a   : > { %11271 = vmatprep.subr.bf16.mxu0 %v12340_v0  ;;  %11307 = vmatprep.subr.bf16.mxu1 %v12340_v0 }
  0x8c   : > { %10288 = vmatmul.mubr.f32.vlgmr.msra.gmra.mrb[2].mxu0 %v12546_v37  ;;  %10354 = vmatmul.mubr.f32.vlgmr.msra.gmra.mrb[2].mxu1 %v12546_v37 }
  0x8d   : > { %11273 = vmatpush3.bf16.msra.mxu0 %v12696_v17  ;;  %11309 = vmatpush3.bf16.msra.mxu1 %v12698_v21 }
  0x8e   : > { %11274 = vmatprep.subr.bf16.mxu0 %v12340_v0  ;;  %11310 = vmatprep.subr.bf16.mxu1 %v12340_v0 }
  0x8f   : > { %10298 = vmatprep.mubr.msk.f32.mxu0 %vm12341_vm0, %v12342_v1  ;;  %10364 = vmatprep.mubr.msk.f32.mxu1 %vm12341_vm0, %v12342_v1 }
  0x91   : > { %11276 = vmatpush3.bf16.msra.mxu0 %v12720_v23  ;;  %11312 = vmatpush3.bf16.msra.mxu1 %v12722_v33 }
  0x92   : > { %11277 = vmatprep.subr.bf16.mxu0 %v12340_v0  ;;  %11313 = vmatprep.subr.bf16.mxu1 %v12340_v0 }
  0x94   : > { %10299 = vmatmul.mubr.f32.vlgmr.msra.gmra.mrb[2].mxu0 %v12566_v45  ;;  %10365 = vmatmul.mubr.f32.vlgmr.msra.gmra.mrb[2].mxu1 %v12566_v45 }
  0x95   : > { %11279 = vmatpush3.bf16.msra.mxu0 %v11278_v15  ;;  %11315 = vmatpush3.bf16.msra.mxu1 %v11314_v16  ;;  %v11335_v15 = vpack.c.bf16 %v2366_v12, %v2359_v10  ;;  %v11371_v16 = vpack.c.bf16 %v2851_v14, %v2844_v13  ;;  %v3813_v13 = vsub.f32 %v13004_v56, %v3812_v5 }
  0x96   : > { %11280 = vmatprep.subr.bf16.mxu0 %v12340_v0  ;;  %11316 = vmatprep.subr.bf16.mxu1 %v12340_v0  ;;  %v3820_v14 = vsub.f32 %v13006_v57, %v3819_v6 }
  0x97   : > { %10309 = vmatprep.mubr.msk.f32.mxu0 %vm12341_vm0, %v12342_v1  ;;  %10375 = vmatprep.mubr.msk.f32.mxu1 %vm12341_vm0, %v12342_v1 }
  0x99   : > { %11282 = vmatpush3.bf16.msra.mxu0 %v11281_v25  ;;  %11318 = vmatpush3.bf16.msra.mxu1 %v11317_v27  ;;  %v269_v25 = vld [vmem:[%s12487_s28 + $0xc0] sm:$0xff]  ;;  %v270_v27 = vld [vmem:[%s12487_s28 + $0xc8] sm:$0xff] }
  0x9a   : > { %11283 = vmatprep.subr.bf16.mxu0 %v12340_v0  ;;  %11319 = vmatprep.subr.bf16.mxu1 %v12340_v0  ;;  %v3232_v31 = vand.u32 4294901760, %v269_v25  ;;  %v3235_v32 = vand.u32 4294901760, %v270_v27 }
  0x9c   : > { %10310 = vmatmul.mubr.f32.vlgmr.msra.gmra.mrb[2].mxu0 %v12532_v29  ;;  %10376 = vmatmul.mubr.f32.vlgmr.msra.gmra.mrb[2].mxu1 %v12532_v29 }
  0x9d   : > { %11285 = vmatpush3.bf16.msra.mxu0 %v12696_v17  ;;  %11321 = vmatpush3.bf16.msra.mxu1 %v12698_v21  ;;  %v12856_v17 = vpack.c.bf16 %v2265_v24, %v2262_v26  ;;  %v12858_v21 = vpack.c.bf16 %v2750_v30, %v2747_v28  ;;  %v11350_v26 = vpack.c.bf16 %v2350_v49, %v2343_v48  ;;  %v273_v28 = vld [vmem:[%s12487_s28 + $0xe0] sm:$0xff]  ;;  %v274_v30 = vld [vmem:[%s12487_s28 + $0xe8] sm:$0xff] }
  0x9e   : > { %11286 = vmatprep.subr.bf16.mxu0 %v12340_v0  ;;  %11322 = vmatprep.subr.bf16.mxu1 %v12340_v0  ;;  %v11386_v24 = vpack.c.bf16 %v2835_v53, %v2828_v52  ;;  %v3717_v36 = vand.u32 4294901760, %v273_v28  ;;  %v3720_v38 = vand.u32 4294901760, %v274_v30  ;;  %v12996_v52 = vsub.f32 %v271_v39, %v3238_v46 }
  0x9f   : > { %10320 = vmatprep.mubr.msk.f32.mxu0 %vm12341_vm0, %v12342_v1  ;;  %10386 = vmatprep.mubr.msk.f32.mxu1 %vm12341_vm0, %v12342_v1  ;;  %v12998_v53 = vsub.f32 %v272_v40, %v3241_v47  ;;  %v12209_v47 = vld [vmem:[%s12487_s28 + $0x20] sm:$0xff] }
  0xa0   : > { %v12988_v48 = vsub.f32 %v273_v28, %v3717_v36  ;;  %v12990_v49 = vsub.f32 %v274_v30, %v3720_v38  ;;  %v11449_v28 = vpack.c.bf16 %v13006_v57, %v13004_v56  ;;  %v12211_v57 = vld [vmem:[%s12487_s28 + $0x10] sm:$0xff] }
  0xa1   : > { %11288 = vmatpush3.bf16.msra.mxu0 %v12720_v23  ;;  %11324 = vmatpush3.bf16.msra.mxu1 %v12722_v33  ;;  %v12882_v23 = vpack.c.bf16 %v2756_v44, %v2753_v43  ;;  %v2345_v33 = vand.u32 4294901760, %v2344_v54  ;;  %v12984_v43 = vsub.f32 %v269_v25, %v3232_v31  ;;  %v12986_v44 = vsub.f32 %v270_v27, %v3235_v32 }
  0xa2   : > { %11325 = vmatprep.subr.bf16.mxu0 %v12340_v0  ;;  %11361 = vmatprep.subr.bf16.mxu1 %v12340_v0  ;;  %v3798_v58 = vand.u32 4294901760, %v12988_v48  ;;  %v3805_v60 = vand.u32 4294901760, %v12990_v49  ;;  %v11413_v27 = vpack.c.bf16 %v12998_v53, %v12996_v52 }
  0xa3   : > { %v11332_v9 = vpack.c.bf16 %v2352_v2, %v2345_v33  ;;  %v3313_v54 = vand.u32 4294901760, %v12984_v43  ;;  %v3320_v55 = vand.u32 4294901760, %v12986_v44  ;;  %v3327_v33 = vand.u32 4294901760, %v12996_v52 }
  0xa4   : > { %10321 = vmatmul.mubr.f32.vlgmr.msra.gmra.mrb[2].mxu0 %v12532_v29  ;;  %10387 = vmatmul.mubr.f32.vlgmr.msra.gmra.mrb[2].mxu1 %v12532_v29  ;;  %v3334_v2 = vand.u32 4294901760, %v12998_v53  ;;  %v3799_v3 = vsub.f32 %v12988_v48, %v3798_v58  ;;  %v3806_v4 = vsub.f32 %v12990_v49, %v3805_v60  ;;  %v11410_v25 = vpack.c.bf16 %v12986_v44, %v12984_v43 }
  0xa5   : > { %11327 = vmatpush3.bf16.msra.mxu0 %v12856_v17  ;;  %11363 = vmatpush3.bf16.msra.mxu1 %v12858_v21  ;;  %v3314_v61 = vsub.f32 %v12984_v43, %v3313_v54  ;;  %v3321_v62 = vsub.f32 %v12986_v44, %v3320_v55  ;;  %v11458_v30 = vpack.c.bf16 %v3805_v60, %v3798_v58  ;;  %v4278_v43 = vsel %vm4201_vm2, %v12207_v42, 0  ;;  %v12208_v44 = vld [vmem:[%s12487_s28 + $0x8] sm:$0xff]  ;;  %v12212_v60 = vld [vmem:[%s12487_s28 + $0x18] sm:$0xff] }
  0xa6   : > { %11328 = vmatprep.subr.bf16.mxu0 %v12340_v0  ;;  %11364 = vmatprep.subr.bf16.mxu1 %v12340_v0  ;;  %v3335_v10 = vsub.f32 %v12998_v53, %v3334_v2  ;;  %v3807_v12 = vand.u32 4294901760, %v3806_v4  ;;  %v4281_v46 = vsel %vm4201_vm2, %v12208_v44, 0  ;;  %v4284_v58 = vsel %vm4201_vm2, %v12211_v57, 0 }
  0xa7   : > { %10397 = vmatprep.mubr.msk.f32.mxu0 %vm12341_vm0, %v12342_v1  ;;  %10463 = vmatprep.mubr.msk.f32.mxu1 %vm12341_vm0, %v12342_v1  ;;  %v3322_v8 = vand.u32 4294901760, %v3321_v62  ;;  %v12214_v62 = vld [vmem:[%s12487_s28 + $0x38] sm:$0xff] }
  0xa9   : > { %11330 = vmatpush3.bf16.msra.mxu0 %v12880_v63  ;;  %11366 = vmatpush3.bf16.msra.mxu1 %v12882_v23 }
  0xaa   : > { %11331 = vmatprep.subr.bf16.mxu0 %v12340_v0  ;;  %11367 = vmatprep.subr.bf16.mxu1 %v12340_v0 }
  0xac   : > { %10398 = vmatmul.mubr.f32.vlgmr.msra.gmra.mrb[4].mxu0 %v12582_v59  ;;  %10464 = vmatmul.mubr.f32.vlgmr.msra.gmra.mrb[4].mxu1 %v12582_v59 }
  0xad   : > { %11333 = vmatpush3.bf16.msra.mxu0 %v11332_v9  ;;  %11369 = vmatpush3.bf16.msra.mxu1 %v11368_v11  ;;  %v3328_v9 = vsub.f32 %v12996_v52, %v3327_v33  ;;  %v3800_v11 = vand.u32 4294901760, %v3799_v3  ;;  %v4293_v52 = vand.u32 4294901760, %v4281_v46 }
  0xae   : > { %11334 = vmatprep.subr.bf16.mxu0 %v12340_v0  ;;  %11370 = vmatprep.subr.bf16.mxu1 %v12340_v0 }
  0xaf   : > { %10408 = vmatprep.mubr.msk.f32.mxu0 %vm12341_vm0, %v12342_v1  ;;  %10474 = vmatprep.mubr.msk.f32.mxu1 %vm12341_vm0, %v12342_v1 }
  0xb1   : > { %11336 = vmatpush3.bf16.msra.mxu0 %v11335_v15  ;;  %11372 = vmatpush3.bf16.msra.mxu1 %v11371_v16  ;;  %v3329_v15 = vand.u32 4294901760, %v3328_v9  ;;  %v3336_v16 = vand.u32 4294901760, %v3335_v10 }
  0xb2   : > { %11337 = vmatprep.subr.bf16.mxu0 %v12340_v0  ;;  %11373 = vmatprep.subr.bf16.mxu1 %v12340_v0 }
  0xb4   : > { %10409 = vmatmul.mubr.f32.vlgmr.msra.gmra.mrb[4].mxu0 %v12532_v29  ;;  %10475 = vmatmul.mubr.f32.vlgmr.msra.gmra.mrb[4].mxu1 %v12532_v29 }
  0xb5   : > { %11339 = vmatpush3.bf16.msra.mxu0 %v11338_v18  ;;  %11375 = vmatpush3.bf16.msra.mxu1 %v11374_v19  ;;  %v11440_v19 = vpack.c.bf16 %v3807_v12, %v3800_v11 }
  0xb6   : > { %11340 = vmatprep.subr.bf16.mxu0 %v12340_v0  ;;  %11376 = vmatprep.subr.bf16.mxu1 %v12340_v0 }
  0xb7   : > { %10419 = vmatprep.mubr.msk.f32.mxu0 %vm12341_vm0, %v12342_v1  ;;  %10485 = vmatprep.mubr.msk.f32.mxu1 %vm12341_vm0, %v12342_v1 }
  0xb9   : > { %11342 = vmatpush3.bf16.msra.mxu0 %v11341_v20  ;;  %11378 = vmatpush3.bf16.msra.mxu1 %v11377_v22  ;;  %v3814_v20 = vand.u32 4294901760, %v3813_v13  ;;  %v3821_v22 = vand.u32 4294901760, %v3820_v14 }
  0xba   : > { %11343 = vmatprep.subr.bf16.mxu0 %v12340_v0  ;;  %11379 = vmatprep.subr.bf16.mxu1 %v12340_v0 }
  0xbc   : > { %10420 = vmatmul.mubr.f32.vlgmr.msra.gmra.mrb[4].mxu0 %v12546_v37  ;;  %10486 = vmatmul.mubr.f32.vlgmr.msra.gmra.mrb[4].mxu1 %v12546_v37 }
  0xbd   : > { %11345 = vmatpush3.bf16.msra.mxu0 %v12856_v17  ;;  %11381 = vmatpush3.bf16.msra.mxu1 %v12858_v21 }
  0xbe   : > { %11346 = vmatprep.subr.bf16.mxu0 %v12340_v0  ;;  %11382 = vmatprep.subr.bf16.mxu1 %v12340_v0 }
  0xbf   : > { %10430 = vmatprep.mubr.msk.f32.mxu0 %vm12341_vm0, %v12342_v1  ;;  %10496 = vmatprep.mubr.msk.f32.mxu1 %vm12341_vm0, %v12342_v1 }
  0xc1   : > { %11348 = vmatpush3.bf16.msra.mxu0 %v12880_v63  ;;  %11384 = vmatpush3.bf16.msra.mxu1 %v12882_v23 }
  0xc2   : > { %11349 = vmatprep.subr.bf16.mxu0 %v12340_v0  ;;  %11385 = vmatprep.subr.bf16.mxu1 %v12340_v0 }
  0xc4   : > { %10431 = vmatmul.mubr.f32.vlgmr.msra.gmra.mrb[4].mxu0 %v12566_v45  ;;  %10497 = vmatmul.mubr.f32.vlgmr.msra.gmra.mrb[4].mxu1 %v12566_v45 }
  0xc5   : > { %11351 = vmatpush3.bf16.msra.mxu0 %v11350_v26  ;;  %11387 = vmatpush3.bf16.msra.mxu1 %v11386_v24  ;;  %v11407_v26 = vpack.c.bf16 %v3336_v16, %v3329_v15  ;;  %v11443_v24 = vpack.c.bf16 %v3821_v22, %v3814_v20 }
  0xc6   : > { %11352 = vmatprep.subr.bf16.mxu0 %v12340_v0  ;;  %11388 = vmatprep.subr.bf16.mxu1 %v12340_v0 }
  0xc7   : > { %10441 = vmatprep.mubr.msk.f32.mxu0 %vm12341_vm0, %v12342_v1  ;;  %10507 = vmatprep.mubr.msk.f32.mxu1 %vm12341_vm0, %v12342_v1 }
  0xc9   : > { %11354 = vmatpush3.bf16.msra.mxu0 %v11353_v34  ;;  %11390 = vmatpush3.bf16.msra.mxu1 %v11389_v35 }
  0xca   : > { %11355 = vmatprep.subr.bf16.mxu0 %v12340_v0  ;;  %11391 = vmatprep.subr.bf16.mxu1 %v12340_v0 }
  0xcc   : > { %10442 = vmatmul.mubr.f32.vlgmr.msra.gmra.mrb[4].mxu0 %v12532_v29  ;;  %10508 = vmatmul.mubr.f32.vlgmr.msra.gmra.mrb[4].mxu1 %v12532_v29 }
  0xcd   : > { %11357 = vmatpush3.bf16.msra.mxu0 %v12856_v17  ;;  %11393 = vmatpush3.bf16.msra.mxu1 %v12858_v21  ;;  %v13016_v17 = vpack.c.bf16 %v3235_v32, %v3232_v31  ;;  %v13018_v21 = vpack.c.bf16 %v3720_v38, %v3717_v36  ;;  %v11425_v31 = vpack.c.bf16 %v3334_v2, %v3327_v33  ;;  %v4787_v33 = vsel %vm4201_vm2, %v12214_v62, 0 }
  0xce   : > { %11358 = vmatprep.subr.bf16.mxu0 %v12340_v0  ;;  %11394 = vmatprep.subr.bf16.mxu1 %v12340_v0  ;;  %v11461_v32 = vpack.c.bf16 %v3819_v6, %v3812_v5  ;;  %v4296_v2 = vand.u32 4294901760, %v4284_v58  ;;  %v4799_v5 = vand.u32 4294901760, %v4787_v33 }
  0xcf   : > { %10452 = vmatprep.mubr.msk.f32.mxu0 %vm12341_vm0, %v12342_v1  ;;  %10518 = vmatprep.mubr.msk.f32.mxu1 %vm12341_vm0, %v12342_v1 }
  0xd0   : > { %v13204_v9 = vsub.f32 %v4284_v58, %v4296_v2  ;;  %v13212_v13 = vsub.f32 %v4787_v33, %v4799_v5 }
  0xd1   : > { %11360 = vmatpush3.bf16.msra.mxu0 %v12880_v63  ;;  %11396 = vmatpush3.bf16.msra.mxu1 %v12882_v23  ;;  %v13042_v63 = vpack.c.bf16 %v3726_v51, %v3723_v50  ;;  %v3315_v23 = vand.u32 4294901760, %v3314_v61  ;;  %v4290_v51 = vand.u32 4294901760, %v4278_v43 }
  0xd2   : > { %11397 = vmatprep.subr.bf16.mxu0 %v12340_v0  ;;  %11433 = vmatprep.subr.bf16.mxu1 %v12340_v0 }
  0xd3   : > { %v11404_v18 = vpack.c.bf16 %v3322_v8, %v3315_v23  ;;  %v13194_v6 = vsub.f32 %v4278_v43, %v4290_v51 }
  0xd4   : > { %10453 = vmatmul.mubr.f32.vlgmr.msra.gmra.mrb[4].mxu0 %v12532_v29  ;;  %10519 = vmatmul.mubr.f32.vlgmr.msra.gmra.mrb[4].mxu1 %v12532_v29 }
  0xd5   : > { %11399 = vmatpush3.bf16.msra.mxu0 %v13016_v17  ;;  %11435 = vmatpush3.bf16.msra.mxu1 %v13018_v21  ;;  %v4371_v14 = vand.u32 4294901760, %v13194_v6 }
  0xd6   : > { %11400 = vmatprep.subr.bf16.mxu0 %v12340_v0  ;;  %11436 = vmatprep.subr.bf16.mxu1 %v12340_v0 }
  0xd7   : > { %10529 = vmatprep.mubr.msk.f32.mxu0 %vm12341_vm0, %v12342_v1  ;;  %10595 = vmatprep.mubr.msk.f32.mxu1 %vm12341_vm0, %v12342_v1 }
  0xd9   : > { %11402 = vmatpush3.bf16.msra.mxu0 %v13040_v7  ;;  %11438 = vmatpush3.bf16.msra.mxu1 %v13042_v63 }
  0xda   : > { %11403 = vmatprep.subr.bf16.mxu0 %v12340_v0  ;;  %11439 = vmatprep.subr.bf16.mxu1 %v12340_v0 }
  0xdc   : > { %10530 = vmatmul.mubr.f32.vlgmr.msra.gmra.mrb[6].mxu0 %v12582_v59  ;;  %10596 = vmatmul.mubr.f32.vlgmr.msra.gmra.mrb[6].mxu1 %v12582_v59  ;;  %v11446_v59 = vpack.c.bf16 %v12990_v49, %v12988_v48  ;;  %v4778_v48 = vsel %vm4201_vm2, %v12209_v47, 0  ;;  %v12210_v49 = vld [vmem:[%s12487_s28 + $0x28] sm:$0xff] }
  0xdd   : > { %11405 = vmatpush3.bf16.msra.mxu0 %v11404_v18  ;;  %11441 = vmatpush3.bf16.msra.mxu1 %v11440_v19  ;;  %v4781_v50 = vsel %vm4201_vm2, %v12210_v49, 0  ;;  %v4790_v53 = vand.u32 4294901760, %v4778_v48  ;;  %v4372_v19 = vsub.f32 %v13194_v6, %v4371_v14 }
  0xde   : > { %11406 = vmatprep.subr.bf16.mxu0 %v12340_v0  ;;  %11442 = vmatprep.subr.bf16.mxu1 %v12340_v0 }
  0xdf   : > { %10540 = vmatprep.mubr.msk.f32.mxu0 %vm12341_vm0, %v12342_v1  ;;  %10606 = vmatprep.mubr.msk.f32.mxu1 %vm12341_vm0, %v12342_v1 }
  0xe1   : > { %11408 = vmatpush3.bf16.msra.mxu0 %v11407_v26  ;;  %11444 = vmatpush3.bf16.msra.mxu1 %v11443_v24  ;;  %v4373_v24 = vand.u32 4294901760, %v4372_v19 }
  0xe2   : > { %11409 = vmatprep.subr.bf16.mxu0 %v12340_v0  ;;  %11445 = vmatprep.subr.bf16.mxu1 %v12340_v0 }
  0xe4   : > { %10541 = vmatmul.mubr.f32.vlgmr.msra.gmra.mrb[6].mxu0 %v12532_v29  ;;  %10607 = vmatmul.mubr.f32.vlgmr.msra.gmra.mrb[6].mxu1 %v12532_v29 }
  0xe5   : > { %11411 = vmatpush3.bf16.msra.mxu0 %v11410_v25  ;;  %11447 = vmatpush3.bf16.msra.mxu1 %v11446_v59 }
  0xe6   : > { %11412 = vmatprep.subr.bf16.mxu0 %v12340_v0  ;;  %11448 = vmatprep.subr.bf16.mxu1 %v12340_v0 }
  0xe7   : > { %10551 = vmatprep.mubr.msk.f32.mxu0 %vm12341_vm0, %v12342_v1  ;;  %10617 = vmatprep.mubr.msk.f32.mxu1 %vm12341_vm0, %v12342_v1 }
  0xe9   : > { %11414 = vmatpush3.bf16.msra.mxu0 %v11413_v27  ;;  %11450 = vmatpush3.bf16.msra.mxu1 %v11449_v28 }
  0xea   : > { %11415 = vmatprep.subr.bf16.mxu0 %v12340_v0  ;;  %11451 = vmatprep.subr.bf16.mxu1 %v12340_v0 }
  0xec   : > { %10552 = vmatmul.mubr.f32.vlgmr.msra.gmra.mrb[6].mxu0 %v12546_v37  ;;  %10618 = vmatmul.mubr.f32.vlgmr.msra.gmra.mrb[6].mxu1 %v12546_v37  ;;  %v11422_v37 = vpack.c.bf16 %v3320_v55, %v3313_v54  ;;  %v4793_v54 = vand.u32 4294901760, %v4781_v50  ;;  %v13178_v55 = vpack.c.bf16 %v4293_v52, %v4290_v51 }
  0xed   : > { %11417 = vmatpush3.bf16.msra.mxu0 %v13016_v17  ;;  %11453 = vmatpush3.bf16.msra.mxu1 %v13018_v21 }
  0xee   : > { %11418 = vmatprep.subr.bf16.mxu0 %v12340_v0  ;;  %11454 = vmatprep.subr.bf16.mxu1 %v12340_v0  ;;  %v13180_v56 = vpack.c.bf16 %v4793_v54, %v4790_v53  ;;  %v13200_v23 = vsub.f32 %v4781_v50, %v4793_v54 }
  0xef   : > { %10562 = vmatprep.mubr.msk.f32.mxu0 %vm12341_vm0, %v12342_v1  ;;  %10628 = vmatprep.mubr.msk.f32.mxu1 %vm12341_vm0, %v12342_v1 }
  0xf0   : > { %v4878_v18 = vand.u32 4294901760, %v13200_v23 }
  0xf1   : > { %11420 = vmatpush3.bf16.msra.mxu0 %v13040_v7  ;;  %11456 = vmatpush3.bf16.msra.mxu1 %v13042_v63 }
  0xf2   : > { %11421 = vmatprep.subr.bf16.mxu0 %v12340_v0  ;;  %11457 = vmatprep.subr.bf16.mxu1 %v12340_v0  ;;  %v4879_v26 = vsub.f32 %v13200_v23, %v4878_v18 }
  0xf4   : > { %10563 = vmatmul.mubr.f32.vlgmr.msra.gmra.mrb[6].mxu0 %v12566_v45  ;;  %10629 = vmatmul.mubr.f32.vlgmr.msra.gmra.mrb[6].mxu1 %v12566_v45  ;;  %v13158_v45 = vpop.permute.xlu0 %314  ;;  %v4880_v27 = vand.u32 4294901760, %v4879_v26 }
  0xf5   : > { %11423 = vmatpush3.bf16.msra.mxu0 %v11422_v37  ;;  %11459 = vmatpush3.bf16.msra.mxu1 %v11458_v30  ;;  %v4385_v30 = vand.u32 4294901760, %v13204_v9 }
  0xf6   : > { %11424 = vmatprep.subr.bf16.mxu0 %v12340_v0  ;;  %11460 = vmatprep.subr.bf16.mxu1 %v12340_v0 }
  0xf7   : > { %10573 = vmatprep.mubr.msk.f32.mxu0 %vm12341_vm0, %v12342_v1  ;;  %10639 = vmatprep.mubr.msk.f32.mxu1 %vm12341_vm0, %v12342_v1 }
  0xf9   : > { %11426 = vmatpush3.bf16.msra.mxu0 %v11425_v31  ;;  %11462 = vmatpush3.bf16.msra.mxu1 %v11461_v32 }
  0xfa   : > { %11427 = vmatprep.subr.bf16.mxu0 %v12340_v0  ;;  %11463 = vmatprep.subr.bf16.mxu1 %v12340_v0 }
  0xfc   : > { %10574 = vmatmul.mubr.f32.vlgmr.msra.gmra.mrb[6].mxu0 %v12532_v29  ;;  %10640 = vmatmul.mubr.f32.vlgmr.msra.gmra.mrb[6].mxu1 %v12532_v29 }
  0xfd   : > { %11429 = vmatpush3.bf16.msra.mxu0 %v13016_v17  ;;  %11465 = vmatpush3.bf16.msra.mxu1 %v13018_v21  ;;  %v4287_v17 = vsel %vm4201_vm2, %v12212_v60, 0  ;;  %v12213_v21 = vld [vmem:[%s12487_s28 + $0x30] sm:$0xff] }
  0xfe   : > { %11430 = vmatprep.subr.bf16.mxu0 %v12340_v0  ;;  %11466 = vmatprep.subr.bf16.mxu1 %v12340_v0  ;;  %v4784_v61 = vsel %vm4201_vm2, %v12213_v21, 0  ;;  %v4299_v3 = vand.u32 4294901760, %v4287_v17 }
  0xff   : > { %10584 = vmatprep.mubr.msk.f32.mxu0 %vm12341_vm0, %v12342_v1  ;;  %10650 = vmatprep.mubr.msk.f32.mxu1 %vm12341_vm0, %v12342_v1  ;;  %v4796_v4 = vand.u32 4294901760, %v4784_v61 }
 0x100   : > { %v13202_v8 = vpack.c.bf16 %v4299_v3, %v4296_v2  ;;  %v13206_v10 = vsub.f32 %v4287_v17, %v4299_v3 }
 0x101   : > { %11432 = vmatpush3.bf16.msra.mxu0 %v13040_v7  ;;  %11468 = vmatpush3.bf16.msra.mxu1 %v13042_v63  ;;  %v13196_v7 = vsub.f32 %v4281_v46, %v4293_v52  ;;  %v13198_v63 = vsub.f32 %v4778_v48, %v4790_v53  ;;  %v13208_v11 = vpack.c.bf16 %v4799_v5, %v4796_v4 }
 0x102   : > { %11469 = vmatprep.subr.bf16.mxu0 %v12340_v0  ;;  %11505 = vmatprep.subr.bf16.mxu1 %v12340_v0  ;;  %v13210_v12 = vsub.f32 %v4784_v61, %v4796_v4  ;;  %v4392_v31 = vand.u32 4294901760, %v13206_v10  ;;  %v11485_v17 = vpack.c.bf16 %v13206_v10, %v13204_v9 }
 0x103   : > { %v4378_v15 = vand.u32 4294901760, %v13196_v7  ;;  %v4871_v16 = vand.u32 4294901760, %v13198_v63  ;;  %v11482_v58 = vpack.c.bf16 %v13196_v7, %v13194_v6  ;;  %v11518_v60 = vpack.c.bf16 %v13200_v23, %v13198_v63 }
 0x104   : > { %10585 = vmatmul.mubr.f32.vlgmr.msra.gmra.mrb[6].mxu0 %v12532_v29  ;;  %10651 = vmatmul.mubr.f32.vlgmr.msra.gmra.mrb[6].mxu1 %v12532_v29  ;;  %v4885_v32 = vand.u32 4294901760, %v13210_v12  ;;  %v11521_v21 = vpack.c.bf16 %v13212_v13, %v13210_v12  ;;  %v13264_v33 = vpack.c.bf16 %v4392_v31, %v4385_v30 }
 0x105   : > { %10661 = vmatprep.mubr.msk.f32.mxu0 %vm12341_vm0, %v12342_v1  ;;  %10727 = vmatprep.mubr.msk.f32.mxu1 %vm12341_vm0, %v12342_v1  ;;  %v4379_v20 = vsub.f32 %v13196_v7, %v4378_v15  ;;  %v4872_v22 = vsub.f32 %v13198_v63, %v4871_v16  ;;  %v13260_v61 = vpack.c.bf16 %v4378_v15, %v4371_v14 }
 0x106   : > { %v13262_v62 = vpack.c.bf16 %v4878_v18, %v4871_v16 }
 0x107   : > { %v4380_v25 = vand.u32 4294901760, %v4379_v20  ;;  %v4873_v59 = vand.u32 4294901760, %v4872_v22 }
 0x109   : > { %v13226_v28 = vpack.c.bf16 %v4380_v25, %v4373_v24  ;;  %v13228_v37 = vpack.c.bf16 %v4880_v27, %v4873_v59 }
 0x10a   : > { %11471 = vmatpush3.bf16.xpose.msra.mxu0 %v13178_v55  ;;  %11507 = vmatpush3.bf16.xpose.msra.mxu1 %v13180_v56 }
 0x10b   : > { %11472 = vmatprep.subr.bf16.mxu0 %v12340_v0  ;;  %11508 = vmatprep.subr.bf16.mxu1 %v12340_v0 }
 0x112   : > { %11474 = vmatpush3.bf16.xpose.msra.mxu0 %v13202_v8  ;;  %11510 = vmatpush3.bf16.xpose.msra.mxu1 %v13208_v11 }
 0x113   : > { %11475 = vmatprep.subr.bf16.mxu0 %v12340_v0  ;;  %11511 = vmatprep.subr.bf16.mxu1 %v12340_v0 }
 0x147   : > { %v802_v34 = vpop.f32.mrb[0].mxu0  ;;  %v1287_v35 = vpop.f32.mrb[0].mxu1 }
 0x148   : > { %v13161_v36 = vadd.f32 %v802_v34, %v13158_v45  ;;  %v13164_v38 = vadd.f32 %v1287_v35, %v13158_v45  ;;  %v10190_v29 = vpop.f32.mrb[1].mxu0  ;;  %v10256_v39 = vpop.f32.mrb[1].mxu1  ;;  %v4892_v34 = vand.u32 4294901760, %v13212_v13 }
 0x149   : > { %v4386_v39 = vsub.f32 %v13204_v9, %v4385_v30 }
 0x14a   : > { %v4205_v40 = vsel %vm4201_vm2, %v13164_v38, -inf  ;;  %v4202_v41 = vsel %vm4201_vm2, %v13161_v36, -inf  ;;  %v4893_v42 = vsub.f32 %v13212_v13, %v4892_v34  ;;  %v13274_v14 = vpack.c.bf16 %v4892_v34, %v4885_v32 }
 0x14b   : > { %4206 = vmax.xlane.f32.xlu1 %v4205_v40  ;;  %4203 = vmax.xlane.f32.xlu0 %v4202_v41  ;;  %v4393_v40 = vsub.f32 %v13206_v10, %v4392_v31  ;;  %v4886_v41 = vsub.f32 %v13210_v12, %v4885_v32  ;;  %v4387_v47 = vand.u32 4294901760, %v4386_v39 }
 0x14c   : > { %v4894_v50 = vand.u32 4294901760, %v4893_v42 }
 0x14d   : > { %v4394_v48 = vand.u32 4294901760, %v4393_v40  ;;  %v4887_v49 = vand.u32 4294901760, %v4886_v41 }
 0x14f   : > { %v13246_v53 = vpack.c.bf16 %v4394_v48, %v4387_v47  ;;  %v13248_v54 = vpack.c.bf16 %v4894_v50, %v4887_v49 }
 0x177   : > { %v1772_v35 = vpop.f32.mrb[2].mxu0  ;;  %v2257_v29 = vpop.f32.mrb[2].mxu1 }
 0x178   : > { %v13239_v43 = vadd.f32 %v1772_v35, %v13158_v45  ;;  %v10322_v44 = vpop.f32.mrb[3].mxu0  ;;  %v10388_v46 = vpop.f32.mrb[3].mxu1  ;;  %v13242_v51 = vadd.f32 %v2257_v29, %v13158_v45 }
 0x17a   : > { %v4208_v52 = vsel %vm4201_vm2, %v13239_v43, -inf  ;;  %v4211_v57 = vsel %vm4201_vm2, %v13242_v51, -inf }
 0x17b   : > { %4209 = vmax.xlane.f32.xlu1 %v4208_v52 }
 0x17f   : > { %4212 = vmax.xlane.f32.xlu1 %v4211_v57 }
 0x1a7   : > { %v2742_v2 = vpop.f32.mrb[4].mxu0  ;;  %v3227_v3 = vpop.f32.mrb[4].mxu1 }
 0x1a8   : > { %v13267_v4 = vadd.f32 %v2742_v2, %v13158_v45  ;;  %v10454_v5 = vpop.f32.mrb[5].mxu0  ;;  %v10520_v19 = vpop.f32.mrb[5].mxu1  ;;  %v13270_v20 = vadd.f32 %v3227_v3, %v13158_v45 }
 0x1aa   : > { %v4214_v22 = vsel %vm4201_vm2, %v13267_v4, -inf  ;;  %v4217_v15 = vsel %vm4201_vm2, %v13270_v20, -inf }
 0x1ab   : > { %4215 = vmax.xlane.f32.xlu1 %v4214_v22 }
 0x1af   : > { %4218 = vmax.xlane.f32.xlu1 %v4217_v15  ;;  %v12219_v15 = vld [vmem:[%s12487_s28 + $0x50] sm:$0xff] }
 0x1d7   : > { %v3712_v16 = vpop.f32.mrb[6].mxu0  ;;  %v4197_v18 = vpop.f32.mrb[6].mxu1 }
 0x1d8   : > { %v13279_v26 = vadd.f32 %v3712_v16, %v13158_v45  ;;  %v4207_v24 = vpop.xlane.xlu1 %4206  ;;  %v4204_v25 = vpop.xlane.xlu0 %4203  ;;  %v13284_v32 = vadd.f32 %v4197_v18, %v13158_v45  ;;  %v12220_v16 = vld [vmem:[%s12487_s28 + $0x58] sm:$0xff] }
 0x1d9   : > { %v4227_v59 = vsub.f32 %v13164_v38, %v4207_v24  ;;  %v4226_v27 = vsub.f32 %v13161_v36, %v4204_v25  ;;  %v10586_v30 = vpop.f32.mrb[7].mxu0  ;;  %v10652_v31 = vpop.f32.mrb[7].mxu1  ;;  %v5287_v18 = vsel %vm4201_vm2, %v12220_v16, 0 }
 0x1da   : > { %v4220_v34 = vsel %vm4201_vm2, %v13279_v26, -inf  ;;  %v4223_v39 = vsel %vm4201_vm2, %v13284_v32, -inf  ;;  %v12221_v30 = vld [vmem:[%s12487_s28 + $0x70] sm:$0xff] }
 0x1db   : > { %v4236_v35 = vmul.f32 1.442695, %v4227_v59  ;;  %v4234_v29 = vmul.f32 1.442695, %v4226_v27  ;;  %4221 = vmax.xlane.f32.xlu1 %v4220_v34  ;;  %v5784_v31 = vsel %vm4201_vm2, %v12221_v30, 0  ;;  %v12222_v34 = vld [vmem:[%s12487_s28 + $0x78] sm:$0xff] }
 0x1dd   : > { %12175 = vpow2.f32 %v4236_v35  ;;  %v5787_v35 = vsel %vm4201_vm2, %v12222_v34, 0 }
 0x1de   : > { %12177 = vpow2.f32 %v4234_v29 }
 0x1df   : > { %4224 = vmax.xlane.f32.xlu1 %v4223_v39 }
 0x1e7   : > { %v12176_v38 = vpop.eup %12175 }
 0x1e8   : > { %v12178_v40 = vpop.eup %12177  ;;  %v4775_v36 = vsel %vm4201_vm2, %v12176_v38, 0  ;;  %v4253_v48 = vsel %vm4201_vm2, %v12176_v38, 0.0 }
 0x1e9   : > { %v13291_v41 = vand.u32 4294901760, %v4775_v36  ;;  %v4275_v45 = vsel %vm4201_vm2, %v12178_v40, 0  ;;  %v4250_v42 = vsel %vm4201_vm2, %v12178_v40, 0.0 }
 0x1ea   : > { %v13295_v44 = vand.u32 4294901760, %v4275_v45  ;;  %4251 = vadd.xlane.f32.xlu1 %v4250_v42  ;;  %v5796_v42 = vand.u32 4294901760, %v5784_v31 }
 0x1eb   : > { %v4859_v46 = vsub.f32 %v4775_v36, %v13291_v41 }
 0x1ec   : > { %v4359_v47 = vsub.f32 %v4275_v45, %v13295_v44  ;;  %v5299_v45 = vand.u32 4294901760, %v5287_v18 }
 0x1ed   : > { %v4860_v49 = vand.u32 4294901760, %v4859_v46 }
 0x1ee   : > { %4254 = vadd.xlane.f32.xlu1 %v4253_v48  ;;  %v4360_v50 = vand.u32 4294901760, %v4359_v47 }
 0x1ef   : > { %v4861_v52 = vsub.f32 %v4859_v46, %v4860_v49 }
 0x1f0   : > { %v4361_v57 = vsub.f32 %v4359_v47, %v4360_v50 }
 0x1f1   : > { %v4862_v2 = vand.u32 4294901760, %v4861_v52 }
 0x1f2   : > { %v4362_v3 = vand.u32 4294901760, %v4361_v57 }
 0x1f3   : > { %10728 = vmatmul.mubr.f32.vlgmr.msra.gmra.mrb[8].mxu1 %v4862_v2 }
 0x1f4   : > { %10662 = vmatmul.mubr.f32.vlgmr.msra.gmra.mrb[8].mxu0 %v4362_v3  ;;  %11513 = vmatpush3.bf16.xpose.msra.mxu1 %v13228_v37 }
 0x1f5   : > { %11477 = vmatpush3.bf16.xpose.msra.mxu0 %v13226_v28  ;;  %11514 = vmatprep.subr.bf16.mxu1 %v12340_v0 }
 0x1f6   : > { %11478 = vmatprep.subr.bf16.mxu0 %v12340_v0  ;;  %10672 = vmatprep.mubr.msk.f32.mxu0 %vm12341_vm0, %v12342_v1 }
 0x1f7   : > { %10738 = vmatprep.mubr.msk.f32.mxu1 %vm12341_vm0, %v12342_v1 }
 0x1fc   : > { %11516 = vmatpush3.bf16.xpose.msra.mxu1 %v13248_v54 }
 0x1fd   : > { %11480 = vmatpush3.bf16.xpose.msra.mxu0 %v13246_v53  ;;  %11517 = vmatprep.subr.bf16.mxu1 %v12340_v0 }
 0x1fe   : > { %11481 = vmatprep.subr.bf16.mxu0 %v12340_v0 }
 0x203   : > { %10739 = vmatmul.mubr.f32.vlgmr.msra.gmra.mrb[8].mxu1 %v13291_v41 }
 0x204   : > { %10673 = vmatmul.mubr.f32.vlgmr.msra.gmra.mrb[8].mxu0 %v13295_v44  ;;  %11519 = vmatpush3.bf16.xpose.msra.mxu1 %v11518_v60 }
 0x205   : > { %11483 = vmatpush3.bf16.xpose.msra.mxu0 %v11482_v58  ;;  %11520 = vmatprep.subr.bf16.mxu1 %v12340_v0  ;;  %v12216_v58 = vld [vmem:[%s12487_s28 + $0x68] sm:$0xff] }
 0x206   : > { %11484 = vmatprep.subr.bf16.mxu0 %v12340_v0  ;;  %10683 = vmatprep.mubr.msk.f32.mxu0 %vm12341_vm0, %v12342_v1 }
 0x207   : > { %10749 = vmatprep.mubr.msk.f32.mxu1 %vm12341_vm0, %v12342_v1 }
 0x208   : > { %v4210_v28 = vpop.xlane.xlu1 %4209 }
 0x209   : > { %v4228_v37 = vsub.f32 %v13239_v43, %v4210_v28 }
 0x20b   : > { %v4238_v53 = vmul.f32 1.442695, %v4228_v37 }
 0x20c   : > { %11522 = vmatpush3.bf16.xpose.msra.mxu1 %v11521_v21  ;;  %v4213_v6 = vpop.xlane.xlu1 %4212 }
 0x20d   : > { %12179 = vpow2.f32 %v4238_v53  ;;  %11486 = vmatpush3.bf16.xpose.msra.mxu0 %v11485_v17  ;;  %v4229_v7 = vsub.f32 %v13242_v51, %v4213_v6  ;;  %11523 = vmatprep.subr.bf16.mxu1 %v12340_v0  ;;  %v12215_v51 = vld [vmem:[%s12487_s28 + $0x60] sm:$0xff]  ;;  %v12218_v17 = vld [vmem:[%s12487_s28 + $0x48] sm:$0xff]  ;;  %v13446_v53 = vsub.f32 %v5784_v31, %v5796_v42 }
 0x20e   : > { %11487 = vmatprep.subr.bf16.mxu0 %v12340_v0  ;;  %v5778_v54 = vsel %vm4201_vm2, %v12215_v51, 0  ;;  %v5281_v21 = vsel %vm4201_vm2, %v12218_v17, 0 }
 0x20f   : > { %v4240_v63 = vmul.f32 1.442695, %v4229_v7  ;;  %v5293_v22 = vand.u32 4294901760, %v5281_v21 }
 0x211   : > { %12181 = vpow2.f32 %v4240_v63  ;;  %v13408_v38 = vsub.f32 %v5281_v21, %v5293_v22 }
 0x213   : > { %10750 = vmatmul.mubr.f32.vlgmr.msra.gmra.mrb[8].mxu1 %v4859_v46  ;;  %v5799_v46 = vand.u32 4294901760, %v5787_v35 }
 0x214   : > { %10684 = vmatmul.mubr.f32.vlgmr.msra.gmra.mrb[8].mxu0 %v4359_v47  ;;  %11525 = vmatpush3.bf16.xpose.msra.mxu1 %v13180_v56 }
 0x215   : > { %11489 = vmatpush3.bf16.xpose.msra.mxu0 %v13178_v55  ;;  %11526 = vmatprep.subr.bf16.mxu1 %v12340_v0  ;;  %v13434_v2 = vpack.c.bf16 %v5799_v46, %v5796_v42  ;;  %v13448_v6 = vsub.f32 %v5787_v35, %v5799_v46 }
 0x216   : > { %11490 = vmatprep.subr.bf16.mxu0 %v12340_v0  ;;  %10694 = vmatprep.mubr.msk.f32.mxu0 %vm12341_vm0, %v12342_v1 }
 0x217   : > { %v12180_v23 = vpop.eup %12179  ;;  %10760 = vmatprep.mubr.msk.f32.mxu1 %vm12341_vm0, %v12342_v1 }
 0x218   : > { %v4256_v9 = vsel %vm4201_vm2, %v12180_v23, 0.0 }
 0x219   : > { %4257 = vadd.xlane.f32.xlu0 %v4256_v9 }
 0x21b   : > { %v12182_v10 = vpop.eup %12181 }
 0x21c   : > { %11528 = vmatpush3.bf16.xpose.msra.mxu1 %v13208_v11  ;;  %v4259_v12 = vsel %vm4201_vm2, %v12182_v10, 0.0 }
 0x21d   : > { %11492 = vmatpush3.bf16.xpose.msra.mxu0 %v13202_v8  ;;  %4260 = vadd.xlane.f32.xlu1 %v4259_v12 }
 0x21e   : > { %11493 = vmatprep.subr.bf16.mxu0 %v12340_v0  ;;  %11529 = vmatprep.subr.bf16.mxu1 %v12340_v0 }
 0x223   : > { %10761 = vmatmul.mubr.f32.vlgmr.msra.gmra.mrb[8].mxu1 %v4860_v49 }
 0x224   : > { %10695 = vmatmul.mubr.f32.vlgmr.msra.gmra.mrb[8].mxu0 %v4360_v50  ;;  %11531 = vmatpush3.bf16.xpose.msra.mxu1 %v13262_v62 }
 0x225   : > { %11495 = vmatpush3.bf16.xpose.msra.mxu0 %v13260_v61  ;;  %11532 = vmatprep.subr.bf16.mxu1 %v12340_v0 }
 0x226   : > { %11496 = vmatprep.subr.bf16.mxu0 %v12340_v0  ;;  %10705 = vmatprep.mubr.msk.f32.mxu0 %vm12341_vm0, %v12342_v1 }
 0x227   : > { %10771 = vmatprep.mubr.msk.f32.mxu1 %vm12341_vm0, %v12342_v1 }
 0x22c   : > { %11534 = vmatpush3.bf16.xpose.msra.mxu1 %v13274_v14  ;;  %v5775_v14 = vsel %vm4201_vm2, %v12182_v10, 0 }
 0x22d   : > { %11498 = vmatpush3.bf16.xpose.msra.mxu0 %v13264_v33  ;;  %11535 = vmatprep.subr.bf16.mxu1 %v12340_v0  ;;  %v5790_v33 = vand.u32 4294901760, %v5778_v54  ;;  %v13404_v29 = vand.u32 4294901760, %v5775_v14 }
 0x22e   : > { %11499 = vmatprep.subr.bf16.mxu0 %v12340_v0 }
 0x22f   : > { %v13394_v25 = vsub.f32 %v5778_v54, %v5790_v33  ;;  %v13421_v50 = vsub.f32 %v5775_v14, %v13404_v29 }
 0x231   : > { %v5871_v48 = vand.u32 4294901760, %v13394_v25  ;;  %v5860_v9 = vand.u32 4294901760, %v13421_v50 }
 0x233   : > { %10772 = vmatmul.mubr.f32.vlgmr.msra.gmra.mrb[8].mxu1 %v13291_v41  ;;  %v5872_v28 = vsub.f32 %v13394_v25, %v5871_v48 }
 0x234   : > { %10706 = vmatmul.mubr.f32.vlgmr.msra.gmra.mrb[8].mxu0 %v13295_v44  ;;  %11537 = vmatpush3.bf16.xpose.msra.mxu1 %v13180_v56  ;;  %v5781_v56 = vsel %vm4201_vm2, %v12216_v58, 0 }
 0x235   : > { %11501 = vmatpush3.bf16.xpose.msra.mxu0 %v13178_v55  ;;  %11538 = vmatprep.subr.bf16.mxu1 %v12340_v0  ;;  %v12217_v55 = vld [vmem:[%s12487_s28 + $0x40] sm:$0xff]  ;;  %v5873_v51 = vand.u32 4294901760, %v5872_v28 }
 0x236   : > { %11502 = vmatprep.subr.bf16.mxu0 %v12340_v0  ;;  %10716 = vmatprep.mubr.msk.f32.mxu0 %vm12341_vm0, %v12342_v1  ;;  %v5278_v60 = vsel %vm4201_vm2, %v12217_v55, 0  ;;  %v5892_v55 = vand.u32 4294901760, %v13448_v6 }
 0x237   : > { %10782 = vmatprep.mubr.msk.f32.mxu1 %vm12341_vm0, %v12342_v1  ;;  %v5290_v19 = vand.u32 4294901760, %v5278_v60 }
 0x238   : > { %v4216_v13 = vpop.xlane.xlu1 %4215 }
 0x239   : > { %v4230_v43 = vsub.f32 %v13267_v4, %v4216_v13  ;;  %v5793_v4 = vand.u32 4294901760, %v5781_v56  ;;  %v13406_v39 = vpack.c.bf16 %v5293_v22, %v5290_v19 }
 0x23b   : > { %v4242_v61 = vmul.f32 1.442695, %v4230_v43  ;;  %v13396_v59 = vpack.c.bf16 %v5793_v4, %v5790_v33  ;;  %v13398_v27 = vsub.f32 %v5781_v56, %v5793_v4  ;;  %v5885_v56 = vand.u32 4294901760, %v13446_v53 }
 0x23c   : > { %11540 = vmatpush3.bf16.xpose.msra.mxu1 %v13208_v11  ;;  %v4219_v62 = vpop.xlane.xlu1 %4218  ;;  %v5284_v11 = vsel %vm4201_vm2, %v12219_v15, 0 }
 0x23d   : > { %12183 = vpow2.f32 %v4242_v61  ;;  %11504 = vmatpush3.bf16.xpose.msra.mxu0 %v13202_v8  ;;  %v4231_v5 = vsub.f32 %v13270_v20, %v4219_v62  ;;  %11577 = vmatprep.subr.bf16.mxu1 %v12340_v0  ;;  %v5275_v8 = vsel %vm4201_vm2, %v12180_v23, 0  ;;  %v13392_v20 = vsub.f32 %v5278_v60, %v5290_v19 }
 0x23e   : > { %11541 = vmatprep.subr.bf16.mxu0 %v12340_v0  ;;  %v13410_v40 = vand.u32 4294901760, %v5275_v8  ;;  %v5296_v36 = vand.u32 4294901760, %v5284_v11  ;;  %v5878_v49 = vand.u32 4294901760, %v13398_v27  ;;  %v13455_v23 = vsub.f32 %v5287_v18, %v5299_v45 }
 0x23f   : > { %v4244_v24 = vmul.f32 1.442695, %v4231_v5  ;;  %v5371_v47 = vand.u32 4294901760, %v13392_v20  ;;  %v5861_v60 = vsub.f32 %v13421_v50, %v5860_v9  ;;  %v5886_v4 = vsub.f32 %v13446_v53, %v5885_v56 }
 0x240   : > { %v13432_v57 = vpack.c.bf16 %v5299_v45, %v5296_v36  ;;  %v5879_v7 = vsub.f32 %v13398_v27, %v5878_v49  ;;  %v13453_v63 = vsub.f32 %v5284_v11, %v5296_v36  ;;  %v5392_v61 = vand.u32 4294901760, %v13455_v23 }
 0x241   : > { %12185 = vpow2.f32 %v4244_v24  ;;  %v5372_v3 = vsub.f32 %v13392_v20, %v5371_v47  ;;  %v5893_v5 = vsub.f32 %v13448_v6, %v5892_v55  ;;  %v5862_v19 = vand.u32 4294901760, %v5861_v60 }
 0x242   : > { %v5880_v58 = vand.u32 4294901760, %v5879_v7  ;;  %v5385_v21 = vand.u32 4294901760, %v13453_v63  ;;  %v5393_v15 = vsub.f32 %v13455_v23, %v5392_v61  ;;  %v5887_v16 = vand.u32 4294901760, %v5886_v4 }
 0x243   : > { %10783 = vmatmul.mubr.f32.vlgmr.msra.gmra.mrb[8].mxu1 %v13291_v41  ;;  %v5378_v41 = vand.u32 4294901760, %v13408_v38  ;;  %v5373_v43 = vand.u32 4294901760, %v5372_v3  ;;  %v5894_v18 = vand.u32 4294901760, %v5893_v5  ;;  %v11590_v34 = vpack.c.bf16 %v13398_v27, %v13394_v25  ;;  %v12223_v27 = vld [vmem:[%s12487_s28 + $0xa0] sm:$0xff] }
 0x244   : > { %10717 = vmatmul.mubr.f32.vlgmr.msra.gmra.mrb[8].mxu0 %v13295_v44  ;;  %11579 = vmatpush3.bf16.xpose.msra.mxu1 %v13396_v59  ;;  %v13428_v44 = vsub.f32 %v5275_v8, %v13410_v40  ;;  %v11584_v33 = vpack.c.bf16 %v5880_v58, %v5873_v51  ;;  %v5386_v14 = vsub.f32 %v13453_v63, %v5385_v21  ;;  %v5394_v24 = vand.u32 4294901760, %v5393_v15 }
 0x245   : > { %11543 = vmatpush3.bf16.xpose.msra.mxu0 %v13406_v39  ;;  %11580 = vmatprep.subr.bf16.mxu1 %v12340_v0  ;;  %v5379_v10 = vsub.f32 %v13408_v38, %v5378_v41  ;;  %v11587_v30 = vpack.c.bf16 %v5894_v18, %v5887_v16  ;;  %v11554_v35 = vpack.c.bf16 %v13408_v38, %v13392_v20  ;;  %v6778_v38 = vsel %vm4201_vm2, %v12223_v27, 0 }
 0x246   : > { %11544 = vmatprep.subr.bf16.mxu0 %v12340_v0  ;;  %10793 = vmatprep.mubr.msk.f32.mxu0 %vm12341_vm0, %v12342_v1  ;;  %v5360_v12 = vand.u32 4294901760, %v13428_v44  ;;  %v5387_v8 = vand.u32 4294901760, %v5386_v14  ;;  %v11593_v45 = vpack.c.bf16 %v13448_v6, %v13446_v53  ;;  %v11557_v46 = vpack.c.bf16 %v13455_v23, %v13453_v63 }
 0x247   : > { %v13430_v52 = vpop.eup %12183  ;;  %10859 = vmatprep.mubr.msk.f32.mxu1 %vm12341_vm0, %v12342_v1  ;;  %v5380_v17 = vand.u32 4294901760, %v5379_v10  ;;  %v11602_v51 = vpack.c.bf16 %v5878_v49, %v5871_v48  ;;  %v11605_v20 = vpack.c.bf16 %v5892_v55, %v5885_v56  ;;  %v11569_v25 = vpack.c.bf16 %v5392_v61, %v5385_v21  ;;  %v12225_v49 = vld [vmem:[%s12487_s28 + $0x80] sm:$0xff]  ;;  %v12228_v55 = vld [vmem:[%s12487_s28 + $0x98] sm:$0xff] }
 0x248   : > { %v4262_v37 = vsel %vm4201_vm2, %v13430_v52, 0.0  ;;  %v5361_v62 = vsub.f32 %v13428_v44, %v5360_v12  ;;  %v11551_v31 = vpack.c.bf16 %v5394_v24, %v5387_v8  ;;  %v6287_v60 = vsel %vm4201_vm2, %v12228_v55, 0  ;;  %v12230_v21 = vld [vmem:[%s12487_s28 + $0xb8] sm:$0xff] }
 0x249   : > { %4263 = vadd.xlane.f32.xlu0 %v4262_v37  ;;  %v11548_v22 = vpack.c.bf16 %v5380_v17, %v5373_v43  ;;  %v6787_v61 = vsel %vm4201_vm2, %v12230_v21, 0 }
 0x24a   : > { %v5362_v11 = vand.u32 4294901760, %v5361_v62  ;;  %v6799_v14 = vand.u32 4294901760, %v6787_v61 }
 0x24b   : > { %v13462_v13 = vpop.eup %12185 }
 0x24c   : > { %11582 = vmatpush3.bf16.xpose.msra.mxu1 %v13434_v2  ;;  %v4265_v54 = vsel %vm4201_vm2, %v13462_v13, 0.0  ;;  %v6775_v63 = vsel %vm4201_vm2, %v13462_v13, 0  ;;  %v12229_v13 = vld [vmem:[%s12487_s28 + $0xb0] sm:$0xff] }
 0x24d   : > { %11546 = vmatpush3.bf16.xpose.msra.mxu0 %v13432_v57  ;;  %4266 = vadd.xlane.f32.xlu1 %v4265_v54  ;;  %v11566_v54 = vpack.c.bf16 %v5378_v41, %v5371_v47  ;;  %v12224_v47 = vld [vmem:[%s12487_s28 + $0xa8] sm:$0xff]  ;;  %v6790_v41 = vand.u32 4294901760, %v6778_v38  ;;  %v6784_v17 = vsel %vm4201_vm2, %v12229_v13, 0  ;;  %v13612_v62 = vand.u32 4294901760, %v6775_v63 }
 0x24e   : > { %11547 = vmatprep.subr.bf16.mxu0 %v12340_v0  ;;  %11583 = vmatprep.subr.bf16.mxu1 %v12340_v0  ;;  %v6781_v48 = vsel %vm4201_vm2, %v12224_v47, 0 }
 0x24f   : > { %v13629_v18 = vsub.f32 %v6775_v63, %v13612_v62 }
 0x253   : > { %10860 = vmatmul.mubr.f32.vlgmr.msra.gmra.mrb[10].mxu1 %v5862_v19  ;;  %v6299_v19 = vand.u32 4294901760, %v6287_v60 }
 0x254   : > { %10794 = vmatmul.mubr.f32.vlgmr.msra.gmra.mrb[10].mxu0 %v5362_v11  ;;  %11585 = vmatpush3.bf16.xpose.msra.mxu1 %v11584_v33 }
 0x255   : > { %11549 = vmatpush3.bf16.xpose.msra.mxu0 %v11548_v22  ;;  %11586 = vmatprep.subr.bf16.mxu1 %v12340_v0  ;;  %v6796_v22 = vand.u32 4294901760, %v6784_v17 }
 0x256   : > { %11550 = vmatprep.subr.bf16.mxu0 %v12340_v0  ;;  %10804 = vmatprep.mubr.msk.f32.mxu0 %vm12341_vm0, %v12342_v1 }
 0x257   : > { %10870 = vmatprep.mubr.msk.f32.mxu1 %vm12341_vm0, %v12342_v1  ;;  %v13640_v24 = vpack.c.bf16 %v6799_v14, %v6796_v22 }
 0x25c   : > { %11588 = vmatpush3.bf16.xpose.msra.mxu1 %v11587_v30 }
 0x25d   : > { %11552 = vmatpush3.bf16.xpose.msra.mxu0 %v11551_v31  ;;  %11589 = vmatprep.subr.bf16.mxu1 %v12340_v0  ;;  %v13647_v31 = vsub.f32 %v6784_v17, %v6796_v22  ;;  %v12233_v22 = vld [vmem:[%s12487_s28 + $0xc0] sm:$0xff] }
 0x25e   : > { %11553 = vmatprep.subr.bf16.mxu0 %v12340_v0 }
 0x263   : > { %10871 = vmatmul.mubr.f32.vlgmr.msra.gmra.mrb[10].mxu1 %v13404_v29 }
 0x264   : > { %10805 = vmatmul.mubr.f32.vlgmr.msra.gmra.mrb[10].mxu0 %v13410_v40  ;;  %11591 = vmatpush3.bf16.xpose.msra.mxu1 %v11590_v34  ;;  %v13649_v34 = vsub.f32 %v6787_v61, %v6799_v14 }
 0x265   : > { %11555 = vmatpush3.bf16.xpose.msra.mxu0 %v11554_v35  ;;  %11592 = vmatprep.subr.bf16.mxu1 %v12340_v0 }
 0x266   : > { %11556 = vmatprep.subr.bf16.mxu0 %v12340_v0  ;;  %10815 = vmatprep.mubr.msk.f32.mxu0 %vm12341_vm0, %v12342_v1  ;;  %v11665_v13 = vpack.c.bf16 %v13649_v34, %v13647_v31 }
 0x267   : > { %10881 = vmatprep.mubr.msk.f32.mxu1 %vm12341_vm0, %v12342_v1 }
 0x268   : > { %v4222_v36 = vpop.xlane.xlu1 %4221 }
 0x269   : > { %v4232_v42 = vsub.f32 %v13279_v26, %v4222_v36 }
 0x26b   : > { %v4246_v3 = vmul.f32 1.442695, %v4232_v42  ;;  %v13659_v42 = vsub.f32 %v6287_v60, %v6299_v19 }
 0x26c   : > { %11594 = vmatpush3.bf16.xpose.msra.mxu1 %v11593_v45  ;;  %v4225_v28 = vpop.xlane.xlu1 %4224 }
 0x26d   : > { %12187 = vpow2.f32 %v4246_v3  ;;  %11558 = vmatpush3.bf16.xpose.msra.mxu0 %v11557_v46  ;;  %v4233_v37 = vsub.f32 %v13284_v32, %v4225_v28  ;;  %11595 = vmatprep.subr.bf16.mxu1 %v12340_v0  ;;  %v6860_v46 = vand.u32 4294901760, %v13629_v18  ;;  %v6392_v27 = vand.u32 4294901760, %v13659_v42 }
 0x26e   : > { %11559 = vmatprep.subr.bf16.mxu0 %v12340_v0 }
 0x26f   : > { %v4248_v7 = vmul.f32 1.442695, %v4233_v37 }
 0x271   : > { %12189 = vpow2.f32 %v4248_v7 }
 0x273   : > { %10882 = vmatmul.mubr.f32.vlgmr.msra.gmra.mrb[10].mxu1 %v13421_v50 }
 0x274   : > { %10816 = vmatmul.mubr.f32.vlgmr.msra.gmra.mrb[10].mxu0 %v13428_v44  ;;  %11597 = vmatpush3.bf16.xpose.msra.mxu1 %v13396_v59  ;;  %v6793_v44 = vand.u32 4294901760, %v6781_v48 }
 0x275   : > { %11561 = vmatpush3.bf16.xpose.msra.mxu0 %v13406_v39  ;;  %11598 = vmatprep.subr.bf16.mxu1 %v12340_v0 }
 0x276   : > { %11562 = vmatprep.subr.bf16.mxu0 %v12340_v0  ;;  %10826 = vmatprep.mubr.msk.f32.mxu0 %vm12341_vm0, %v12342_v1  ;;  %v13594_v23 = vpack.c.bf16 %v6793_v44, %v6790_v41  ;;  %v13604_v56 = vsub.f32 %v6781_v48, %v6793_v44 }
 0x277   : > { %v13528_v26 = vpop.eup %12187  ;;  %10892 = vmatprep.mubr.msk.f32.mxu1 %vm12341_vm0, %v12342_v1 }
 0x278   : > { %v4268_v32 = vsel %vm4201_vm2, %v13528_v26, 0.0  ;;  %v6878_v16 = vand.u32 4294901760, %v13604_v56 }
 0x279   : > { %4269 = vadd.xlane.f32.xlu0 %v4268_v32 }
 0x27a   : > { %v6879_v36 = vsub.f32 %v13604_v56, %v6878_v16 }
 0x27b   : > { %v13534_v10 = vpop.eup %12189 }
 0x27c   : > { %11600 = vmatpush3.bf16.xpose.msra.mxu1 %v13434_v2  ;;  %v4271_v43 = vsel %vm4201_vm2, %v13534_v10, 0.0  ;;  %v6880_v32 = vand.u32 4294901760, %v6879_v36 }
 0x27d   : > { %11564 = vmatpush3.bf16.xpose.msra.mxu0 %v13432_v57  ;;  %4272 = vadd.xlane.f32.xlu1 %v4271_v43  ;;  %v6885_v43 = vand.u32 4294901760, %v13647_v31 }
 0x27e   : > { %11565 = vmatprep.subr.bf16.mxu0 %v12340_v0  ;;  %11601 = vmatprep.subr.bf16.mxu1 %v12340_v0 }
 0x27f   : > { %v6886_v48 = vsub.f32 %v13647_v31, %v6885_v43 }
 0x283   : > { %10893 = vmatmul.mubr.f32.vlgmr.msra.gmra.mrb[10].mxu1 %v5860_v9  ;;  %v6275_v9 = vsel %vm4201_vm2, %v13430_v52, 0 }
 0x284   : > { %10827 = vmatmul.mubr.f32.vlgmr.msra.gmra.mrb[10].mxu0 %v5360_v12  ;;  %11603 = vmatpush3.bf16.xpose.msra.mxu1 %v11602_v51  ;;  %v13618_v4 = vand.u32 4294901760, %v6275_v9  ;;  %v6892_v51 = vand.u32 4294901760, %v13649_v34 }
 0x285   : > { %11567 = vmatpush3.bf16.xpose.msra.mxu0 %v11566_v54  ;;  %11604 = vmatprep.subr.bf16.mxu1 %v12340_v0  ;;  %v6861_v54 = vsub.f32 %v13629_v18, %v6860_v46 }
 0x286   : > { %11568 = vmatprep.subr.bf16.mxu0 %v12340_v0  ;;  %10837 = vmatprep.mubr.msk.f32.mxu0 %vm12341_vm0, %v12342_v1 }
 0x287   : > { %10903 = vmatprep.mubr.msk.f32.mxu1 %vm12341_vm0, %v12342_v1 }
 0x28c   : > { %11606 = vmatpush3.bf16.xpose.msra.mxu1 %v11605_v20 }
 0x28d   : > { %11570 = vmatpush3.bf16.xpose.msra.mxu0 %v11569_v25  ;;  %11607 = vmatprep.subr.bf16.mxu1 %v12340_v0 }
 0x28e   : > { %11571 = vmatprep.subr.bf16.mxu0 %v12340_v0 }
 0x293   : > { %10904 = vmatmul.mubr.f32.vlgmr.msra.gmra.mrb[10].mxu1 %v13404_v29 }
 0x294   : > { %10838 = vmatmul.mubr.f32.vlgmr.msra.gmra.mrb[10].mxu0 %v13410_v40  ;;  %11609 = vmatpush3.bf16.xpose.msra.mxu1 %v13396_v59  ;;  %v6278_v59 = vsel %vm4201_vm2, %v12225_v49, 0  ;;  %v6893_v49 = vsub.f32 %v13649_v34, %v6892_v51 }
 0x295   : > { %11573 = vmatpush3.bf16.xpose.msra.mxu0 %v13406_v39  ;;  %11610 = vmatprep.subr.bf16.mxu1 %v12340_v0  ;;  %v12226_v39 = vld [vmem:[%s12487_s28 + $0x88] sm:$0xff]  ;;  %v6290_v53 = vand.u32 4294901760, %v6278_v59 }
 0x296   : > { %11574 = vmatprep.subr.bf16.mxu0 %v12340_v0  ;;  %10848 = vmatprep.mubr.msk.f32.mxu0 %vm12341_vm0, %v12342_v1  ;;  %v6281_v50 = vsel %vm4201_vm2, %v12226_v39, 0 }
 0x297   : > { %10914 = vmatprep.mubr.msk.f32.mxu1 %vm12341_vm0, %v12342_v1  ;;  %v6293_v6 = vand.u32 4294901760, %v6281_v50  ;;  %v13598_v12 = vsub.f32 %v6278_v59, %v6290_v53  ;;  %v6862_v59 = vand.u32 4294901760, %v6861_v54 }
 0x299   : > { %v13614_v52 = vpack.c.bf16 %v6293_v6, %v6290_v53  ;;  %v13616_v33 = vsub.f32 %v6281_v50, %v6293_v6  ;;  %v6371_v15 = vand.u32 4294901760, %v13598_v12  ;;  %v6887_v53 = vand.u32 4294901760, %v6886_v48 }
 0x29a   : > { %v6894_v6 = vand.u32 4294901760, %v6893_v49 }
 0x29b   : > { %v6372_v30 = vsub.f32 %v13598_v12, %v6371_v15  ;;  %v11626_v60 = vpack.c.bf16 %v13616_v33, %v13598_v12  ;;  %v11677_v12 = vpack.c.bf16 %v6892_v51, %v6885_v43 }
 0x29c   : > { %11612 = vmatpush3.bf16.xpose.msra.mxu1 %v13434_v2  ;;  %v13600_v2 = vsub.f32 %v6778_v38, %v6790_v41  ;;  %v6393_v41 = vsub.f32 %v13659_v42, %v6392_v27 }
 0x29d   : > { %11576 = vmatpush3.bf16.xpose.msra.mxu0 %v13432_v57  ;;  %11649 = vmatprep.subr.bf16.mxu1 %v12340_v0  ;;  %v12227_v57 = vld [vmem:[%s12487_s28 + $0x90] sm:$0xff]  ;;  %v6373_v37 = vand.u32 4294901760, %v6372_v30 }
 0x29e   : > { %11613 = vmatprep.subr.bf16.mxu0 %v12340_v0  ;;  %v6284_v58 = vsel %vm4201_vm2, %v12227_v57, 0  ;;  %v6871_v11 = vand.u32 4294901760, %v13600_v2  ;;  %v11659_v57 = vpack.c.bf16 %v6894_v6, %v6887_v53  ;;  %v11662_v55 = vpack.c.bf16 %v13604_v56, %v13600_v2  ;;  %v12231_v56 = vld [vmem:[%s12487_s28 + $0xe0] sm:$0xff] }
 0x29f   : > { %v6296_v5 = vand.u32 4294901760, %v6284_v58 }
 0x2a0   : > { %v6872_v35 = vsub.f32 %v13600_v2, %v6871_v11  ;;  %v11674_v21 = vpack.c.bf16 %v6878_v16, %v6871_v11 }
 0x2a1   : > { %v13638_v8 = vpack.c.bf16 %v6299_v19, %v6296_v5  ;;  %v13657_v45 = vsub.f32 %v6284_v58, %v6296_v5  ;;  %v12232_v5 = vld [vmem:[%s12487_s28 + $0xe8] sm:$0xff] }
 0x2a2   : > { %v6873_v7 = vand.u32 4294901760, %v6872_v35  ;;  %v7781_v19 = vsel %vm4201_vm2, %v12232_v5, 0  ;;  %v12236_v35 = vld [vmem:[%s12487_s28 + $0xd8] sm:$0xff] }
 0x2a3   : > { %10915 = vmatmul.mubr.f32.vlgmr.msra.gmra.mrb[10].mxu1 %v13404_v29  ;;  %v6378_v29 = vand.u32 4294901760, %v13616_v33  ;;  %v6385_v25 = vand.u32 4294901760, %v13657_v45  ;;  %v11629_v17 = vpack.c.bf16 %v13659_v42, %v13657_v45  ;;  %v7793_v16 = vand.u32 4294901760, %v7781_v19 }
 0x2a4   : > { %10849 = vmatmul.mubr.f32.vlgmr.msra.gmra.mrb[10].mxu0 %v13410_v40  ;;  %11651 = vmatpush3.bf16.xpose.msra.mxu1 %v13594_v23  ;;  %v13636_v40 = vsub.f32 %v6275_v9, %v13618_v4  ;;  %v11656_v47 = vpack.c.bf16 %v6880_v32, %v6873_v7  ;;  %v6394_v9 = vand.u32 4294901760, %v6393_v41  ;;  %v7287_v36 = vsel %vm4201_vm2, %v12236_v35, 0 }
 0x2a5   : > { %11615 = vmatpush3.bf16.xpose.msra.mxu0 %v13614_v52  ;;  %11652 = vmatprep.subr.bf16.mxu1 %v12340_v0  ;;  %v6379_v3 = vsub.f32 %v13616_v33, %v6378_v29  ;;  %v6386_v50 = vsub.f32 %v13657_v45, %v6385_v25  ;;  %v11638_v61 = vpack.c.bf16 %v6378_v29, %v6371_v15  ;;  %v7778_v33 = vsel %vm4201_vm2, %v12231_v56, 0  ;;  %v12237_v45 = vld [vmem:[%s12487_s28 + $0xf0] sm:$0xff] }
 0x2a6   : > { %11616 = vmatprep.subr.bf16.mxu0 %v12340_v0  ;;  %10925 = vmatprep.mubr.msk.f32.mxu0 %vm12341_vm0, %v12342_v1  ;;  %v6360_v28 = vand.u32 4294901760, %v13636_v40  ;;  %v11641_v2 = vpack.c.bf16 %v6392_v27, %v6385_v25  ;;  %v7775_v15 = vsel %vm4201_vm2, %v13534_v10, 0  ;;  %v7790_v11 = vand.u32 4294901760, %v7778_v33 }
 0x2a7   : > { %10991 = vmatprep.mubr.msk.f32.mxu1 %vm12341_vm0, %v12342_v1  ;;  %v6380_v20 = vand.u32 4294901760, %v6379_v3  ;;  %v6387_v63 = vand.u32 4294901760, %v6386_v50  ;;  %v7275_v10 = vsel %vm4201_vm2, %v13528_v26, 0  ;;  %v13792_v34 = vsub.f32 %v7781_v19, %v7793_v16 }
 0x2a8   : > { %v6361_v38 = vsub.f32 %v13636_v40, %v6360_v28  ;;  %v13788_v30 = vpack.c.bf16 %v7793_v16, %v7790_v11  ;;  %v13790_v31 = vsub.f32 %v7778_v33, %v7790_v11  ;;  %v7784_v42 = vsel %vm4201_vm2, %v12237_v45, 0 }
 0x2a9   : > { %v11620_v39 = vpack.c.bf16 %v6380_v20, %v6373_v37  ;;  %v11623_v58 = vpack.c.bf16 %v6394_v9, %v6387_v63  ;;  %v13808_v7 = vand.u32 4294901760, %v7275_v10  ;;  %v7299_v51 = vand.u32 4294901760, %v7287_v36 }
 0x2aa   : > { %v6362_v44 = vand.u32 4294901760, %v6361_v38  ;;  %v7796_v54 = vand.u32 4294901760, %v7784_v42  ;;  %v7871_v25 = vand.u32 4294901760, %v13790_v31  ;;  %v7878_v27 = vand.u32 4294901760, %v13792_v34 }
 0x2ab   : > { %v13847_v53 = vsub.f32 %v7287_v36, %v7299_v51  ;;  %v11734_v45 = vpack.c.bf16 %v13792_v34, %v13790_v31 }
 0x2ac   : > { %11654 = vmatpush3.bf16.xpose.msra.mxu1 %v13640_v24  ;;  %v7872_v50 = vsub.f32 %v13790_v31, %v7871_v25  ;;  %v7879_v41 = vsub.f32 %v13792_v34, %v7878_v27 }
 0x2ad   : > { %11618 = vmatpush3.bf16.xpose.msra.mxu0 %v13638_v8  ;;  %11655 = vmatprep.subr.bf16.mxu1 %v12340_v0 }
 0x2ae   : > { %11619 = vmatprep.subr.bf16.mxu0 %v12340_v0 }
 0x2b3   : > { %10992 = vmatmul.mubr.f32.vlgmr.msra.gmra.mrb[12].mxu1 %v6862_v59  ;;  %v13835_v59 = vsub.f32 %v7784_v42, %v7796_v54 }
 0x2b4   : > { %10926 = vmatmul.mubr.f32.vlgmr.msra.gmra.mrb[12].mxu0 %v6362_v44  ;;  %11657 = vmatpush3.bf16.xpose.msra.mxu1 %v11656_v47 }
 0x2b5   : > { %11621 = vmatpush3.bf16.xpose.msra.mxu0 %v11620_v39  ;;  %11658 = vmatprep.subr.bf16.mxu1 %v12340_v0 }
 0x2b6   : > { %11622 = vmatprep.subr.bf16.mxu0 %v12340_v0  ;;  %10936 = vmatprep.mubr.msk.f32.mxu0 %vm12341_vm0, %v12342_v1 }
 0x2b7   : > { %11002 = vmatprep.mubr.msk.f32.mxu1 %vm12341_vm0, %v12342_v1 }
 0x2bc   : > { %11660 = vmatpush3.bf16.xpose.msra.mxu1 %v11659_v57 }
 0x2bd   : > { %11624 = vmatpush3.bf16.xpose.msra.mxu0 %v11623_v58  ;;  %11661 = vmatprep.subr.bf16.mxu1 %v12340_v0  ;;  %v7873_v58 = vand.u32 4294901760, %v7872_v50 }
 0x2be   : > { %11625 = vmatprep.subr.bf16.mxu0 %v12340_v0 }
 0x2c3   : > { %11003 = vmatmul.mubr.f32.vlgmr.msra.gmra.mrb[12].mxu1 %v13612_v62 }
 0x2c4   : > { %10937 = vmatmul.mubr.f32.vlgmr.msra.gmra.mrb[12].mxu0 %v13618_v4  ;;  %11663 = vmatpush3.bf16.xpose.msra.mxu1 %v11662_v55  ;;  %v7880_v55 = vand.u32 4294901760, %v7879_v41 }
 0x2c5   : > { %11627 = vmatpush3.bf16.xpose.msra.mxu0 %v11626_v60  ;;  %11664 = vmatprep.subr.bf16.mxu1 %v12340_v0  ;;  %v7885_v60 = vand.u32 4294901760, %v13835_v59 }
 0x2c6   : > { %11628 = vmatprep.subr.bf16.mxu0 %v12340_v0  ;;  %10947 = vmatprep.mubr.msk.f32.mxu0 %vm12341_vm0, %v12342_v1  ;;  %v11728_v56 = vpack.c.bf16 %v7880_v55, %v7873_v58 }
 0x2c7   : > { %11013 = vmatprep.mubr.msk.f32.mxu1 %vm12341_vm0, %v12342_v1  ;;  %v7886_v33 = vsub.f32 %v13835_v59, %v7885_v60 }
 0x2cc   : > { %11666 = vmatpush3.bf16.xpose.msra.mxu1 %v11665_v13 }
 0x2cd   : > { %11630 = vmatpush3.bf16.xpose.msra.mxu0 %v11629_v17  ;;  %11667 = vmatprep.subr.bf16.mxu1 %v12340_v0 }
 0x2ce   : > { %11631 = vmatprep.subr.bf16.mxu0 %v12340_v0 }
 0x2d3   : > { %11014 = vmatmul.mubr.f32.vlgmr.msra.gmra.mrb[12].mxu1 %v13629_v18 }
 0x2d4   : > { %10948 = vmatmul.mubr.f32.vlgmr.msra.gmra.mrb[12].mxu0 %v13636_v40  ;;  %11669 = vmatpush3.bf16.xpose.msra.mxu1 %v13594_v23  ;;  %v13783_v40 = vand.u32 4294901760, %v7775_v15 }
 0x2d5   : > { %11633 = vmatpush3.bf16.xpose.msra.mxu0 %v13614_v52  ;;  %11670 = vmatprep.subr.bf16.mxu1 %v12340_v0 }
 0x2d6   : > { %11634 = vmatprep.subr.bf16.mxu0 %v12340_v0  ;;  %10958 = vmatprep.mubr.msk.f32.mxu0 %vm12341_vm0, %v12342_v1  ;;  %v13811_v32 = vsub.f32 %v7775_v15, %v13783_v40  ;;  %v7887_v15 = vand.u32 4294901760, %v7886_v33  ;;  %v280_v33 = vld [vmem:[%s14783_s3 + $0x8] sm:$0xff] }
 0x2d7   : > { %11024 = vmatprep.mubr.msk.f32.mxu1 %vm12341_vm0, %v12342_v1 }
 0x2d8   : > { %v7860_v49 = vand.u32 4294901760, %v13811_v32 }
 0x2da   : > { %v7861_v57 = vsub.f32 %v13811_v32, %v7860_v49 }
 0x2dc   : > { %11672 = vmatpush3.bf16.xpose.msra.mxu1 %v13640_v24  ;;  %v7862_v19 = vand.u32 4294901760, %v7861_v57 }
 0x2dd   : > { %11636 = vmatpush3.bf16.xpose.msra.mxu0 %v13638_v8  ;;  %11673 = vmatprep.subr.bf16.mxu1 %v12340_v0 }
 0x2de   : > { %11637 = vmatprep.subr.bf16.mxu0 %v12340_v0 }
 0x2e3   : > { %11025 = vmatmul.mubr.f32.vlgmr.msra.gmra.mrb[12].mxu1 %v6860_v46  ;;  %v12238_v46 = vld [vmem:[%s12487_s28 + $0xf8] sm:$0xff] }
 0x2e4   : > { %10959 = vmatmul.mubr.f32.vlgmr.msra.gmra.mrb[12].mxu0 %v6360_v28  ;;  %11675 = vmatpush3.bf16.xpose.msra.mxu1 %v11674_v21  ;;  %v7787_v3 = vsel %vm4201_vm2, %v12238_v46, 0 }
 0x2e5   : > { %11639 = vmatpush3.bf16.xpose.msra.mxu0 %v11638_v61  ;;  %11676 = vmatprep.subr.bf16.mxu1 %v12340_v0  ;;  %v7799_v20 = vand.u32 4294901760, %v7787_v3 }
 0x2e6   : > { %11640 = vmatprep.subr.bf16.mxu0 %v12340_v0  ;;  %10969 = vmatprep.mubr.msk.f32.mxu0 %vm12341_vm0, %v12342_v1 }
 0x2e7   : > { %11035 = vmatprep.mubr.msk.f32.mxu1 %vm12341_vm0, %v12342_v1  ;;  %v13830_v48 = vpack.c.bf16 %v7799_v20, %v7796_v54  ;;  %v13837_v39 = vsub.f32 %v7787_v3, %v7799_v20  ;;  %v8303_v54 = vlaneseq }
 0x2e9   : > { %v7892_v13 = vand.u32 4294901760, %v13837_v39  ;;  %v11737_v46 = vpack.c.bf16 %v13837_v39, %v13835_v59  ;;  %v13968_v20 = vshrl.u32 %v8303_v54, 7 }
 0x2eb   : > { %v7893_v5 = vsub.f32 %v13837_v39, %v7892_v13  ;;  %v11749_v31 = vpack.c.bf16 %v7892_v13, %v7885_v60 }
 0x2ec   : > { %11678 = vmatpush3.bf16.xpose.msra.mxu1 %v11677_v12  ;;  %v7392_v12 = vand.u32 4294901760, %v13847_v53 }
 0x2ed   : > { %11642 = vmatpush3.bf16.xpose.msra.mxu0 %v11641_v2  ;;  %11679 = vmatprep.subr.bf16.mxu1 %v12340_v0  ;;  %v7894_v11 = vand.u32 4294901760, %v7893_v5 }
 0x2ee   : > { %11643 = vmatprep.subr.bf16.mxu0 %v12340_v0 }
 0x2ef   : > { %v11731_v35 = vpack.c.bf16 %v7894_v11, %v7887_v15  ;;  %v14025_v15 = vld [vmem:[%s14783_s3 + $0x10] sm:$0xff]  ;;  %v14030_v11 = vld [vmem:[%s14783_s3 + $0x18] sm:$0xff] }
 0x2f3   : > { %11036 = vmatmul.mubr.f32.vlgmr.msra.gmra.mrb[12].mxu1 %v13612_v62 }
 0x2f4   : > { %10970 = vmatmul.mubr.f32.vlgmr.msra.gmra.mrb[12].mxu0 %v13618_v4  ;;  %11681 = vmatpush3.bf16.xpose.msra.mxu1 %v13594_v23  ;;  %v7278_v23 = vsel %vm4201_vm2, %v12233_v22, 0 }
 0x2f5   : > { %11645 = vmatpush3.bf16.xpose.msra.mxu0 %v13614_v52  ;;  %11682 = vmatprep.subr.bf16.mxu1 %v12340_v0  ;;  %v12234_v52 = vld [vmem:[%s12487_s28 + $0xc8] sm:$0xff]  ;;  %v7290_v18 = vand.u32 4294901760, %v7278_v23 }
 0x2f6   : > { %11646 = vmatprep.subr.bf16.mxu0 %v12340_v0  ;;  %10980 = vmatprep.mubr.msk.f32.mxu0 %vm12341_vm0, %v12342_v1  ;;  %v7281_v14 = vsel %vm4201_vm2, %v12234_v52, 0  ;;  %v7393_v52 = vsub.f32 %v13847_v53, %v7392_v12 }
 0x2f7   : > { %11046 = vmatprep.mubr.msk.f32.mxu1 %vm12341_vm0, %v12342_v1  ;;  %v7293_v29 = vand.u32 4294901760, %v7281_v14  ;;  %v13804_v26 = vsub.f32 %v7278_v23, %v7290_v18 }
 0x2f9   : > { %v13802_v28 = vpack.c.bf16 %v7293_v29, %v7290_v18  ;;  %v13806_v37 = vsub.f32 %v7281_v14, %v7293_v29  ;;  %v7371_v38 = vand.u32 4294901760, %v13804_v26  ;;  %v7394_v18 = vand.u32 4294901760, %v7393_v52 }
 0x2fb   : > { %v7372_v6 = vsub.f32 %v13804_v26, %v7371_v38  ;;  %v11698_v42 = vpack.c.bf16 %v13806_v37, %v13804_v26  ;;  %v4252_v26 = vpop.xlane.xlu1 %4251 }
 0x2fc   : > { %11684 = vmatpush3.bf16.xpose.msra.mxu1 %v13640_v24  ;;  %v12235_v24 = vld [vmem:[%s12487_s28 + $0xd0] sm:$0xff]  ;;  %12191 = vrcp.f32 %v4252_v26  ;;  %s9430_s28 = sshll.u32 %s12401_s22, 7  ;;  %s12349_s22 = smov [#allocation5]  }
 0x2fd   : > { %11648 = vmatpush3.bf16.xpose.msra.mxu0 %v13638_v8  ;;  %11721 = vmatprep.subr.bf16.mxu1 %v12340_v0  ;;  %v7284_v8 = vsel %vm4201_vm2, %v12235_v24, 0  ;;  %v7373_v17 = vand.u32 4294901760, %v7372_v6  ;;  %s14736_s16 = scalar_lea.hbm %s14785_s5, %s9430_s28  ;;  %s12273_s9 = sshll.u32 %s12349_s22, 4  ;;  %s12274_s9 = int_to_ptr.vmem [resolvable:$false] %s12273_s9 }
 0x2fe   : > { %11685 = vmatprep.subr.bf16.mxu0 %v12340_v0  ;;  %v7296_v43 = vand.u32 4294901760, %v7284_v8  ;;  %p12276_p8 = scmp.lt.s32.totalorder %s14738_s12, %s12274_s9 }
 0x300   : > { %v13828_v47 = vpack.c.bf16 %v7299_v51, %v7296_v43  ;;  %v13845_v44 = vsub.f32 %v7284_v8, %v7296_v43  ;;  %v11746_v43 = vpack.c.bf16 %v7878_v27, %v7871_v25 }
 0x302   : > { %v7385_v61 = vand.u32 4294901760, %v13845_v44  ;;  %v11701_v3 = vpack.c.bf16 %v13847_v53, %v13845_v44 }
 0x303   : > { %11047 = vmatmul.mubr.f32.vlgmr.msra.gmra.mrb[12].mxu1 %v13612_v62  ;;  %v7378_v62 = vand.u32 4294901760, %v13806_v37 }
 0x304   : > { %10981 = vmatmul.mubr.f32.vlgmr.msra.gmra.mrb[12].mxu0 %v13618_v4  ;;  %11723 = vmatpush3.bf16.xpose.msra.mxu1 %v13788_v30  ;;  %v13826_v4 = vsub.f32 %v7275_v10, %v13808_v7  ;;  %v7386_v23 = vsub.f32 %v13845_v44, %v7385_v61  ;;  %v11713_v34 = vpack.c.bf16 %v7392_v12, %v7385_v61  ;;  %v296_v61 = vld [vmem:[%s14783_s3 + $0x88] sm:$0xff]  ;;  %v14004_v12 = vld [vmem:[%s14783_s3] sm:$0xff] }
 0x305   : > { %11687 = vmatpush3.bf16.xpose.msra.mxu0 %v13802_v28  ;;  %11724 = vmatprep.subr.bf16.mxu1 %v12340_v0  ;;  %v7379_v63 = vsub.f32 %v13806_v37, %v7378_v62  ;;  %v11710_v51 = vpack.c.bf16 %v7378_v62, %v7371_v38  ;;  %v4258_v37 = vpop.xlane.xlu0 %4257  ;;  %v8472_v5 = vand.u32 4294901760, %v14004_v12 }
 0x306   : > { %11688 = vmatprep.subr.bf16.mxu0 %v12340_v0  ;;  %11057 = vmatprep.mubr.msk.f32.mxu0 %vm12341_vm0, %v12342_v1  ;;  %v7360_v9 = vand.u32 4294901760, %v13826_v4  ;;  %v7387_v16 = vand.u32 4294901760, %v7386_v23  ;;  %v12192_v25 = vpop.eup %12191  ;;  %v8475_v23 = vand.u32 4294901760, %v280_v33 }
 0x307   : > { %11123 = vmatprep.mubr.msk.f32.mxu1 %vm12341_vm0, %v12342_v1  ;;  %v7380_v21 = vand.u32 4294901760, %v7379_v63 }
 0x308   : > { %v7361_v2 = vsub.f32 %v13826_v4, %v7360_v9  ;;  %v11695_v36 = vpack.c.bf16 %v7394_v18, %v7387_v16 }
 0x309   : > { %v11692_v22 = vpack.c.bf16 %v7380_v21, %v7373_v17  ;;  %v295_v21 = vld [vmem:[%s14783_s3 + $0x80] sm:$0xff]  ;;  %v4264_v60 = vpop.xlane.xlu0 %4263 }
 0x30a   : > { %v7362_v14 = vand.u32 4294901760, %v7361_v2  ;;  %v8520_v2 = vand.u32 4294901760, %v295_v21 }
 0x30c   : > { %11726 = vmatpush3.bf16.xpose.msra.mxu1 %v13830_v48  ;;  %v14032_v16 = vsub.f32 %v295_v21, %v8520_v2 }
 0x30d   : > { %11690 = vmatpush3.bf16.xpose.msra.mxu0 %v13828_v47  ;;  %11727 = vmatprep.subr.bf16.mxu1 %v12340_v0 }
 0x30e   : > { %11691 = vmatprep.subr.bf16.mxu0 %v12340_v0 }
 0x313   : > { %11124 = vmatmul.mubr.f32.vlgmr.msra.gmra.mrb[14].mxu1 %v7862_v19  ;;  %v14013_v19 = vld [vmem:[%s14783_s3 + $0x90] sm:$0xff] }
 0x314   : > { %11058 = vmatmul.mubr.f32.vlgmr.msra.gmra.mrb[14].mxu0 %v7362_v14  ;;  %11729 = vmatpush3.bf16.xpose.msra.mxu1 %v11728_v56  ;;  %v8523_v56 = vand.u32 4294901760, %v296_v61  ;;  %v8526_v52 = vand.u32 4294901760, %v14013_v19 }
 0x315   : > { %11693 = vmatpush3.bf16.xpose.msra.mxu0 %v11692_v22  ;;  %11730 = vmatprep.subr.bf16.mxu1 %v12340_v0  ;;  %v14018_v22 = vld [vmem:[%s14783_s3 + $0x98] sm:$0xff] }
 0x316   : > { %v13883_v29 = vpop.f32.mrb[8].mxu1  ;;  %11694 = vmatprep.subr.bf16.mxu0 %v12340_v0  ;;  %11068 = vmatprep.mubr.msk.f32.mxu0 %vm12341_vm0, %v12342_v1  ;;  %v8529_v14 = vand.u32 4294901760, %v14018_v22  ;;  %v14034_v18 = vsub.f32 %v296_v61, %v8523_v56  ;;  %v14110_v21 = vpack.c.bf16 %v8523_v56, %v8520_v2  ;;  %v14115_v61 = vld [vmem:[%s14783_s3 + $0x28] sm:$0xff] }
 0x317   : > { %v13888_v10 = vpop.f32.mrb[8].mxu0  ;;  %v10784_v24 = vpop.f32.mrb[9].mxu1  ;;  %11134 = vmatprep.mubr.msk.f32.mxu1 %vm12341_vm0, %v12342_v1 }
 0x318   : > { %v10718_v8 = vpop.f32.mrb[9].mxu0  ;;  %v8290_v59 = vmul.f32 %v12192_v25, %v13888_v10  ;;  %v8478_v10 = vand.u32 4294901760, %v14025_v15  ;;  %v14040_v24 = vsub.f32 %v280_v33, %v8475_v23 }
 0x319   : > { %v14043_v8 = vsub.f32 %v14013_v19, %v8526_v52 }
 0x31c   : > { %11732 = vmatpush3.bf16.xpose.msra.mxu1 %v11731_v35  ;;  %v14046_v35 = vsub.f32 %v14018_v22, %v8529_v14 }
 0x31d   : > { %11696 = vmatpush3.bf16.xpose.msra.mxu0 %v11695_v36  ;;  %11733 = vmatprep.subr.bf16.mxu1 %v12340_v0  ;;  %v8481_v36 = vand.u32 4294901760, %v14030_v11 }
 0x31e   : > { %11697 = vmatprep.subr.bf16.mxu0 %v12340_v0  ;;  %14873 = vst [vmem:[#allocation8_spill] sm:$0xff] %v14046_v35 }
 0x323   : > { %11135 = vmatmul.mubr.f32.vlgmr.msra.gmra.mrb[14].mxu1 %v13783_v40 }
 0x324   : > { %11069 = vmatmul.mubr.f32.vlgmr.msra.gmra.mrb[14].mxu0 %v13808_v7  ;;  %11735 = vmatpush3.bf16.xpose.msra.mxu1 %v11734_v45  ;;  %v14801_v45 = vand.u32 4294901760, %v14032_v16 }
 0x325   : > { %11699 = vmatpush3.bf16.xpose.msra.mxu0 %v11698_v42  ;;  %11736 = vmatprep.subr.bf16.mxu1 %v12340_v0  ;;  %v14800_v42 = vand.u32 4294901760, %v14034_v18 }
 0x326   : > { %11700 = vmatprep.subr.bf16.mxu0 %v12340_v0  ;;  %11079 = vmatprep.mubr.msk.f32.mxu0 %vm12341_vm0, %v12342_v1  ;;  %v8699_v26 = vsub.f32 %v14032_v16, %v14801_v45 }
 0x327   : > { %11145 = vmatprep.mubr.msk.f32.mxu1 %vm12341_vm0, %v12342_v1 }
 0x328   : > { %v8700_v25 = vand.u32 4294901760, %v8699_v26 }
 0x32c   : > { %11738 = vmatpush3.bf16.xpose.msra.mxu1 %v11737_v46 }
 0x32d   : > { %11702 = vmatpush3.bf16.xpose.msra.mxu0 %v11701_v3  ;;  %11739 = vmatprep.subr.bf16.mxu1 %v12340_v0  ;;  %v14055_v3 = vsub.f32 %v14025_v15, %v8478_v10 }
 0x32e   : > { %11703 = vmatprep.subr.bf16.mxu0 %v12340_v0 }
 0x32f   : > { %14874 = vst [vmem:[#allocation9_spill] sm:$0xff] %v14055_v3 }
 0x333   : > { %11146 = vmatmul.mubr.f32.vlgmr.msra.gmra.mrb[14].mxu1 %v13811_v32 }
 0x334   : > { %11080 = vmatmul.mubr.f32.vlgmr.msra.gmra.mrb[14].mxu0 %v13826_v4  ;;  %11741 = vmatpush3.bf16.xpose.msra.mxu1 %v13788_v30 }
 0x335   : > { %11705 = vmatpush3.bf16.xpose.msra.mxu0 %v13802_v28  ;;  %11742 = vmatprep.subr.bf16.mxu1 %v12340_v0 }
 0x336   : > { %11706 = vmatprep.subr.bf16.mxu0 %v12340_v0  ;;  %11090 = vmatprep.mubr.msk.f32.mxu0 %vm12341_vm0, %v12342_v1 }
 0x337   : > { %11156 = vmatprep.mubr.msk.f32.mxu1 %vm12341_vm0, %v12342_v1 }
 0x33c   : > { %11744 = vmatpush3.bf16.xpose.msra.mxu1 %v13830_v48 }
 0x33d   : > { %11708 = vmatpush3.bf16.xpose.msra.mxu0 %v13828_v47  ;;  %11745 = vmatprep.subr.bf16.mxu1 %v12340_v0 }
 0x33e   : > { %11709 = vmatprep.subr.bf16.mxu0 %v12340_v0 }
 0x343   : > { %11157 = vmatmul.mubr.f32.vlgmr.msra.gmra.mrb[14].mxu1 %v7860_v49 }
 0x344   : > { %11091 = vmatmul.mubr.f32.vlgmr.msra.gmra.mrb[14].mxu0 %v7360_v9  ;;  %11747 = vmatpush3.bf16.xpose.msra.mxu1 %v11746_v43  ;;  %v14796_v43 = vand.u32 4294901760, %v14040_v24 }
 0x345   : > { %11711 = vmatpush3.bf16.xpose.msra.mxu0 %v11710_v51  ;;  %11748 = vmatprep.subr.bf16.mxu1 %v12340_v0  ;;  %v14795_v51 = vand.u32 4294901760, %v14043_v8 }
 0x346   : > { %11712 = vmatprep.subr.bf16.mxu0 %v12340_v0  ;;  %11101 = vmatprep.mubr.msk.f32.mxu0 %vm12341_vm0, %v12342_v1 }
 0x347   : > { %11167 = vmatprep.mubr.msk.f32.mxu1 %vm12341_vm0, %v12342_v1 }
 0x34c   : > { %11750 = vmatpush3.bf16.xpose.msra.mxu1 %v11749_v31  ;;  %v14794_v31 = vand.u32 4294901760, %v14046_v35 }
 0x34d   : > { %11714 = vmatpush3.bf16.xpose.msra.mxu0 %v11713_v34  ;;  %11751 = vmatprep.subr.bf16.mxu1 %v12340_v0  ;;  %v14063_v34 = vsub.f32 %v14030_v11, %v8481_v36 }
 0x34e   : > { %11715 = vmatprep.subr.bf16.mxu0 %v12340_v0  ;;  %v8720_v54 = vsub.f32 %v14046_v35, %v14794_v31 }
 0x34f   : > { %14875 = vst [vmem:[#allocation10_spill] sm:$0xff] %v14063_v34 }
 0x353   : > { %11168 = vmatmul.mubr.f32.vlgmr.msra.gmra.mrb[14].mxu1 %v13783_v40 }
 0x354   : > { %11102 = vmatmul.mubr.f32.vlgmr.msra.gmra.mrb[14].mxu0 %v13808_v7  ;;  %11753 = vmatpush3.bf16.xpose.msra.mxu1 %v13788_v30  ;;  %v4255_v30 = vpop.xlane.xlu1 %4254 }
 0x355   : > { %11717 = vmatpush3.bf16.xpose.msra.mxu0 %v13802_v28  ;;  %11754 = vmatprep.subr.bf16.mxu1 %v12340_v0  ;;  %12193 = vrcp.f32 %v4255_v30  ;;  %v8706_v30 = vsub.f32 %v14034_v18, %v14800_v42 }
 0x356   : > { %11718 = vmatprep.subr.bf16.mxu0 %v12340_v0  ;;  %11112 = vmatprep.mubr.msk.f32.mxu0 %vm12341_vm0, %v12342_v1  ;;  %v12344_v0 = vmov 1983009808  }
 0x357   : > { %11178 = vmatprep.mubr.msk.f32.mxu1 %vm12341_vm0, %v12342_v1  ;;  %v8301_v32 = vunpack.c.l.s4 %v12344_v0  ;;  %v8594_v0 = vsub.f32 %v14040_v24, %v14796_v43 }
 0x358   : > { %v4261_v28 = vpop.xlane.xlu1 %4260 }
 0x359   : > { %12195 = vrcp.f32 %v4261_v28  ;;  %v8302_v1 = vunpack.c.0.s8 %v8301_v32  ;;  %v8713_v32 = vsub.f32 %v14043_v8, %v14795_v51 }
 0x35a   : > { %12197 = vrcp.f32 %v4258_v37  ;;  %v14793_v37 = vand.u32 4294901760, %v14055_v3 }
 0x35b   : > { %12199 = vrcp.f32 %v4264_v60 }
 0x35c   : > { %11756 = vmatpush3.bf16.xpose.msra.mxu1 %v13830_v48  ;;  %v4267_v55 = vpop.xlane.xlu1 %4266 }
 0x35d   : > { %11720 = vmatpush3.bf16.xpose.msra.mxu0 %v13828_v47  ;;  %v13972_v47 = vsub.s32 %v8302_v1, %v13968_v20  ;;  %v14790_v1 = vand.u32 4294901760, %v14063_v34  ;;  %12201 = vrcp.f32 %v4267_v55 }
 0x35e   : > { %11758 = vmatprep.subr.bf16.mxu0 %v14110_v21 }
 0x35f   : > { %v12194_v27 = vpop.eup %12193 }
 0x360   : > { %v4273_v13 = vpop.xlane.xlu1 %4272 }
 0x361   : > { %12203 = vrcp.f32 %v4273_v13 }
 0x363   : > { %11179 = vmatmul.mubr.f32.vlgmr.msra.gmra.mrb[14].mxu1 %v13783_v40  ;;  %v12196_v38 = vpop.eup %12195 }
 0x364   : > { %11113 = vmatmul.mubr.f32.vlgmr.msra.gmra.mrb[14].mxu0 %v13808_v7  ;;  %v12198_v40 = vpop.eup %12197  ;;  %v8291_v7 = vmul.f32 %v12194_v27, %v13883_v29  ;;  %v14037_v29 = vsub.f32 %v14004_v12, %v8472_v5  ;;  %v8707_v27 = vand.u32 4294901760, %v8706_v30  ;;  %v14120_v12 = vld [vmem:[%s14783_s3 + $0xb0] sm:$0xff]  ;;  %v14125_v30 = vld [vmem:[%s14783_s3 + $0xb8] sm:$0xff] }
 0x366   : > { %v14798_v46 = vand.u32 4294901760, %v14037_v29 }
 0x368   : > { %v8587_v28 = vsub.f32 %v14037_v29, %v14798_v46 }
 0x376   : > { %v6270_v62 = vpop.f32.mrb[10].mxu1 }
 0x377   : > { %v5770_v4 = vpop.f32.mrb[10].mxu0  ;;  %v8293_v48 = vmul.f32 %v12196_v38, %v6270_v62  ;;  %v10916_v49 = vpop.f32.mrb[11].mxu1  ;;  %v8588_v38 = vand.u32 4294901760, %v8587_v28  ;;  %v8601_v62 = vsub.f32 %v14055_v3, %v14793_v37  ;;  %v14130_v28 = vpack.c.bf16 %v8475_v23, %v8472_v5 }
 0x378   : > { %v8292_v39 = vmul.f32 %v12198_v40, %v5770_v4  ;;  %v10850_v50 = vpop.f32.mrb[11].mxu0  ;;  %v14091_v40 = vld [vmem:[%s14783_s3 + $0xa0] sm:$0xff]  ;;  %v8595_v4 = vand.u32 4294901760, %v8594_v0  ;;  %v8721_v49 = vand.u32 4294901760, %v8720_v54 }
 0x379   : > { %v8314_v41 = vcombine.low %v8291_v7, %v8293_v48  ;;  %v8315_v44 = vcombine.high %v8291_v7, %v8293_v48  ;;  %v8714_v48 = vand.u32 4294901760, %v8713_v32  ;;  %v14106_v50 = vld [vmem:[%s14783_s3 + $0x20] sm:$0xff]  ;;  %v8532_v2 = vand.u32 4294901760, %v14091_v40  ;;  %v14136_v32 = vld [vmem:[%s14783_s3 + $0x30] sm:$0xff]  ;;  %11760 = vmatpush3.bf16.msra.mxu0 %v14130_v28 }
 0x37a   : > { %v8298_v53 = vcombine.low %v8290_v59, %v8292_v39  ;;  %v8299_v6 = vcombine.high %v8290_v59, %v8292_v39  ;;  %v8608_v59 = vsub.f32 %v14063_v34, %v14790_v1  ;;  %v14101_v39 = vld [vmem:[%s14783_s3 + $0xa8] sm:$0xff]  ;;  %v11791_v19 = vpack.c.bf16 %v8595_v4, %v8588_v38 }
 0x37b   : > { %v13976_v63 = vrot.slane %v8314_v41, %v13972_v47  ;;  %v13979_v9 = vrot.slane %v8315_v44, %v13972_v47  ;;  %v11793_v22 = vpack.c.bf16 %v8721_v49, %v8714_v48  ;;  %v8535_v56 = vand.u32 4294901760, %v14101_v39 }
 0x37c   : > { %v13982_v57 = vrot.slane %v8298_v53, %v13972_v47  ;;  %v13985_v58 = vrot.slane %v8299_v6, %v13972_v47  ;;  %v11789_v53 = vpack.c.bf16 %v8707_v27, %v8700_v25  ;;  %v8602_v6 = vand.u32 4294901760, %v8601_v62 }
 0x37d   : > { %v8609_v26 = vand.u32 4294901760, %v8608_v59  ;;  %v8484_v0 = vand.u32 4294901760, %v14106_v50  ;;  %v8487_v25 = vand.u32 4294901760, %v14115_v61  ;;  %v14139_v27 = vpack.c.bf16 %v8529_v14, %v8526_v52  ;;  %v14158_v52 = vld [vmem:[%s14783_s3 + $0x38] sm:$0xff] }
 0x37e   : > { %11790 = vmatprep.subr.bf16.mxu1 %v11789_v53  ;;  %v8538_v38 = vand.u32 4294901760, %v14120_v12  ;;  %v14143_v62 = vsub.f32 %v14091_v40, %v8532_v2  ;;  %v14146_v5 = vsub.f32 %v14101_v39, %v8535_v56  ;;  %v8541_v4 = vand.u32 4294901760, %v14125_v30 }
 0x37f   : > { %11792 = vmatpush3.bf16.msra.mxu1 %v11791_v19  ;;  %v11795_v54 = vpack.c.bf16 %v8609_v26, %v8602_v6  ;;  %v14152_v23 = vsub.f32 %v14106_v50, %v8484_v0  ;;  %v14161_v14 = vsub.f32 %v14115_v61, %v8487_v25  ;;  %11762 = vmatprep.subr.bf16.mxu0 %v14139_v27  ;;  %v14813_v49 = vand.u32 4294901760, %v14136_v32 }
 0x380   : > { %11794 = vmatprep.subr.bf16.mxu1 %v11793_v22  ;;  %14876 = vst [vmem:[#allocation11_spill] sm:$0xff] %v14143_v62  ;;  %14877 = vst [vmem:[#allocation12_spill] sm:$0xff] %v14146_v5  ;;  %v14167_v40 = vsub.f32 %v14120_v12, %v8538_v38  ;;  %v14173_v48 = vpack.c.bf16 %v8481_v36, %v8478_v10  ;;  %v14789_v59 = vand.u32 4294901760, %v14143_v62  ;;  %v14788_v39 = vand.u32 4294901760, %v14146_v5 }
 0x381   : > { %14878 = vst [vmem:[#allocation13_spill] sm:$0xff] %v14152_v23  ;;  %14879 = vst [vmem:[#allocation14_spill] sm:$0xff] %v14161_v14  ;;  %v14180_v53 = vsub.f32 %v14125_v30, %v8541_v4  ;;  %v14791_v6 = vand.u32 4294901760, %v14161_v14  ;;  %v14812_v11 = vand.u32 4294901760, %v14158_v52  ;;  %v14188_v10 = vsub.f32 %v14136_v32, %v14813_v49 }
 0x382   : > { %14880 = vst [vmem:[#allocation15_spill] sm:$0xff] %v14167_v40  ;;  %v14792_v15 = vand.u32 4294901760, %v14167_v40  ;;  %v8727_v36 = vsub.f32 %v14143_v62, %v14789_v59  ;;  %v8734_v61 = vsub.f32 %v14146_v5, %v14788_v39  ;;  %11764 = vmatpush3.bf16.msra.mxu0 %v14173_v48 }
 0x383   : > { %14881 = vst [vmem:[#allocation16_spill] sm:$0xff] %v14180_v53  ;;  %11796 = vmatpush3.bf16.msra.mxu1 %v11795_v54  ;;  %14882 = vst [vmem:[#allocation17_spill] sm:$0xff] %v14188_v10  ;;  %v14797_v19 = vand.u32 4294901760, %v14180_v53  ;;  %v8622_v22 = vsub.f32 %v14161_v14, %v14791_v6  ;;  %v14799_v30 = vand.u32 4294901760, %v14188_v10  ;;  %v14211_v54 = vsub.f32 %v14158_v52, %v14812_v11 }
 0x384   : > { %v8741_v26 = vsub.f32 %v14167_v40, %v14792_v15  ;;  %v8728_v39 = vand.u32 4294901760, %v8727_v36  ;;  %v8735_v59 = vand.u32 4294901760, %v8734_v61  ;;  %v14224_v15 = vld [vmem:[%s14783_s3 + $0xc8] sm:$0xff]  ;;  %v14233_v36 = vld [vmem:[%s14783_s3 + $0x40] sm:$0xff] }
 0x385   : > { %14883 = vst [vmem:[#allocation18_spill] sm:$0xff] %v14211_v54  ;;  %v8748_v6 = vsub.f32 %v14180_v53, %v14797_v19  ;;  %v8623_v37 = vand.u32 4294901760, %v8622_v22  ;;  %v8629_v51 = vsub.f32 %v14188_v10, %v14799_v30  ;;  %v14802_v43 = vand.u32 4294901760, %v14211_v54  ;;  %v14241_v22 = vld [vmem:[%s14783_s3 + $0x48] sm:$0xff] }
 0x386   : > { %v8742_v31 = vand.u32 4294901760, %v8741_v26  ;;  %v11797_v61 = vpack.c.bf16 %v8735_v59, %v8728_v39  ;;  %v14235_v19 = vpack.c.bf16 %v8535_v56, %v8532_v2  ;;  %v14809_v45 = vand.u32 4294901760, %v14224_v15  ;;  %v14250_v2 = vld [vmem:[%s14783_s3 + $0xd0] sm:$0xff]  ;;  %v14255_v56 = vld [vmem:[%s14783_s3 + $0xd8] sm:$0xff] }
 0x387   : > { %v8630_v30 = vand.u32 4294901760, %v8629_v51  ;;  %v8636_v42 = vsub.f32 %v14211_v54, %v14802_v43 }
 0x388   : > { %11798 = vmatprep.subr.bf16.mxu1 %v11797_v61  ;;  %11766 = vmatprep.subr.bf16.mxu0 %v14235_v19  ;;  %v14276_v61 = vpack.c.bf16 %v8541_v4, %v8538_v38 }
 0x389   : > { %v8637_v39 = vand.u32 4294901760, %v8636_v42 }
 0x38a   : > { %14887 = vst [vmem:[#allocation22_spill] sm:$0xff] %v14276_v61 }
 0x3d6   : > { %v14093_v7 = vpop.f32.mrb[12].mxu1 }
 0x3d7   : > { %v14108_v41 = vpop.f32.mrb[12].mxu0  ;;  %v11048_v44 = vpop.f32.mrb[13].mxu1 }
 0x3d8   : > { %v10982_v33 = vpop.f32.mrb[13].mxu0  ;;  %v14787_v44 = vand.u32 4294901760, %v14152_v23 }
 0x3da   : > { %v8615_v33 = vsub.f32 %v14152_v23, %v14787_v44  ;;  %v14216_v44 = vld [vmem:[%s14783_s3 + $0xc0] sm:$0xff] }
 0x3db   : > { %v14811_v46 = vand.u32 4294901760, %v14216_v44  ;;  %v14900_v3 = vand.u32 4294901760, %v14216_v44 }
 0x3dc   : > { %v8616_v1 = vand.u32 4294901760, %v8615_v33  ;;  %v8749_v33 = vand.u32 4294901760, %v8748_v6  ;;  %v14271_v6 = vsub.f32 %v14224_v15, %v14809_v45 }
 0x3dd   : > { %v14261_v51 = vsub.f32 %v14216_v44, %v14811_v46 }
 0x3de   : > { %v11799_v26 = vpack.c.bf16 %v8623_v37, %v8616_v1  ;;  %v11801_v59 = vpack.c.bf16 %v8749_v33, %v8742_v31  ;;  %v14265_v37 = vpack.c.bf16 %v8487_v25, %v8484_v0  ;;  %v14806_v1 = vand.u32 4294901760, %v14233_v36  ;;  %14886 = vst [vmem:[#allocation21_spill] sm:$0xff] %v14271_v6 }
 0x3df   : > { %14884 = vst [vmem:[#allocation19_spill] sm:$0xff] %v14261_v51  ;;  %v14805_v31 = vand.u32 4294901760, %v14241_v22  ;;  %v14803_v50 = vand.u32 4294901760, %v14261_v51  ;;  %v14804_v0 = vand.u32 4294901760, %v14250_v2  ;;  %v14807_v25 = vand.u32 4294901760, %v14255_v56 }
 0x3e0   : > { %14885 = vst [vmem:[#allocation20_spill] sm:$0xff] %v14265_v37  ;;  %11800 = vmatpush3.bf16.msra.mxu1 %v11799_v26  ;;  %11768 = vmatpush3.bf16.msra.mxu0 %v14265_v37  ;;  %v14283_v42 = vsub.f32 %v14233_v36, %v14806_v1  ;;  %v11803_v33 = vpack.c.bf16 %v8637_v39, %v8630_v30  ;;  %v14808_v26 = vand.u32 4294901760, %v14271_v6 }
 0x3e1   : > { %11802 = vmatprep.subr.bf16.mxu1 %v11801_v59  ;;  %v14291_v12 = vsub.f32 %v14241_v22, %v14805_v31  ;;  %11770 = vmatprep.subr.bf16.mxu0 %v14276_v61  ;;  %v8755_v38 = vsub.f32 %v14261_v51, %v14803_v50  ;;  %v14301_v59 = vsub.f32 %v14250_v2, %v14804_v0 }
 0x3e2   : > { %14888 = vst [vmem:[#allocation23_spill] sm:$0xff] %v14283_v42  ;;  %v14810_v4 = vand.u32 4294901760, %v14283_v42  ;;  %v14306_v30 = vsub.f32 %v14255_v56, %v14807_v25  ;;  %v8762_v39 = vsub.f32 %v14271_v6, %v14808_v26  ;;  %v14896_v6 = vand.u32 4294901760, %v14136_v32 }
 0x3e3   : > { %14889 = vst [vmem:[#allocation24_spill] sm:$0xff] %v14291_v12  ;;  %14890 = vst [vmem:[#allocation25_spill] sm:$0xff] %v14301_v59  ;;  %v14814_v43 = vand.u32 4294901760, %v14291_v12  ;;  %v8756_v50 = vand.u32 4294901760, %v8755_v38  ;;  %v14815_v0 = vand.u32 4294901760, %v14301_v59  ;;  %v14901_v32 = vand.u32 4294901760, %v14224_v15 }
 0x3e4   : > { %14891 = vst [vmem:[#allocation26_spill] sm:$0xff] %v14306_v30  ;;  %11804 = vmatpush3.bf16.msra.mxu1 %v11803_v33  ;;  %v8643_v17 = vsub.f32 %v14283_v42, %v14810_v4  ;;  %v14818_v31 = vand.u32 4294901760, %v14306_v30  ;;  %v8763_v1 = vand.u32 4294901760, %v8762_v39 }
 0x3e5   : > { %v8650_v33 = vsub.f32 %v14291_v12, %v14814_v43  ;;  %v8769_v26 = vsub.f32 %v14301_v59, %v14815_v0  ;;  %v12345_v43 = vmov 1934713408   ;;  %v4270_v59 = vpop.xlane.xlu0 %4269 }
 0x3e6   : > { %v8644_v25 = vand.u32 4294901760, %v8643_v17  ;;  %v8776_v38 = vsub.f32 %v14306_v30, %v14818_v31  ;;  %v11805_v45 = vpack.c.bf16 %v8763_v1, %v8756_v50  ;;  %v8365_v17 = vunpack.c.l.s4 %v12345_v43  ;;  %v14365_v1 = vld [vmem:[%s14783_s3 + $0xe8] sm:$0xff]  ;;  %v12200_v50 = vpop.eup %12199 }
 0x3e7   : > { %v8651_v4 = vand.u32 4294901760, %v8650_v33  ;;  %v8770_v46 = vand.u32 4294901760, %v8769_v26  ;;  %12205 = vrcp.f32 %v4270_v59  ;;  %v14894_v26 = vcombine.high %v13982_v57, %v13976_v63 }
 0x3e8   : > { %v8777_v11 = vand.u32 4294901760, %v8776_v38  ;;  %11806 = vmatprep.subr.bf16.mxu1 %v11805_v45  ;;  %v8366_v0 = vunpack.c.0.s8 %v8365_v17  ;;  %v14332_v45 = vld [vmem:[%s14783_s3 + $0x50] sm:$0xff]  ;;  %v14823_v33 = vand.u32 4294901760, %v14365_v1  ;;  %v14384_v38 = vld [vmem:[%s14783_s3 + $0x60] sm:$0xff]  ;;  %v12202_v17 = vpop.eup %12201 }
 0x3e9   : > { %v11807_v49 = vpack.c.bf16 %v8651_v4, %v8644_v25  ;;  %v14820_v60 = vand.u32 4294901760, %v14332_v45 }
 0x3ea   : > { %v11809_v39 = vpack.c.bf16 %v8777_v11, %v8770_v46  ;;  %v14327_v31 = vsub.s32 %v8366_v0, %v13968_v20  ;;  %v14337_v46 = vld [vmem:[%s14783_s3 + $0x58] sm:$0xff]  ;;  %v14892_v20 = vcombine.low %v13985_v58, %v13979_v9  ;;  %v14360_v11 = vld [vmem:[%s14783_s3 + $0xe0] sm:$0xff]  ;;  %v14893_v0 = vcombine.low %v13982_v57, %v13976_v63 }
 0x3eb   : > { %11808 = vmatpush3.bf16.msra.mxu1 %v11807_v49  ;;  %v14819_v55 = vand.u32 4294901760, %v14337_v46  ;;  %v14350_v49 = vsub.f32 %v14332_v45, %v14820_v60  ;;  %v14826_v59 = vand.u32 4294901760, %v14360_v11  ;;  %v14405_v30 = vsub.f32 %v14365_v1, %v14823_v33  ;;  %v14426_v33 = vld [vmem:[%s14783_s3 + $0xf0] sm:$0xff] }
 0x3ec   : > { %11810 = vmatprep.subr.bf16.mxu1 %v11809_v39  ;;  %v14345_v43 = vrot.slane %v14892_v20, %v14327_v31  ;;  %v14371_v25 = vrot.slane %v14893_v0, %v14327_v31  ;;  %v14377_v4 = vrot.slane %v14894_v26, %v14327_v31  ;;  %v14389_v39 = vld [vmem:[%s14783_s3 + $0x68] sm:$0xff]  ;;  %v8294_v26 = vmul.f32 %v12200_v50, %v14108_v41 }
 0x3ed   : > { %v14355_v13 = vsub.f32 %v14337_v46, %v14819_v55  ;;  %v14824_v20 = vand.u32 4294901760, %v14350_v49  ;;  %v14829_v0 = vand.u32 4294901760, %v14389_v39  ;;  %v8295_v55 = vmul.f32 %v12202_v17, %v14093_v7 }
 0x3ee   : > { %v14400_v60 = vsub.f32 %v14360_v11, %v14826_v59  ;;  %v14895_v7 = vand.u32 4294901760, %v14384_v38  ;;  %v14850_v59 = vand.u32 4294901760, %v14426_v33 }
 0x3ef   : > { %v14825_v63 = vand.u32 4294901760, %v14355_v13  ;;  %v8657_v57 = vsub.f32 %v14350_v49, %v14824_v20  ;;  %v14421_v17 = vsub.f32 %v14389_v39, %v14829_v0  ;;  %v14431_v20 = vld [vmem:[%s14783_s3 + $0xf8] sm:$0xff] }
 0x3f0   : > { %v14416_v50 = vsub.f32 %v14384_v38, %v14895_v7  ;;  %v14847_v7 = vand.u32 4294901760, %v14405_v30  ;;  %v14855_v12 = vand.u32 4294901760, %v14431_v20  ;;  %v14448_v53 = vsub.f32 %v14426_v33, %v14850_v59 }
 0x3f1   : > { %v8664_v41 = vsub.f32 %v14355_v13, %v14825_v63  ;;  %v14842_v63 = vand.u32 4294901760, %v14400_v60  ;;  %v8658_v0 = vand.u32 4294901760, %v8657_v57  ;;  %v14899_v59 = vand.u32 4294901760, %v14421_v17 }
 0x3f2   : > { %v8790_v10 = vsub.f32 %v14405_v30, %v14847_v7  ;;  %v14453_v57 = vsub.f32 %v14431_v20, %v14855_v12  ;;  %v14898_v7 = vand.u32 4294901760, %v14416_v50 }
 0x3f3   : > { %v8665_v42 = vand.u32 4294901760, %v8664_v41  ;;  %v8783_v54 = vsub.f32 %v14400_v60, %v14842_v63  ;;  %v12204_v41 = vpop.eup %12203  ;;  %v14897_v63 = vand.u32 4294901760, %v14158_v52  ;;  %v8678_v61 = vsub.f32 %v14421_v17, %v14899_v59 }
 0x3f4   : > { %v8671_v23 = vsub.f32 %v14416_v50, %v14898_v7  ;;  %v12206_v5 = vpop.eup %12205  ;;  %v14471_v52 = vpack.c.bf16 %v14901_v32, %v14900_v3  ;;  %v8796_v59 = vand.u32 4294901760, %v14448_v53  ;;  %v8803_v44 = vand.u32 4294901760, %v14453_v57 }
 0x3f5   : > { %v14459_v40 = vpack.c.bf16 %v14897_v63, %v14896_v6  ;;  %v11811_v14 = vpack.c.bf16 %v8665_v42, %v8658_v0  ;;  %v8784_v6 = vand.u32 4294901760, %v8783_v54  ;;  %v8791_v42 = vand.u32 4294901760, %v8790_v10 }
 0x3f6   : > { %v8672_v7 = vand.u32 4294901760, %v8671_v23  ;;  %v8679_v37 = vand.u32 4294901760, %v8678_v61  ;;  %v14902_v10 = vand.u32 4294901760, %v14233_v36  ;;  %v293_v23 = vld [vmem:[%s14783_s3 + $0x70] sm:$0xff]  ;;  %v14904_v36 = vand.u32 4294901760, %v14250_v2 }
 0x3f7   : > { %11772 = vmatpush3.bf16.msra.mxu0 %v14459_v40  ;;  %11812 = vmatpush3.bf16.msra.mxu1 %v11811_v14  ;;  %v14906_v2 = vcombine.high %v13985_v58, %v13979_v9 }
 0x3f8   : > { %11774 = vmatprep.subr.bf16.mxu0 %v14471_v52  ;;  %v11815_v14 = vpack.c.bf16 %v8679_v37, %v8672_v7  ;;  %v8797_v37 = vsub.f32 %v14448_v53, %v8796_v59 }
 0x3fa   : > { %v8798_v32 = vand.u32 4294901760, %v8797_v37 }
 0x436   : > { %v8270_v51 = vpop.f32.mrb[14].mxu1 }
 0x437   : > { %v7770_v12 = vpop.f32.mrb[14].mxu0  ;;  %v8297_v62 = vmul.f32 %v12204_v41, %v8270_v51  ;;  %v11180_v34 = vpop.f32.mrb[15].mxu1 }
 0x438   : > { %v8296_v63 = vmul.f32 %v12206_v5, %v7770_v12  ;;  %v11114_v0 = vpop.f32.mrb[15].mxu0  ;;  %v11813_v34 = vpack.c.bf16 %v8791_v42, %v8784_v6  ;;  %v14903_v5 = vand.u32 4294901760, %v14241_v22  ;;  %v14905_v22 = vand.u32 4294901760, %v14255_v56 }
 0x439   : > { %v8346_v35 = vcombine.low %v8295_v55, %v8297_v62  ;;  %v8347_v51 = vcombine.high %v8295_v55, %v8297_v62  ;;  %v294_v62 = vld [vmem:[%s14783_s3 + $0x78] sm:$0xff]  ;;  %v8393_v56 = vrot.slane %v14906_v2, %v14327_v31  ;;  %v8514_v6 = vand.u32 4294901760, %v293_v23 }
 0x43a   : > { %v8330_v3 = vcombine.low %v8294_v26, %v8296_v63  ;;  %v8331_v15 = vcombine.high %v8294_v26, %v8296_v63  ;;  %v14481_v54 = vpack.c.bf16 %v14903_v5, %v14902_v10  ;;  %11814 = vmatprep.subr.bf16.mxu1 %v11813_v34  ;;  %v14495_v55 = vpack.c.bf16 %v14905_v22, %v14904_v36 }
 0x43b   : > { %v8354_v61 = vrot.slane %v8346_v35, %v13972_v47  ;;  %v8361_v12 = vrot.slane %v8347_v51, %v13972_v47  ;;  %11816 = vmatpush3.bf16.msra.mxu1 %v11815_v14  ;;  %v8804_v35 = vsub.f32 %v14453_v57, %v8803_v44  ;;  %v8517_v42 = vand.u32 4294901760, %v294_v62 }
 0x43c   : > { %v8338_v26 = vrot.slane %v8330_v3, %v13972_v47  ;;  %v8345_v41 = vrot.slane %v8331_v15, %v13972_v47  ;;  %11776 = vmatpush3.bf16.msra.mxu0 %v14481_v54  ;;  %v14907_v34 = vand.u32 4294901760, %v14332_v45  ;;  %v14908_v3 = vand.u32 4294901760, %v14337_v46 }
 0x43d   : > { %11778 = vmatprep.subr.bf16.mxu0 %v14495_v55  ;;  %v8805_v51 = vand.u32 4294901760, %v8804_v35  ;;  %v14517_v10 = vsub.f32 %v293_v23, %v8514_v6  ;;  %v14519_v9 = vsub.f32 %v294_v62, %v8517_v42  ;;  %v14909_v23 = vand.u32 4294901760, %v14360_v11 }
 0x43e   : > { %v8394_v63 = vcombine.low %v8338_v26, %v8354_v61  ;;  %v8395_v0 = vcombine.high %v8338_v26, %v8354_v61  ;;  %v8410_v47 = vcombine.low %v8345_v41, %v8361_v12  ;;  %v8411_v7 = vcombine.high %v8345_v41, %v8361_v12 }
 0x43f   : > { %v14515_v15 = vpack.c.bf16 %v14908_v3, %v14907_v34  ;;  %v11817_v12 = vpack.c.bf16 %v8805_v51, %v8798_v32  ;;  %v14867_v45 = vand.u32 4294901760, %v14517_v10  ;;  %v14866_v46 = vand.u32 4294901760, %v14519_v9 }
 0x440   : > { %v8418_v58 = vrot.slane %v8410_v47, %v14327_v31  ;;  %v8402_v5 = vrot.slane %v8394_v63, %v14327_v31  ;;  %v8409_v14 = vrot.slane %v8395_v0, %v14327_v31  ;;  %v8425_v61 = vrot.slane %v8411_v7, %v14327_v31 }
 0x441   : > { %11780 = vmatpush3.bf16.msra.mxu0 %v14515_v15  ;;  %v14910_v62 = vand.u32 4294901760, %v14365_v1  ;;  %11818 = vmatprep.subr.bf16.mxu1 %v11817_v12  ;;  %v8685_v11 = vsub.f32 %v14517_v10, %v14867_v45  ;;  %v8692_v1 = vsub.f32 %v14519_v9, %v14866_v46  ;;  %v14911_v63 = vand.u32 4294901760, %v14384_v38  ;;  %v14933_v46 = vld [vmem:[#allocation26_spill] sm:$0xff] }
 0x442   : > { %v8431_v22 = vcombine.high %v14345_v43, %v8418_v58  ;;  %v8427_v37 = vcombine.high %v14371_v25, %v8402_v5  ;;  %v8428_v26 = vcombine.low %v14377_v4, %v8409_v14  ;;  %v8432_v31 = vcombine.low %v8393_v56, %v8425_v61 }
 0x443   : > { %v14532_v36 = vpack.c.bf16 %v14910_v62, %v14909_v23  ;;  %v8429_v41 = vcombine.high %v14377_v4, %v8409_v14  ;;  %v8433_v35 = vcombine.high %v8393_v56, %v8425_v61  ;;  %v8430_v2 = vcombine.low %v14345_v43, %v8418_v58 }
 0x444   : > { %v8426_v32 = vcombine.low %v14371_v25, %v8402_v5  ;;  %8447 = vrot.lane.b32.xlu0 %v8431_v22, %s12346_s10  ;;  %8435 = vrot.lane.b32.xlu1 %v8427_v37, %s12346_s10  ;;  %v14912_v4 = vand.u32 4294901760, %v14389_v39  ;;  %v14913_v43 = vand.u32 4294901760, %v14426_v33  ;;  %v14914_v25 = vand.u32 4294901760, %v14431_v20  ;;  %s12275_s10 = scalar_lea.vmem %s12274_s9, 256 }
 0x445   : > { %11782 = vmatprep.subr.bf16.mxu0 %v14532_v36  ;;  %v8686_v47 = vand.u32 4294901760, %v8685_v11  ;;  %v8693_v7 = vand.u32 4294901760, %v8692_v1  ;;  %v14560_v51 = vpack.c.bf16 %v8517_v42, %v8514_v6  ;;  %v11821_v39 = vpack.c.bf16 %v14034_v18, %v14032_v16  ;;  %p12277_p9 = scmp.lt.s32.totalorder %s12275_s10, %s12269_s7 }
 0x446   : > { %v14550_v56 = vpack.c.bf16 %v14912_v4, %v14911_v63  ;;  %v14557_v0 = vpack.c.bf16 %v14914_v25, %v14913_v43  ;;  %v11843_v33 = vpack.c.bf16 %v14355_v13, %v14350_v49  ;;  %v11845_v20 = vpack.c.bf16 %v14405_v30, %v14400_v60 }
 0x447   : > { %v11819_v38 = vpack.c.bf16 %v8693_v7, %v8686_v47  ;;  %v11847_v6 = vpack.c.bf16 %v14421_v17, %v14416_v50  ;;  %v11849_v42 = vpack.c.bf16 %v14453_v57, %v14448_v53  ;;  %v11851_v34 = vpack.c.bf16 %v14519_v9, %v14517_v10  ;;  %v14915_v7 = vld [vmem:[#allocation8_spill] sm:$0xff]  ;;  %v9428_v53 = vld [vmem:[%s14784_s4] ss:$0 sm:$0xff]  ;;  %p12278_p13 = por %p12277_p9, %p12276_p8 }
 0x448   : > { %11784 = vmatpush3.bf16.msra.mxu0 %v14550_v56  ;;  %8439 = vrot.lane.b32.xlu0 %v8428_v26, %s12347_s11  ;;  %v11823_v47 = vpack.c.bf16 %v14040_v24, %v14037_v29 }
 0x449   : > { %11786 = vmatprep.subr.bf16.mxu0 %v14557_v0  ;;  %8451 = vrot.lane.b32.xlu1 %v8432_v31, %s12347_s11  ;;  %p12279_p1 = pnand %p12278_p13, %p12272_p12 }
 0x44a   : > { %11820 = vmatpush3.bf16.msra.mxu1 %v11819_v38  ;;  %v11825_v38 = vpack.c.bf16 %v14915_v7, %v14043_v8 }
 0x44b   : > { %11854 = vmatprep.subr.bf16.mxu1 %v14110_v21 }
 0x44c   : > { %11788 = vmatpush3.bf16.msra.mxu0 %v14560_v51  ;;  %8443 = vrot.lane.b32.xlu0 %v8429_v41, %s12348_s13 }
 0x44d   : > { %11822 = vmatprep.subr.bf16.mxu0 %v11821_v39  ;;  %8455 = vrot.lane.b32.xlu1 %v8433_v35, %s12348_s13  ;;  %v14916_v39 = vld [vmem:[#allocation20_spill] sm:$0xff] }
 0x4b6   : > { %v8448_v3 = vpop.permute.xlu0 %8447  ;;  %v8436_v58 = vpop.permute.xlu1 %8435 }
 0x4b7   : > { %v8462_v61 = vsel %vm317_vm1, %v8430_v2, %v8448_v3  ;;  %v8458_v12 = vsel %vm317_vm1, %v8426_v32, %v8436_v58  ;;  %v14917_v3 = vld [vmem:[#allocation9_spill] sm:$0xff]  ;;  %v14918_v58 = vld [vmem:[#allocation10_spill] sm:$0xff] }
 0x4ba   : > { %v8440_v5 = vpop.permute.xlu0 %8439 }
 0x4bb   : > { %v8452_v14 = vpop.permute.xlu1 %8451  ;;  %v8459_v23 = vsel %vm4201_vm2, %v8458_v12, %v8440_v5  ;;  %v11827_v5 = vpack.c.bf16 %v14918_v58, %v14917_v3 }
 0x4bc   : > { %v8463_v62 = vsel %vm4201_vm2, %v8462_v61, %v8452_v14  ;;  %v14919_v14 = vld [vmem:[#allocation11_spill] sm:$0xff]  ;;  %v14920_v61 = vld [vmem:[#allocation12_spill] sm:$0xff] }
 0x4bd   : > { %v11829_v12 = vpack.c.bf16 %v14920_v61, %v14919_v14 }
 0x4be   : > { %v8444_v22 = vpop.permute.xlu0 %8443 }
 0x4bf   : > { %v8456_v37 = vpop.permute.xlu1 %8455  ;;  %v8461_v26 = vsel %vm8460_vm3, %v8459_v23, %v8444_v22  ;;  %v14921_v23 = vld [vmem:[#allocation22_spill] sm:$0xff] }
 0x4c0   : > { %v8464_v31 = vsel %vm8460_vm3, %v8463_v62, %v8456_v37  ;;  %v14581_v41 = vand.u32 4294901760, %v8461_v26  ;;  %v14922_v62 = vld [vmem:[#allocation13_spill] sm:$0xff]  ;;  %v14923_v22 = vld [vmem:[#allocation14_spill] sm:$0xff] }
 0x4c1   : > { %v14583_v35 = vand.u32 4294901760, %v8464_v31  ;;  %v11831_v37 = vpack.c.bf16 %v14923_v22, %v14922_v62 }
 0x4c2   : > { %v14586_v11 = vsub.f32 %v8461_v26, %v14581_v41  ;;  %v14924_v26 = vld [vmem:[#allocation15_spill] sm:$0xff] }
 0x4c3   : > { %v8568_v1 = vsub.f32 %v8464_v31, %v14583_v35  ;;  %8808 = vmatprep.mubr.f32.mxu1 %v14583_v35  ;;  %v14925_v31 = vld [vmem:[#allocation16_spill] sm:$0xff] }
 0x4c4   : > { %8810 = vmatmul.mubr.f32.vlgmr.msra.gmra.mrb[16].mxu1 %v14581_v41  ;;  %v8575_v2 = vand.u32 4294901760, %v14586_v11 }
 0x4c5   : > { %11856 = vmatpush3.bf16.msra.mxu1 %v14130_v28  ;;  %v8569_v32 = vand.u32 4294901760, %v8568_v1 }
 0x4c6   : > { %11858 = vmatprep.subr.bf16.mxu1 %v14139_v27  ;;  %v8576_v63 = vsub.f32 %v14586_v11, %v8575_v2 }
 0x4c7   : > { %9052 = vmatprep.mubr.f32.mxu1 %v8569_v32  ;;  %v8570_v4 = vsub.f32 %v8568_v1, %v8569_v32  ;;  %v11833_v32 = vpack.c.bf16 %v14925_v31, %v14924_v26 }
 0x4c8   : > { %v8577_v25 = vand.u32 4294901760, %v8576_v63  ;;  %v14927_v63 = vld [vmem:[#allocation18_spill] sm:$0xff] }
 0x4c9   : > { %11860 = vmatpush3.bf16.msra.mxu1 %v14173_v48  ;;  %v8571_v43 = vand.u32 4294901760, %v8570_v4 }
 0x4ca   : > { %11862 = vmatprep.subr.bf16.mxu1 %v14235_v19 }
 0x4cb   : > { %8572 = vmatprep.mubr.f32.mxu0 %v8571_v43  ;;  %v14928_v43 = vld [vmem:[#allocation19_spill] sm:$0xff] }
 0x4cc   : > { %8578 = vmatmul.mubr.f32.vlgmr.msra.gmra.mrb[16].mxu0 %v8577_v25  ;;  %v14929_v25 = vld [vmem:[#allocation21_spill] sm:$0xff] }
 0x4cd   : > { %11824 = vmatpush3.bf16.msra.mxu0 %v11823_v47  ;;  %11864 = vmatpush3.bf16.msra.mxu1 %v14916_v39  ;;  %v11837_v47 = vpack.c.bf16 %v14929_v25, %v14928_v43 }
 0x4ce   : > { %8945 = vmatprep.mubr.f32.mxu0 %v8568_v1  ;;  %11826 = vmatprep.subr.bf16.mxu0 %v11825_v38  ;;  %v14926_v1 = vld [vmem:[#allocation17_spill] sm:$0xff]  ;;  %v14930_v38 = vld [vmem:[#allocation23_spill] sm:$0xff] }
 0x4cf   : > { %11866 = vmatprep.subr.bf16.mxu1 %v14921_v23  ;;  %v11835_v4 = vpack.c.bf16 %v14927_v63, %v14926_v1 }
 0x4d1   : > { %11828 = vmatpush3.bf16.msra.mxu0 %v11827_v5  ;;  %11868 = vmatpush3.bf16.msra.mxu1 %v14459_v40  ;;  %v14931_v5 = vld [vmem:[#allocation24_spill] sm:$0xff] }
 0x4d2   : > { %11830 = vmatprep.subr.bf16.mxu0 %v11829_v12  ;;  %11870 = vmatprep.subr.bf16.mxu1 %v14471_v52  ;;  %v11839_v12 = vpack.c.bf16 %v14931_v5, %v14930_v38 }
 0x4d5   : > { %11832 = vmatpush3.bf16.msra.mxu0 %v11831_v37  ;;  %11872 = vmatpush3.bf16.msra.mxu1 %v14481_v54  ;;  %v14932_v37 = vld [vmem:[#allocation25_spill] sm:$0xff] }
 0x4d6   : > { %11834 = vmatprep.subr.bf16.mxu0 %v11833_v32  ;;  %11874 = vmatprep.subr.bf16.mxu1 %v14495_v55  ;;  %v11841_v45 = vpack.c.bf16 %v14933_v46, %v14932_v37  ;;  %v14956_v32 = vand.u32 4294901760, %v14350_v49  ;;  %v11913_v49 = vpack.c.bf16 %v8803_v44, %v8796_v59 }
 0x4d9   : > { %11836 = vmatpush3.bf16.msra.mxu0 %v11835_v4  ;;  %11876 = vmatpush3.bf16.msra.mxu1 %v14515_v15 }
 0x4da   : > { %11838 = vmatprep.subr.bf16.mxu0 %v11837_v47  ;;  %11878 = vmatprep.subr.bf16.mxu1 %v14532_v36 }
 0x4dd   : > { %11840 = vmatpush3.bf16.msra.mxu0 %v11839_v12  ;;  %11880 = vmatpush3.bf16.msra.mxu1 %v14550_v56 }
 0x4de   : > { %11842 = vmatprep.subr.bf16.mxu0 %v11841_v45  ;;  %11882 = vmatprep.subr.bf16.mxu1 %v14557_v0  ;;  %v14934_v45 = vand.u32 4294901760, %v14032_v16  ;;  %v14938_v16 = vand.u32 4294901760, %v14043_v8  ;;  %v14943_v8 = vand.u32 4294901760, %v14920_v61  ;;  %v14950_v61 = vand.u32 4294901760, %v14928_v43 }
 0x4e1   : > { %11844 = vmatpush3.bf16.msra.mxu0 %v11843_v33  ;;  %11884 = vmatpush3.bf16.msra.mxu1 %v14560_v51  ;;  %v14935_v33 = vand.u32 4294901760, %v14034_v18  ;;  %v14939_v18 = vand.u32 4294901760, %v14915_v7  ;;  %v14947_v7 = vand.u32 4294901760, %v14925_v31 }
 0x4e2   : > { %11846 = vmatprep.subr.bf16.mxu0 %v11845_v20  ;;  %11918 = vmatprep.subr.bf16.mxu1 %v14110_v21  ;;  %v14936_v21 = vand.u32 4294901760, %v14037_v29  ;;  %v14941_v29 = vand.u32 4294901760, %v14918_v58  ;;  %v14949_v58 = vand.u32 4294901760, %v14927_v63  ;;  %v14958_v63 = vand.u32 4294901760, %v14400_v60 }
 0x4e3   : > { %v11885_v20 = vpack.c.bf16 %v14935_v33, %v14934_v45  ;;  %v14963_v60 = vand.u32 4294901760, %v14519_v9 }
 0x4e4   : > { %9056 = vmatmul.mubr.f32.vlgmr.msra.gmra.mrb[18].mxu1 %v8575_v2  ;;  %v14946_v2 = vand.u32 4294901760, %v14924_v26  ;;  %v14954_v26 = vand.u32 4294901760, %v14932_v37 }
 0x4e5   : > { %11848 = vmatpush3.bf16.msra.mxu0 %v11847_v6  ;;  %11920 = vmatpush3.bf16.msra.mxu1 %v14130_v28  ;;  %v14937_v28 = vand.u32 4294901760, %v14040_v24  ;;  %v14942_v24 = vand.u32 4294901760, %v14919_v14 }
 0x4e6   : > { %9326 = vmatprep.mubr.f32.mxu1 %v14583_v35  ;;  %11850 = vmatprep.subr.bf16.mxu0 %v11849_v42  ;;  %v11889_v42 = vpack.c.bf16 %v14939_v18, %v14938_v16 }
 0x4e7   : > { %11922 = vmatprep.subr.bf16.mxu1 %v14139_v27  ;;  %v11887_v6 = vpack.c.bf16 %v14937_v28, %v14936_v21  ;;  %v14940_v27 = vand.u32 4294901760, %v14917_v3  ;;  %v14948_v3 = vand.u32 4294901760, %v14926_v1 }
 0x4e9   : > { %11852 = vmatpush3.bf16.msra.mxu0 %v11851_v34  ;;  %11924 = vmatpush3.bf16.msra.mxu1 %v14173_v48  ;;  %v11891_v48 = vpack.c.bf16 %v14941_v29, %v14940_v27  ;;  %v14944_v34 = vand.u32 4294901760, %v14922_v62  ;;  %v11899_v14 = vpack.c.bf16 %v14949_v58, %v14948_v3  ;;  %v14952_v62 = vand.u32 4294901760, %v14930_v38 }
 0x4ea   : > { %11886 = vmatprep.subr.bf16.mxu0 %v11885_v20  ;;  %11926 = vmatprep.subr.bf16.mxu1 %v14235_v19  ;;  %v11893_v19 = vpack.c.bf16 %v14943_v8, %v14942_v24 }
 0x4ec   : > { %8948 = vmatmul.mubr.f32.vlgmr.msra.gmra.mrb[18].mxu0 %v14586_v11 }
 0x4ed   : > { %11888 = vmatpush3.bf16.msra.mxu0 %v11887_v6  ;;  %9222 = vmatprep.mubr.f32.mxu0 %v14583_v35  ;;  %v14945_v35 = vand.u32 4294901760, %v14923_v22 }
 0x4ee   : > { %11928 = vmatpush3.bf16.msra.mxu1 %v14916_v39  ;;  %11890 = vmatprep.subr.bf16.mxu0 %v11889_v42  ;;  %v11897_v39 = vpack.c.bf16 %v14947_v7, %v14946_v2 }
 0x4ef   : > { %11930 = vmatprep.subr.bf16.mxu1 %v14921_v23  ;;  %v11895_v11 = vpack.c.bf16 %v14945_v35, %v14944_v34 }
 0x4f1   : > { %11892 = vmatpush3.bf16.msra.mxu0 %v11891_v48 }
 0x4f2   : > { %11932 = vmatpush3.bf16.msra.mxu1 %v14459_v40  ;;  %11894 = vmatprep.subr.bf16.mxu0 %v11893_v19  ;;  %v14951_v40 = vand.u32 4294901760, %v14929_v25 }
 0x4f3   : > { %11934 = vmatprep.subr.bf16.mxu1 %v14471_v52  ;;  %v14953_v52 = vand.u32 4294901760, %v14931_v5 }
 0x4f4   : > { %v11901_v23 = vpack.c.bf16 %v14951_v40, %v14950_v61 }
 0x4f5   : > { %11896 = vmatpush3.bf16.msra.mxu0 %v11895_v11  ;;  %v11903_v22 = vpack.c.bf16 %v14953_v52, %v14952_v62 }
 0x4f6   : > { %11936 = vmatpush3.bf16.msra.mxu1 %v14481_v54  ;;  %11898 = vmatprep.subr.bf16.mxu0 %v11897_v39  ;;  %v14955_v54 = vand.u32 4294901760, %v14933_v46  ;;  %v14960_v46 = vand.u32 4294901760, %v14416_v50 }
 0x4f7   : > { %11938 = vmatprep.subr.bf16.mxu1 %v14495_v55  ;;  %v14957_v55 = vand.u32 4294901760, %v14355_v13 }
 0x4f8   : > { %v11905_v31 = vpack.c.bf16 %v14955_v54, %v14954_v26 }
 0x4f9   : > { %11900 = vmatpush3.bf16.msra.mxu0 %v11899_v14  ;;  %v11907_v1 = vpack.c.bf16 %v14957_v55, %v14956_v32 }
 0x4fa   : > { %11940 = vmatpush3.bf16.msra.mxu1 %v14515_v15  ;;  %11902 = vmatprep.subr.bf16.mxu0 %v11901_v23  ;;  %v14959_v15 = vand.u32 4294901760, %v14405_v30  ;;  %v14962_v30 = vand.u32 4294901760, %v14517_v10 }
 0x4fb   : > { %11942 = vmatprep.subr.bf16.mxu1 %v14532_v36  ;;  %v14961_v36 = vand.u32 4294901760, %v14421_v17 }
 0x4fc   : > { %v11909_v4 = vpack.c.bf16 %v14959_v15, %v14958_v63  ;;  %v11915_v13 = vpack.c.bf16 %v14963_v60, %v14962_v30 }
 0x4fd   : > { %11904 = vmatpush3.bf16.msra.mxu0 %v11903_v22  ;;  %v11911_v43 = vpack.c.bf16 %v14961_v36, %v14960_v46 }
 0x4fe   : > { %11944 = vmatpush3.bf16.msra.mxu1 %v14550_v56  ;;  %11906 = vmatprep.subr.bf16.mxu0 %v11905_v31 }
 0x4ff   : > { %11946 = vmatprep.subr.bf16.mxu1 %v14557_v0 }
 0x501   : > { %11908 = vmatpush3.bf16.msra.mxu0 %v11907_v1 }
 0x502   : > { %11948 = vmatpush3.bf16.msra.mxu1 %v14560_v51  ;;  %11910 = vmatprep.subr.bf16.mxu0 %v11909_v4 }
 0x505   : > { %9328 = vmatmul.mubr.f32.vlgmr.msra.gmra.mrb[20].mxu1 %v14581_v41  ;;  %11912 = vmatpush3.bf16.msra.mxu0 %v11911_v43 }
 0x506   : > { %11914 = vmatprep.subr.bf16.mxu0 %v11913_v49 }
 0x509   : > { %11916 = vmatpush3.bf16.msra.mxu0 %v11915_v13 }
 0x50c   : > { %9224 = vmatmul.mubr.f32.vlgmr.msra.gmra.mrb[20].mxu0 %v14581_v41 }
 0x597   : > { %v9982_v50 = vpop.f32.mrb[16].mxu1 }
 0x598   : > { %v9983_v17 = vpop.f32.mrb[17].mxu1 }
 0x599   : > { %v9984_v56 = vadd.f32 %v9983_v17, %v9982_v50 }
 0x59f   : > { %v9947_v0 = vpop.f32.mrb[16].mxu0 }
 0x5a0   : > { %v9948_v57 = vpop.f32.mrb[17].mxu0 }
 0x5a1   : > { %v9949_v59 = vadd.f32 %v9948_v57, %v9947_v0 }
 0x5a3   : > { %v8580_v44 = vadd.f32 %v9949_v59, %v9428_v53 }
 0x5a5   : > { %v8812_v10 = vadd.f32 %v9984_v56, %v8580_v44 }
 0x5b7   : > { %v10052_v9 = vpop.f32.mrb[18].mxu1 }
 0x5b8   : > { %v10053_v51 = vpop.f32.mrb[19].mxu1 }
 0x5b9   : > { %v10054_v25 = vadd.f32 %v10053_v51, %v10052_v9 }
 0x5bf   : > { %v10017_v47 = vpop.f32.mrb[18].mxu0 }
 0x5c0   : > { %v10018_v38 = vpop.f32.mrb[19].mxu0 }
 0x5c1   : > { %v10019_v41 = vadd.f32 %v10018_v38, %v10017_v47 }
 0x5c3   : > { %v8950_v5 = vadd.f32 %v10019_v41, %v8812_v10 }
 0x5c5   : > { %v9058_v12 = vadd.f32 %v10054_v25, %v8950_v5 }
 0x5d8   : > { %v10122_v37 = vpop.f32.mrb[20].mxu1 }
 0x5d9   : > { %v10123_v45 = vpop.f32.mrb[21].mxu1 }
 0x5da   : > { %v10124_v33 = vadd.f32 %v10123_v45, %v10122_v37 }
 0x5df   : > { %v10087_v20 = vpop.f32.mrb[20].mxu0 }
 0x5e0   : > { %v10088_v21 = vpop.f32.mrb[21].mxu0 }
 0x5e1   : > { %v10089_v28 = vadd.f32 %v10088_v21, %v10087_v20 }
 0x5e3   : > { %v9226_v6 = vadd.f32 %v10089_v28, %v9058_v12 }
 0x5e5   : > { %v9330_v16 = vadd.f32 %v10124_v33, %v9226_v6 }
 0x5e7   : > { %9333 = vst.msk [vmem:[%s243_s29] sm:$0xff] %vm317_vm1, %v9330_v16 }
 0x5e8   : > { %12282 = shalt.err (!%p12279_p1)
}
 0x5e9   : > { %s12283_s23 = scalar_lea.hbm %s14736_s16, 128  ;;  %s12287_s17 = scalar_lea.hbm %s14785_s5, 384 }
 0x5ea   : > { %p12284_p3 = scmp.ne.s32.totalorder %s14736_s16, %s12283_s23  ;;  %p12288_p0 = scmp.lt.u32.totalorder %s14736_s16, %s14785_s5 }
 0x5eb   : > { %p12289_p2 = scmp.lt.u32.totalorder %s12287_s17, %s12283_s23  ;;  %p12291_p6 = scmp.lt.u32.totalorder %s12283_s23, %s14736_s16 }
 0x5ec   : > { %p12285_p4 = pnand %p12284_p3, %p14964_p10 }
 0x5ed   : > { %p12290_p7 = por %p12289_p2, %p12288_p0 }
 0x5ee   : > { %p12286_p5 = pneg %p12285_p4 }
 0x5ef   : > { %p12292_p11 = por %p12291_p6, %p12290_p7 }
 0x5f1   : > { %p12293_p12 = pnand %p12292_p11, %p12286_p5 }
 0x5f3   : > { %12296 = shalt.err (!%p12293_p12)
}
 0x5f4   : > { %12119 = dma.vmem_to_hbm [thread:$0]  (%p14964_p10), %s14738_s12, 128, %s14736_s16, %s9335_s8  }
 0x5f5 PF: > { %p12130_p8 = scmp.ge.s32.totalorder %s12335_s21, 2  ;;  %s9360_s28 = sand.u32 1, %s12323_s18  }
 0x5f6   : > { %p14965_p9 = scmp.ne.s32.totalorder %s14871_s6, 0  ;;  %s9361_s29 = scalar_lea.sflag [#allocation4], %s9360_s28 }
 0x5f8   : > { %p12126_p13 = pnand %p12130_p8, %p14965_p9 }
 0x5fa   : > { %12318 = dma.done.wait (!%p12126_p13), %s9361_s29, 128  }
 0x5fb   : > { %12320 = vsyncadd (!%p12126_p13), %s9361_s29, 4294967168  ;;  %p18_p1 = scmp.ge.s32.totalorder %s12405_s24, 5   ;;  %s14966_s18 = smov %s12327_s19 }
 0x5fc   : > { %s14967_s19 = smov %s12331_s20  ;;  %s14968_s20 = smov %s12417_s27 }
 0x5fd   : > { %s14969_s21 = smov %s12405_s24  ;;  %20 = sbr.rel (!%p18_p1) target bundleno = 5 (0x5), region = 85 }
 0x604   :  { %9366 = vsyncpa [#allocation3], 1 }
 0x605   :  { %9368 = vsyncpa [#allocation3 + $0x1], 1 }
 0x606   :  { %9369 = vsyncpa [#allocation4], 1 }
 0x607   :  { %9371 = vsyncpa [#allocation4 + $0x1], 1 }

</bundles_post_ra>
